<compile_context>
chip_gen: v7x
topology: tpu7x:2x2x1
jax: 0.10.0
libtpu: 0.0.40
codegen_flags: <defaults>
</compile_context>

<pallas_src>
import functools

import jax
import jax.numpy as jnp
import numpy as np
from jax import lax
from jax.experimental import pallas as pl
from jax.experimental.pallas import tpu as pltpu

INI = 0.01


def _round_up(x, m):
    return (x + m - 1) // m * m


def _vmem_limit_bytes():
    """~3/4 of physical VMEM (96 MiB on v5e/v6e, 48 MiB on v7x)."""
    try:
        cap = int(pltpu.get_tpu_info().vmem_capacity_bytes)
        return int(min(max(cap * 3 // 4, 16 << 20), 100 << 20))
    except Exception:
        return 32 << 20


def _pick_time_chunk(T, B, D, H, vmem_budget, max_chunk=128):
    """Largest time chunk whose per-chunk VMEM footprint fits the budget."""
    G = 4 * H
    # per chunk-timestep: bf16 x block (x2 buffers) + bf16 out block (x2)
    #                     + f32 gates scratch + f32 h scratch.
    per_t = B * (2 * 2 * D + 2 * 2 * H + 4 * G + 4 * H)
    # chunk-invariant residents: bf16 weights (x2 buffers), f32 bias/h0/c0 (x2).
    fixed = 2 * 2 * G * (D + H) + 2 * 4 * (G + 2 * B * H)
    avail = max(vmem_budget // 2 - fixed, per_t)
    return int(max(1, min(max_chunk, T, avail // per_t)))


def _permute_gates(w, H):
    """PyTorch gate order (i, f, g, o) -> kernel order (i, f, o, g)."""
    return jnp.concatenate(
        [w[..., 0:2 * H], w[..., 3 * H:4 * H], w[..., 2 * H:3 * H]], axis=-1)


# -----------------------------------------------------------------------------
# Pallas kernel: one LSTM layer, both directions, chunked over (padded) time.
#   grid = (num_dir, C)          C = Tp // Tc, Tp = padded sequence length
#   x_ref    : (Tc*B, D)   bf16  raw input chunk (time-major, flattened with B)
#   w_ih_ref : (1, D, 4H)  bf16  input weights, resident per direction
#   w_hh_ref : (1, H, 4H)  bf16  recurrent weights, resident per direction
#   b_ref    : (1, 1, 4H)  f32   b_ih + b_hh
#   h0/c0    : (1, B, H)   f32   initial states
#   out_ref  : (1, Tc*B, H) bf16 hidden states, original time order
# -----------------------------------------------------------------------------
def _lstm_layer_kernel(x_ref, w_ih_ref, w_hh_ref, b_ref, h0_ref, c0_ref,
                       out_ref, gx_st, hs_st, h_st, c_st,
                       *, Tc, B, H, T_real, masked, unroll):
    d = pl.program_id(0)                 # 0 = forward, 1 = backward
    c = pl.program_id(1)                 # grid step along time chunks
    C = pl.num_programs(1)
    # original time-chunk this grid step touches (backward walks chunks in reverse)
    chunk = c * (1 - 2 * d) + d * (C - 1)

    @pl.when(c == 0)
    def _():
        h_st[d] = h0_ref[0]
        c_st[d] = c0_ref[0]

    # Fused input projection: one (Tc*B, D) @ (D, 4H) MXU GEMM per chunk.
    gx_st[...] = jnp.dot(x_ref[...], w_ih_ref[0],
                         preferred_element_type=jnp.float32) + b_ref[0]

    w_hh = w_hh_ref[0]                   # (H, 4H) bf16, resident across the chunk
    # TODO(synk): keep w_hh loaded in the MXU across the chunk via
    #             pltpu.matmul_push_rhs / matmul_acc_lhs / matmul_pop.

    def step(i, carry):
        # forward processes pos = i, backward pos = Tc-1-i (original in-chunk order)
        pos = i + d * (Tc - 1 - 2 * i)
        row = pl.multiple_of(pos * B, B)
        gates = gx_st[pl.ds(row, B), :] + jnp.dot(
            h_st[d].astype(w_hh.dtype), w_hh, preferred_element_type=jnp.float32)
        # gate layout (i, f, o, g): one sigmoid over 3H lanes, one tanh over H.
        sig = jax.nn.sigmoid(gates[:, :3 * H])
        i_g = sig[:, 0:H]
        f_g = sig[:, H:2 * H]
        o_g = sig[:, 2 * H:3 * H]
        g_g = jnp.tanh(gates[:, 3 * H:])
        c_new = f_g * c_st[d] + i_g * g_g
        h_new = o_g * jnp.tanh(c_new)

        def commit():
            c_st[d] = c_new
            h_st[d] = h_new
            hs_st[pl.ds(row, B), :] = h_new

        if masked:
            # Skip padded timesteps (t >= T_real) so the backward carry is not
            # polluted by the zero-padded tail of the sequence.
            pl.when(chunk * Tc + pos < T_real)(commit)
        else:
            commit()
        return carry

    lax.fori_loop(0, Tc, step, 0, unroll=unroll)
    # Single bulk f32 -> bf16 cast + store for the whole chunk.
    out_ref[0] = hs_st[...].astype(out_ref.dtype)


def run_lstm_layer(x, w_ih, w_hh, b, h0, c0, *, vmem_limit):
    """x: (T, B, D) bf16; w_ih: (num_dir, D, 4H) bf16; w_hh: (num_dir, H, 4H) bf16;
    b: (num_dir, 1, 4H) f32; h0/c0: (num_dir, B, H) f32.
    Returns hidden states (num_dir, T, B, H) bf16 in original time order."""
    T, B, D = x.shape
    num_dir, H, G = w_hh.shape
    Tc = _pick_time_chunk(T, B, D, H, vmem_limit)
    C = (T + Tc - 1) // Tc
    Tp = C * Tc
    if Tp != T:
        x = jnp.pad(x, ((0, Tp - T), (0, 0), (0, 0)))
    x_flat = x.reshape(Tp * B, D)

    # d == 0: chunk c; d == 1: chunk C-1-c (backward walks the sequence from the
    # end; outputs land back in original time order -> no HBM [::-1] copies).
    def x_map(d, c):
        return (c * (1 - 2 * d) + d * (C - 1), 0)

    def out_map(d, c):
        return (d, c * (1 - 2 * d) + d * (C - 1), 0)

    kernel = functools.partial(
        _lstm_layer_kernel, Tc=Tc, B=B, H=H, T_real=T, masked=(Tp != T),
        unroll=min(Tc, 8))

    out = pl.pallas_call(
        kernel,
        out_shape=jax.ShapeDtypeStruct((num_dir, Tp * B, H), jnp.bfloat16),
        grid_spec=pltpu.PrefetchScalarGridSpec(
            num_scalar_prefetch=0,
            grid=(num_dir, C),
            in_specs=[
                pl.BlockSpec((Tc * B, D), x_map),
                # grid-invariant along time; TODO(synk): pl.Buffered(1) at large H.
                pl.BlockSpec((1, D, G), lambda d, c: (d, 0, 0)),
                pl.BlockSpec((1, H, G), lambda d, c: (d, 0, 0)),
                pl.BlockSpec((1, 1, G), lambda d, c: (d, 0, 0)),
                pl.BlockSpec((1, B, H), lambda d, c: (d, 0, 0)),
                pl.BlockSpec((1, B, H), lambda d, c: (d, 0, 0)),
            ],
            out_specs=pl.BlockSpec((1, Tc * B, H), out_map),
            scratch_shapes=[
                pltpu.VMEM((Tc * B, G), jnp.float32),       # fused x-projection gates
                pltpu.VMEM((Tc * B, H), jnp.float32),       # per-chunk h staging
                pltpu.VMEM((num_dir, B, H), jnp.float32),   # h carry (per direction)
                pltpu.VMEM((num_dir, B, H), jnp.float32),   # c carry (per direction)
            ],
        ),
        compiler_params=pltpu.CompilerParams(
            # directions independent (carries are per-direction scratch);
            # time recurrence carried across chunks -> arbitrary.
            # TODO(synk): pltpu.CORE_PARALLEL on the direction axis for v7x.
            dimension_semantics=("parallel", "arbitrary"),
            vmem_limit_bytes=vmem_limit),
    )(x_flat, w_ih, w_hh, b, h0, c0)

    return out.reshape(num_dir, Tp, B, H)[:, :T]


# -----------------------------------------------------------------------------
# Parameters (mirrors nn.LSTM + the two init params); canonical PyTorch gate
# order (i, f, g, o), stored pre-transposed and stacked per direction.
# -----------------------------------------------------------------------------
def init_lstm_encoder_params(key, input_dim, n_hidden, n_layer, bidirectional):
    num_dir = 2 if bidirectional else 1
    k_init_h, k_init_c, k_layers = jax.random.split(key, 3)

    params = {
        "init_h": jax.random.uniform(
            k_init_h, (n_layer * num_dir, n_hidden), jnp.float32, -INI, INI),
        "init_c": jax.random.uniform(
            k_init_c, (n_layer * num_dir, n_hidden), jnp.float32, -INI, INI),
        "layers": [],
    }

    bound = 1.0 / np.sqrt(n_hidden)     # PyTorch nn.LSTM default init range
    lkeys = jax.random.split(k_layers, n_layer * num_dir * 4)
    ki = 0
    for layer in range(n_layer):
        d_in = input_dim if layer == 0 else n_hidden * num_dir
        w_ih_l, w_hh_l, b_l = [], [], []
        for _ in range(num_dir):
            w_ih = jax.random.uniform(
                lkeys[ki], (4 * n_hidden, d_in), jnp.float32, -bound, bound)
            w_hh = jax.random.uniform(
                lkeys[ki + 1], (4 * n_hidden, n_hidden), jnp.float32, -bound, bound)
            b_ih = jax.random.uniform(
                lkeys[ki + 2], (4 * n_hidden,), jnp.float32, -bound, bound)
            b_hh = jax.random.uniform(
                lkeys[ki + 3], (4 * n_hidden,), jnp.float32, -bound, bound)
            ki += 4
            w_ih_l.append(w_ih.T)        # (d_in, 4H)
            w_hh_l.append(w_hh.T)        # (H, 4H)
            b_l.append(b_ih + b_hh)      # (4H,)
        params["layers"].append(
            (jnp.stack(w_ih_l), jnp.stack(w_hh_l), jnp.stack(b_l)))
    return params


# -----------------------------------------------------------------------------
# Full LSTMEncoder.forward (in_lens=None path; inference mode)
# -----------------------------------------------------------------------------
def lstm_encoder_forward(input_, params, n_layer, bidirectional):
    """input_: [batch, seq, input_dim] -> [batch, seq, n_hidden * num_dir]."""
    B0 = input_.shape[0]
    num_dir = 2 if bidirectional else 1
    H = params["init_h"].shape[1]
    vmem_limit = _vmem_limit_bytes()

    # sequence-major; pad batch to a multiple of 8 sublanes; bf16 matmul/DMA path.
    x = jnp.transpose(input_, (1, 0, 2))                  # (T, B0, D)
    B = max(8, _round_up(B0, 8))
    if B != B0:
        x = jnp.pad(x, ((0, 0), (0, B - B0), (0, 0)))
    layer_in = x.astype(jnp.bfloat16)

    for layer in range(n_layer):
        w_ih_t, w_hh_t, bias = params["layers"][layer]
        # gate-order permutation + bf16 cast for the matmul path.
        w_ih = _permute_gates(w_ih_t, H).astype(jnp.bfloat16)
        w_hh = _permute_gates(w_hh_t, H).astype(jnp.bfloat16)
        b = _permute_gates(bias, H)[:, None, :].astype(jnp.float32)

        sl = slice(layer * num_dir, (layer + 1) * num_dir)
        h0 = jnp.broadcast_to(params["init_h"][sl][:, None, :],
                              (num_dir, B, H)).astype(jnp.float32)
        c0 = jnp.broadcast_to(params["init_c"][sl][:, None, :],
                              (num_dir, B, H)).astype(jnp.float32)

        out = run_lstm_layer(layer_in, w_ih, w_hh, b, h0, c0,
                             vmem_limit=vmem_limit)       # (num_dir, T, B, H) bf16
        layer_in = (jnp.concatenate([out[0], out[1]], axis=-1)
                    if num_dir == 2 else out[0])          # (T, B, num_dir*H)
        # TODO(synk): inter-layer dropout omitted (eval/inference forward).
        # TODO(synk): in_lens packed-sequence path not implemented.

    out = jnp.transpose(layer_in, (1, 0, 2))              # (B, T, num_dir*H)
    return out[:B0].astype(jnp.float32)


# -----------------------------------------------------------------------------
# Pure-JAX f32 reference (lax.scan) for correctness checking.
# -----------------------------------------------------------------------------
def _ref_layer(x_seq, h0, c0, w_ih_t, w_hh_t, b):
    H = h0.shape[1]

    def step(carry, x_t):
        h, c = carry
        gates = x_t @ w_ih_t + h @ w_hh_t + b
        i = jax.nn.sigmoid(gates[:, 0:H])
        f = jax.nn.sigmoid(gates[:, H:2 * H])
        g = jnp.tanh(gates[:, 2 * H:3 * H])
        o = jax.nn.sigmoid(gates[:, 3 * H:4 * H])
        c = f * c + i * g
        h = o * jnp.tanh(c)
        return (h, c), h

    (_, _), hs = lax.scan(step, (h0, c0), x_seq)
    return hs


def lstm_encoder_forward_ref(input_, params, n_layer, bidirectional):
    B = input_.shape[0]
    num_dir = 2 if bidirectional else 1
    n_hidden = params["init_h"].shape[1]
    layer_in = jnp.transpose(input_, (1, 0, 2)).astype(jnp.float32)
    for layer in range(n_layer):
        w_ih_t, w_hh_t, b = params["layers"][layer]
        dir_outs = []
        for d in range(num_dir):
            idx = layer * num_dir + d
            h0 = jnp.broadcast_to(params["init_h"][idx][None, :], (B, n_hidden))
            c0 = jnp.broadcast_to(params["init_c"][idx][None, :], (B, n_hidden))
            x_dir = layer_in if d == 0 else layer_in[::-1]
            out = _ref_layer(x_dir, h0, c0, w_ih_t[d], w_hh_t[d], b[d][None, :])
            if d == 1:
                out = out[::-1]
            dir_outs.append(out)
        layer_in = (jnp.concatenate(dir_outs, axis=-1)
                    if num_dir == 2 else dir_outs[0])
    return jnp.transpose(layer_in, (1, 0, 2))


if __name__ == "__main__":
    batch, seq, input_dim = 2, 8, 16
    n_hidden, n_layer, bidirectional, dropout = 32, 2, True, 0.0

    key = jax.random.PRNGKey(0)
    k_param, k_x = jax.random.split(key)
    params = init_lstm_encoder_params(
        k_param, input_dim, n_hidden, n_layer, bidirectional)

    x = jax.random.normal(k_x, (batch, seq, input_dim), jnp.float32)

    fwd = jax.jit(functools.partial(lstm_encoder_forward,
                                    n_layer=n_layer,
                                    bidirectional=bidirectional))
    out = jax.block_until_ready(fwd(x, params))

    ref = jax.block_until_ready(
        lstm_encoder_forward_ref(x, params, n_layer, bidirectional))

    assert out.shape == (batch, seq, n_hidden * (2 if bidirectional else 1)), out.shape
    # bf16 matmul / activation path vs. f32 reference -> looser tolerance.
    np.testing.assert_allclose(np.asarray(out), np.asarray(ref),
                               rtol=2e-2, atol=4e-2)
    print("KERNEL_OK")
</pallas_src>

<mosaic_0001>
module attributes {stable_mosaic.version = 11 : i64} {
  func.func @_lstm_layer_kernel(%arg0: i32, %arg1: i32, %arg2: memref<64x64xbf16, #tpu.memory_space<vmem>>, %arg3: memref<1x64x128xbf16, #tpu.memory_space<vmem>>, %arg4: memref<1x32x128xbf16, #tpu.memory_space<vmem>>, %arg5: memref<1x1x128xf32, #tpu.memory_space<vmem>>, %arg6: memref<1x8x32xf32, #tpu.memory_space<vmem>>, %arg7: memref<1x8x32xf32, #tpu.memory_space<vmem>>, %arg8: memref<1x64x32xbf16, #tpu.memory_space<vmem>>, %arg9: memref<64x128xf32, #tpu.memory_space<vmem>>, %arg10: memref<64x32xf32, #tpu.memory_space<vmem>>, %arg11: memref<2x8x32xf32, #tpu.memory_space<vmem>>, %arg12: memref<2x8x32xf32, #tpu.memory_space<vmem>>) attributes {dimension_semantics = [#tpu.dimension_semantics<parallel>, #tpu.dimension_semantics<arbitrary>], iteration_bounds = array<i64: 2, 1>, scalar_prefetch = 0 : i64, scratch_operands = 4 : i64, tpu.core_type = #tpu.core_type<tc>, window_params = [{transform_indices = @transform_0, window_bounds = array<i64: 64, 64>}, {transform_indices = @transform_1, window_bounds = array<i64: 1, 64, 128>}, {transform_indices = @transform_2, window_bounds = array<i64: 1, 32, 128>}, {transform_indices = @transform_3, window_bounds = array<i64: 1, 1, 128>}, {transform_indices = @transform_4, window_bounds = array<i64: 1, 8, 32>}, {transform_indices = @transform_5, window_bounds = array<i64: 1, 8, 32>}, {transform_indices = @transform_6, window_bounds = array<i64: 1, 64, 32>}]} {
    %c0_i32 = arith.constant 0 : i32
    %0 = arith.cmpi eq, %arg1, %c0_i32 : i32
    %1 = arith.extui %0 : i1 to i32
    %c0_i32_0 = arith.constant 0 : i32
    %2 = arith.cmpi ne, %1, %c0_i32_0 : i32
    scf.if %2 {
      %c0_139 = arith.constant 0 : index
      %c0_140 = arith.constant 0 : index
      %c0_141 = arith.constant 0 : index
      %363 = vector.load %arg6[%c0_139, %c0_140, %c0_141] : memref<1x8x32xf32, #tpu.memory_space<vmem>>, vector<1x8x32xf32>
      %364 = vector.shape_cast %363 : vector<1x8x32xf32> to vector<8x32xf32>
      %365 = arith.index_cast %arg0 : i32 to index
      %c0_142 = arith.constant 0 : index
      %c0_143 = arith.constant 0 : index
      %366 = vector.load %arg11[%365, %c0_142, %c0_143] : memref<2x8x32xf32, #tpu.memory_space<vmem>>, vector<1x8x32xf32>
      %367 = vector.shape_cast %366 : vector<1x8x32xf32> to vector<8x32xf32>
      %368 = vector.shape_cast %364 : vector<8x32xf32> to vector<1x8x32xf32>
      tpu.vector_store %arg11[%365, %c0_142, %c0_143], %368 {strides = array<i32>} : memref<2x8x32xf32, #tpu.memory_space<vmem>>, vector<1x8x32xf32>,
      %c0_144 = arith.constant 0 : index
      %c0_145 = arith.constant 0 : index
      %c0_146 = arith.constant 0 : index
      %369 = vector.load %arg7[%c0_144, %c0_145, %c0_146] : memref<1x8x32xf32, #tpu.memory_space<vmem>>, vector<1x8x32xf32>
      %370 = vector.shape_cast %369 : vector<1x8x32xf32> to vector<8x32xf32>
      %371 = arith.index_cast %arg0 : i32 to index
      %c0_147 = arith.constant 0 : index
      %c0_148 = arith.constant 0 : index
      %372 = vector.load %arg12[%371, %c0_147, %c0_148] : memref<2x8x32xf32, #tpu.memory_space<vmem>>, vector<1x8x32xf32>
      %373 = vector.shape_cast %372 : vector<1x8x32xf32> to vector<8x32xf32>
      %374 = vector.shape_cast %370 : vector<8x32xf32> to vector<1x8x32xf32>
      tpu.vector_store %arg12[%371, %c0_147, %c0_148], %374 {strides = array<i32>} : memref<2x8x32xf32, #tpu.memory_space<vmem>>, vector<1x8x32xf32>,
    } else {
    }
    %c0 = arith.constant 0 : index
    %c0_1 = arith.constant 0 : index
    %3 = vector.load %arg2[%c0, %c0_1] : memref<64x64xbf16, #tpu.memory_space<vmem>>, vector<64x64xbf16>
    %c0_2 = arith.constant 0 : index
    %c0_3 = arith.constant 0 : index
    %c0_4 = arith.constant 0 : index
    %4 = vector.load %arg3[%c0_2, %c0_3, %c0_4] : memref<1x64x128xbf16, #tpu.memory_space<vmem>>, vector<1x64x128xbf16>
    %5 = vector.shape_cast %4 : vector<1x64x128xbf16> to vector<64x128xbf16>
    %cst = arith.constant dense<0.000000e+00> : vector<64x128xf32>
    %6 = tpu.matmul %3, %5, %cst {dimension_numbers = #tpu.dot_dimension_numbers<[1], [0], [0], [1], [0, 0, 1, 1], [], []>} : vector<64x64xbf16>, vector<64x128xbf16>, vector<64x128xf32> -> vector<64x128xf32>
    %c0_5 = arith.constant 0 : index
    %c0_6 = arith.constant 0 : index
    %c0_7 = arith.constant 0 : index
    %7 = vector.load %arg5[%c0_5, %c0_6, %c0_7] : memref<1x1x128xf32, #tpu.memory_space<vmem>>, vector<1x1x128xf32>
    %8 = vector.shape_cast %7 : vector<1x1x128xf32> to vector<1x128xf32>
    %9 = vector.broadcast %8 : vector<1x128xf32> to vector<64x128xf32>
    %10 = arith.addf %6, %9 : vector<64x128xf32>
    %c0_8 = arith.constant 0 : index
    %c0_9 = arith.constant 0 : index
    %11 = vector.load %arg9[%c0_8, %c0_9] : memref<64x128xf32, #tpu.memory_space<vmem>>, vector<64x128xf32>
    tpu.vector_store %arg9[%c0_8, %c0_9], %10 {strides = array<i32>} : memref<64x128xf32, #tpu.memory_space<vmem>>, vector<64x128xf32>,
    %c0_10 = arith.constant 0 : index
    %c0_11 = arith.constant 0 : index
    %c0_12 = arith.constant 0 : index
    %12 = vector.load %arg4[%c0_10, %c0_11, %c0_12] : memref<1x32x128xbf16, #tpu.memory_space<vmem>>, vector<1x32x128xbf16>
    %13 = vector.shape_cast %12 : vector<1x32x128xbf16> to vector<32x128xbf16>
    %c0_i32_13 = arith.constant 0 : i32
    %c2_i32 = arith.constant 2 : i32
    %14 = arith.muli %c2_i32, %c0_i32_13 : i32
    %c7_i32 = arith.constant 7 : i32
    %15 = arith.subi %c7_i32, %14 : i32
    %16 = arith.muli %arg0, %15 : i32
    %17 = arith.addi %c0_i32_13, %16 : i32
    %c8_i32 = arith.constant 8 : i32
    %18 = arith.muli %17, %c8_i32 : i32
    %19 = tpu.assume_multiple %18, 8 : i32
    %20 = arith.index_cast %19 : i32 to index
    %c0_14 = arith.constant 0 : index
    %21 = vector.load %arg9[%20, %c0_14] : memref<64x128xf32, #tpu.memory_space<vmem>>, vector<8x128xf32>
    %22 = arith.index_cast %arg0 : i32 to index
    %c0_15 = arith.constant 0 : index
    %c0_16 = arith.constant 0 : index
    %23 = vector.load %arg11[%22, %c0_15, %c0_16] : memref<2x8x32xf32, #tpu.memory_space<vmem>>, vector<1x8x32xf32>
    %24 = vector.shape_cast %23 : vector<1x8x32xf32> to vector<8x32xf32>
    %25 = arith.truncf %24 : vector<8x32xf32> to vector<8x32xbf16>
    %cst_17 = arith.constant dense<0.000000e+00> : vector<8x128xf32>
    %26 = tpu.matmul %25, %13, %cst_17 {dimension_numbers = #tpu.dot_dimension_numbers<[1], [0], [0], [1], [0, 0, 1, 1], [], []>} : vector<8x32xbf16>, vector<32x128xbf16>, vector<8x128xf32> -> vector<8x128xf32>
    %27 = arith.addf %21, %26 : vector<8x128xf32>
    %28 = vector.extract_strided_slice %27 {offsets = [0, 0], sizes = [8, 96], strides = [1, 1]} : vector<8x128xf32> to vector<8x96xf32>
    %29 = arith.negf %28 : vector<8x96xf32>
    %30 = math.exp %29 : vector<8x96xf32>
    %cst_18 = arith.constant 1.000000e+00 : f32
    %31 = vector.broadcast %cst_18 : f32 to vector<8x96xf32>
    %32 = arith.addf %31, %30 : vector<8x96xf32>
    %33 = arith.divf %31, %32 : vector<8x96xf32>
    %34 = vector.extract_strided_slice %33 {offsets = [0, 0], sizes = [8, 32], strides = [1, 1]} : vector<8x96xf32> to vector<8x32xf32>
    %35 = vector.extract_strided_slice %33 {offsets = [0, 32], sizes = [8, 32], strides = [1, 1]} : vector<8x96xf32> to vector<8x32xf32>
    %36 = vector.extract_strided_slice %33 {offsets = [0, 64], sizes = [8, 32], strides = [1, 1]} : vector<8x96xf32> to vector<8x32xf32>
    %37 = vector.extract_strided_slice %27 {offsets = [0, 96], sizes = [8, 32], strides = [1, 1]} : vector<8x128xf32> to vector<8x32xf32>
    %38 = math.tanh %37 : vector<8x32xf32>
    %39 = arith.index_cast %arg0 : i32 to index
    %c0_19 = arith.constant 0 : index
    %c0_20 = arith.constant 0 : index
    %40 = vector.load %arg12[%39, %c0_19, %c0_20] : memref<2x8x32xf32, #tpu.memory_space<vmem>>, vector<1x8x32xf32>
    %41 = vector.shape_cast %40 : vector<1x8x32xf32> to vector<8x32xf32>
    %42 = arith.mulf %35, %41 : vector<8x32xf32>
    %43 = arith.mulf %34, %38 : vector<8x32xf32>
    %44 = arith.addf %42, %43 : vector<8x32xf32>
    %45 = math.tanh %44 : vector<8x32xf32>
    %46 = arith.mulf %36, %45 : vector<8x32xf32>
    %47 = arith.index_cast %arg0 : i32 to index
    %c0_21 = arith.constant 0 : index
    %c0_22 = arith.constant 0 : index
    %48 = vector.load %arg12[%47, %c0_21, %c0_22] : memref<2x8x32xf32, #tpu.memory_space<vmem>>, vector<1x8x32xf32>
    %49 = vector.shape_cast %48 : vector<1x8x32xf32> to vector<8x32xf32>
    %50 = vector.shape_cast %44 : vector<8x32xf32> to vector<1x8x32xf32>
    tpu.vector_store %arg12[%47, %c0_21, %c0_22], %50 {strides = array<i32>} : memref<2x8x32xf32, #tpu.memory_space<vmem>>, vector<1x8x32xf32>,
    %51 = arith.index_cast %arg0 : i32 to index
    %c0_23 = arith.constant 0 : index
    %c0_24 = arith.constant 0 : index
    %52 = vector.load %arg11[%51, %c0_23, %c0_24] : memref<2x8x32xf32, #tpu.memory_space<vmem>>, vector<1x8x32xf32>
    %53 = vector.shape_cast %52 : vector<1x8x32xf32> to vector<8x32xf32>
    %54 = vector.shape_cast %46 : vector<8x32xf32> to vector<1x8x32xf32>
    tpu.vector_store %arg11[%51, %c0_23, %c0_24], %54 {strides = array<i32>} : memref<2x8x32xf32, #tpu.memory_space<vmem>>, vector<1x8x32xf32>,
    %55 = arith.index_cast %19 : i32 to index
    %c0_25 = arith.constant 0 : index
    %56 = vector.load %arg10[%55, %c0_25] : memref<64x32xf32, #tpu.memory_space<vmem>>, vector<8x32xf32>
    tpu.vector_store %arg10[%55, %c0_25], %46 {strides = array<i32>} : memref<64x32xf32, #tpu.memory_space<vmem>>, vector<8x32xf32>,
    %c1_i32 = arith.constant 1 : i32
    %c2_i32_26 = arith.constant 2 : i32
    %57 = arith.muli %c2_i32_26, %c1_i32 : i32
    %c7_i32_27 = arith.constant 7 : i32
    %58 = arith.subi %c7_i32_27, %57 : i32
    %59 = arith.muli %arg0, %58 : i32
    %60 = arith.addi %c1_i32, %59 : i32
    %c8_i32_28 = arith.constant 8 : i32
    %61 = arith.muli %60, %c8_i32_28 : i32
    %62 = tpu.assume_multiple %61, 8 : i32
    %63 = arith.index_cast %62 : i32 to index
    %c0_29 = arith.constant 0 : index
    %64 = vector.load %arg9[%63, %c0_29] : memref<64x128xf32, #tpu.memory_space<vmem>>, vector<8x128xf32>
    %65 = arith.index_cast %arg0 : i32 to index
    %c0_30 = arith.constant 0 : index
    %c0_31 = arith.constant 0 : index
    %66 = vector.load %arg11[%65, %c0_30, %c0_31] : memref<2x8x32xf32, #tpu.memory_space<vmem>>, vector<1x8x32xf32>
    %67 = vector.shape_cast %66 : vector<1x8x32xf32> to vector<8x32xf32>
    %68 = arith.truncf %67 : vector<8x32xf32> to vector<8x32xbf16>
    %cst_32 = arith.constant dense<0.000000e+00> : vector<8x128xf32>
    %69 = tpu.matmul %68, %13, %cst_32 {dimension_numbers = #tpu.dot_dimension_numbers<[1], [0], [0], [1], [0, 0, 1, 1], [], []>} : vector<8x32xbf16>, vector<32x128xbf16>, vector<8x128xf32> -> vector<8x128xf32>
    %70 = arith.addf %64, %69 : vector<8x128xf32>
    %71 = vector.extract_strided_slice %70 {offsets = [0, 0], sizes = [8, 96], strides = [1, 1]} : vector<8x128xf32> to vector<8x96xf32>
    %72 = arith.negf %71 : vector<8x96xf32>
    %73 = math.exp %72 : vector<8x96xf32>
    %cst_33 = arith.constant 1.000000e+00 : f32
    %74 = vector.broadcast %cst_33 : f32 to vector<8x96xf32>
    %75 = arith.addf %74, %73 : vector<8x96xf32>
    %76 = arith.divf %74, %75 : vector<8x96xf32>
    %77 = vector.extract_strided_slice %76 {offsets = [0, 0], sizes = [8, 32], strides = [1, 1]} : vector<8x96xf32> to vector<8x32xf32>
    %78 = vector.extract_strided_slice %76 {offsets = [0, 32], sizes = [8, 32], strides = [1, 1]} : vector<8x96xf32> to vector<8x32xf32>
    %79 = vector.extract_strided_slice %76 {offsets = [0, 64], sizes = [8, 32], strides = [1, 1]} : vector<8x96xf32> to vector<8x32xf32>
    %80 = vector.extract_strided_slice %70 {offsets = [0, 96], sizes = [8, 32], strides = [1, 1]} : vector<8x128xf32> to vector<8x32xf32>
    %81 = math.tanh %80 : vector<8x32xf32>
    %82 = arith.index_cast %arg0 : i32 to index
    %c0_34 = arith.constant 0 : index
    %c0_35 = arith.constant 0 : index
    %83 = vector.load %arg12[%82, %c0_34, %c0_35] : memref<2x8x32xf32, #tpu.memory_space<vmem>>, vector<1x8x32xf32>
    %84 = vector.shape_cast %83 : vector<1x8x32xf32> to vector<8x32xf32>
    %85 = arith.mulf %78, %84 : vector<8x32xf32>
    %86 = arith.mulf %77, %81 : vector<8x32xf32>
    %87 = arith.addf %85, %86 : vector<8x32xf32>
    %88 = math.tanh %87 : vector<8x32xf32>
    %89 = arith.mulf %79, %88 : vector<8x32xf32>
    %90 = arith.index_cast %arg0 : i32 to index
    %c0_36 = arith.constant 0 : index
    %c0_37 = arith.constant 0 : index
    %91 = vector.load %arg12[%90, %c0_36, %c0_37] : memref<2x8x32xf32, #tpu.memory_space<vmem>>, vector<1x8x32xf32>
    %92 = vector.shape_cast %91 : vector<1x8x32xf32> to vector<8x32xf32>
    %93 = vector.shape_cast %87 : vector<8x32xf32> to vector<1x8x32xf32>
    tpu.vector_store %arg12[%90, %c0_36, %c0_37], %93 {strides = array<i32>} : memref<2x8x32xf32, #tpu.memory_space<vmem>>, vector<1x8x32xf32>,
    %94 = arith.index_cast %arg0 : i32 to index
    %c0_38 = arith.constant 0 : index
    %c0_39 = arith.constant 0 : index
    %95 = vector.load %arg11[%94, %c0_38, %c0_39] : memref<2x8x32xf32, #tpu.memory_space<vmem>>, vector<1x8x32xf32>
    %96 = vector.shape_cast %95 : vector<1x8x32xf32> to vector<8x32xf32>
    %97 = vector.shape_cast %89 : vector<8x32xf32> to vector<1x8x32xf32>
    tpu.vector_store %arg11[%94, %c0_38, %c0_39], %97 {strides = array<i32>} : memref<2x8x32xf32, #tpu.memory_space<vmem>>, vector<1x8x32xf32>,
    %98 = arith.index_cast %62 : i32 to index
    %c0_40 = arith.constant 0 : index
    %99 = vector.load %arg10[%98, %c0_40] : memref<64x32xf32, #tpu.memory_space<vmem>>, vector<8x32xf32>
    tpu.vector_store %arg10[%98, %c0_40], %89 {strides = array<i32>} : memref<64x32xf32, #tpu.memory_space<vmem>>, vector<8x32xf32>,
    %c2_i32_41 = arith.constant 2 : i32
    %c2_i32_42 = arith.constant 2 : i32
    %100 = arith.muli %c2_i32_42, %c2_i32_41 : i32
    %c7_i32_43 = arith.constant 7 : i32
    %101 = arith.subi %c7_i32_43, %100 : i32
    %102 = arith.muli %arg0, %101 : i32
    %103 = arith.addi %c2_i32_41, %102 : i32
    %c8_i32_44 = arith.constant 8 : i32
    %104 = arith.muli %103, %c8_i32_44 : i32
    %105 = tpu.assume_multiple %104, 8 : i32
    %106 = arith.index_cast %105 : i32 to index
    %c0_45 = arith.constant 0 : index
    %107 = vector.load %arg9[%106, %c0_45] : memref<64x128xf32, #tpu.memory_space<vmem>>, vector<8x128xf32>
    %108 = arith.index_cast %arg0 : i32 to index
    %c0_46 = arith.constant 0 : index
    %c0_47 = arith.constant 0 : index
    %109 = vector.load %arg11[%108, %c0_46, %c0_47] : memref<2x8x32xf32, #tpu.memory_space<vmem>>, vector<1x8x32xf32>
    %110 = vector.shape_cast %109 : vector<1x8x32xf32> to vector<8x32xf32>
    %111 = arith.truncf %110 : vector<8x32xf32> to vector<8x32xbf16>
    %cst_48 = arith.constant dense<0.000000e+00> : vector<8x128xf32>
    %112 = tpu.matmul %111, %13, %cst_48 {dimension_numbers = #tpu.dot_dimension_numbers<[1], [0], [0], [1], [0, 0, 1, 1], [], []>} : vector<8x32xbf16>, vector<32x128xbf16>, vector<8x128xf32> -> vector<8x128xf32>
    %113 = arith.addf %107, %112 : vector<8x128xf32>
    %114 = vector.extract_strided_slice %113 {offsets = [0, 0], sizes = [8, 96], strides = [1, 1]} : vector<8x128xf32> to vector<8x96xf32>
    %115 = arith.negf %114 : vector<8x96xf32>
    %116 = math.exp %115 : vector<8x96xf32>
    %cst_49 = arith.constant 1.000000e+00 : f32
    %117 = vector.broadcast %cst_49 : f32 to vector<8x96xf32>
    %118 = arith.addf %117, %116 : vector<8x96xf32>
    %119 = arith.divf %117, %118 : vector<8x96xf32>
    %120 = vector.extract_strided_slice %119 {offsets = [0, 0], sizes = [8, 32], strides = [1, 1]} : vector<8x96xf32> to vector<8x32xf32>
    %121 = vector.extract_strided_slice %119 {offsets = [0, 32], sizes = [8, 32], strides = [1, 1]} : vector<8x96xf32> to vector<8x32xf32>
    %122 = vector.extract_strided_slice %119 {offsets = [0, 64], sizes = [8, 32], strides = [1, 1]} : vector<8x96xf32> to vector<8x32xf32>
    %123 = vector.extract_strided_slice %113 {offsets = [0, 96], sizes = [8, 32], strides = [1, 1]} : vector<8x128xf32> to vector<8x32xf32>
    %124 = math.tanh %123 : vector<8x32xf32>
    %125 = arith.index_cast %arg0 : i32 to index
    %c0_50 = arith.constant 0 : index
    %c0_51 = arith.constant 0 : index
    %126 = vector.load %arg12[%125, %c0_50, %c0_51] : memref<2x8x32xf32, #tpu.memory_space<vmem>>, vector<1x8x32xf32>
    %127 = vector.shape_cast %126 : vector<1x8x32xf32> to vector<8x32xf32>
    %128 = arith.mulf %121, %127 : vector<8x32xf32>
    %129 = arith.mulf %120, %124 : vector<8x32xf32>
    %130 = arith.addf %128, %129 : vector<8x32xf32>
    %131 = math.tanh %130 : vector<8x32xf32>
    %132 = arith.mulf %122, %131 : vector<8x32xf32>
    %133 = arith.index_cast %arg0 : i32 to index
    %c0_52 = arith.constant 0 : index
    %c0_53 = arith.constant 0 : index
    %134 = vector.load %arg12[%133, %c0_52, %c0_53] : memref<2x8x32xf32, #tpu.memory_space<vmem>>, vector<1x8x32xf32>
    %135 = vector.shape_cast %134 : vector<1x8x32xf32> to vector<8x32xf32>
    %136 = vector.shape_cast %130 : vector<8x32xf32> to vector<1x8x32xf32>
    tpu.vector_store %arg12[%133, %c0_52, %c0_53], %136 {strides = array<i32>} : memref<2x8x32xf32, #tpu.memory_space<vmem>>, vector<1x8x32xf32>,
    %137 = arith.index_cast %arg0 : i32 to index
    %c0_54 = arith.constant 0 : index
    %c0_55 = arith.constant 0 : index
    %138 = vector.load %arg11[%137, %c0_54, %c0_55] : memref<2x8x32xf32, #tpu.memory_space<vmem>>, vector<1x8x32xf32>
    %139 = vector.shape_cast %138 : vector<1x8x32xf32> to vector<8x32xf32>
    %140 = vector.shape_cast %132 : vector<8x32xf32> to vector<1x8x32xf32>
    tpu.vector_store %arg11[%137, %c0_54, %c0_55], %140 {strides = array<i32>} : memref<2x8x32xf32, #tpu.memory_space<vmem>>, vector<1x8x32xf32>,
    %141 = arith.index_cast %105 : i32 to index
    %c0_56 = arith.constant 0 : index
    %142 = vector.load %arg10[%141, %c0_56] : memref<64x32xf32, #tpu.memory_space<vmem>>, vector<8x32xf32>
    tpu.vector_store %arg10[%141, %c0_56], %132 {strides = array<i32>} : memref<64x32xf32, #tpu.memory_space<vmem>>, vector<8x32xf32>,
    %c3_i32 = arith.constant 3 : i32
    %c2_i32_57 = arith.constant 2 : i32
    %143 = arith.muli %c2_i32_57, %c3_i32 : i32
    %c7_i32_58 = arith.constant 7 : i32
    %144 = arith.subi %c7_i32_58, %143 : i32
    %145 = arith.muli %arg0, %144 : i32
    %146 = arith.addi %c3_i32, %145 : i32
    %c8_i32_59 = arith.constant 8 : i32
    %147 = arith.muli %146, %c8_i32_59 : i32
    %148 = tpu.assume_multiple %147, 8 : i32
    %149 = arith.index_cast %148 : i32 to index
    %c0_60 = arith.constant 0 : index
    %150 = vector.load %arg9[%149, %c0_60] : memref<64x128xf32, #tpu.memory_space<vmem>>, vector<8x128xf32>
    %151 = arith.index_cast %arg0 : i32 to index
    %c0_61 = arith.constant 0 : index
    %c0_62 = arith.constant 0 : index
    %152 = vector.load %arg11[%151, %c0_61, %c0_62] : memref<2x8x32xf32, #tpu.memory_space<vmem>>, vector<1x8x32xf32>
    %153 = vector.shape_cast %152 : vector<1x8x32xf32> to vector<8x32xf32>
    %154 = arith.truncf %153 : vector<8x32xf32> to vector<8x32xbf16>
    %cst_63 = arith.constant dense<0.000000e+00> : vector<8x128xf32>
    %155 = tpu.matmul %154, %13, %cst_63 {dimension_numbers = #tpu.dot_dimension_numbers<[1], [0], [0], [1], [0, 0, 1, 1], [], []>} : vector<8x32xbf16>, vector<32x128xbf16>, vector<8x128xf32> -> vector<8x128xf32>
    %156 = arith.addf %150, %155 : vector<8x128xf32>
    %157 = vector.extract_strided_slice %156 {offsets = [0, 0], sizes = [8, 96], strides = [1, 1]} : vector<8x128xf32> to vector<8x96xf32>
    %158 = arith.negf %157 : vector<8x96xf32>
    %159 = math.exp %158 : vector<8x96xf32>
    %cst_64 = arith.constant 1.000000e+00 : f32
    %160 = vector.broadcast %cst_64 : f32 to vector<8x96xf32>
    %161 = arith.addf %160, %159 : vector<8x96xf32>
    %162 = arith.divf %160, %161 : vector<8x96xf32>
    %163 = vector.extract_strided_slice %162 {offsets = [0, 0], sizes = [8, 32], strides = [1, 1]} : vector<8x96xf32> to vector<8x32xf32>
    %164 = vector.extract_strided_slice %162 {offsets = [0, 32], sizes = [8, 32], strides = [1, 1]} : vector<8x96xf32> to vector<8x32xf32>
    %165 = vector.extract_strided_slice %162 {offsets = [0, 64], sizes = [8, 32], strides = [1, 1]} : vector<8x96xf32> to vector<8x32xf32>
    %166 = vector.extract_strided_slice %156 {offsets = [0, 96], sizes = [8, 32], strides = [1, 1]} : vector<8x128xf32> to vector<8x32xf32>
    %167 = math.tanh %166 : vector<8x32xf32>
    %168 = arith.index_cast %arg0 : i32 to index
    %c0_65 = arith.constant 0 : index
    %c0_66 = arith.constant 0 : index
    %169 = vector.load %arg12[%168, %c0_65, %c0_66] : memref<2x8x32xf32, #tpu.memory_space<vmem>>, vector<1x8x32xf32>
    %170 = vector.shape_cast %169 : vector<1x8x32xf32> to vector<8x32xf32>
    %171 = arith.mulf %164, %170 : vector<8x32xf32>
    %172 = arith.mulf %163, %167 : vector<8x32xf32>
    %173 = arith.addf %171, %172 : vector<8x32xf32>
    %174 = math.tanh %173 : vector<8x32xf32>
    %175 = arith.mulf %165, %174 : vector<8x32xf32>
    %176 = arith.index_cast %arg0 : i32 to index
    %c0_67 = arith.constant 0 : index
    %c0_68 = arith.constant 0 : index
    %177 = vector.load %arg12[%176, %c0_67, %c0_68] : memref<2x8x32xf32, #tpu.memory_space<vmem>>, vector<1x8x32xf32>
    %178 = vector.shape_cast %177 : vector<1x8x32xf32> to vector<8x32xf32>
    %179 = vector.shape_cast %173 : vector<8x32xf32> to vector<1x8x32xf32>
    tpu.vector_store %arg12[%176, %c0_67, %c0_68], %179 {strides = array<i32>} : memref<2x8x32xf32, #tpu.memory_space<vmem>>, vector<1x8x32xf32>,
    %180 = arith.index_cast %arg0 : i32 to index
    %c0_69 = arith.constant 0 : index
    %c0_70 = arith.constant 0 : index
    %181 = vector.load %arg11[%180, %c0_69, %c0_70] : memref<2x8x32xf32, #tpu.memory_space<vmem>>, vector<1x8x32xf32>
    %182 = vector.shape_cast %181 : vector<1x8x32xf32> to vector<8x32xf32>
    %183 = vector.shape_cast %175 : vector<8x32xf32> to vector<1x8x32xf32>
    tpu.vector_store %arg11[%180, %c0_69, %c0_70], %183 {strides = array<i32>} : memref<2x8x32xf32, #tpu.memory_space<vmem>>, vector<1x8x32xf32>,
    %184 = arith.index_cast %148 : i32 to index
    %c0_71 = arith.constant 0 : index
    %185 = vector.load %arg10[%184, %c0_71] : memref<64x32xf32, #tpu.memory_space<vmem>>, vector<8x32xf32>
    tpu.vector_store %arg10[%184, %c0_71], %175 {strides = array<i32>} : memref<64x32xf32, #tpu.memory_space<vmem>>, vector<8x32xf32>,
    %c4_i32 = arith.constant 4 : i32
    %c2_i32_72 = arith.constant 2 : i32
    %186 = arith.muli %c2_i32_72, %c4_i32 : i32
    %c7_i32_73 = arith.constant 7 : i32
    %187 = arith.subi %c7_i32_73, %186 : i32
    %188 = arith.muli %arg0, %187 : i32
    %189 = arith.addi %c4_i32, %188 : i32
    %c8_i32_74 = arith.constant 8 : i32
    %190 = arith.muli %189, %c8_i32_74 : i32
    %191 = tpu.assume_multiple %190, 8 : i32
    %192 = arith.index_cast %191 : i32 to index
    %c0_75 = arith.constant 0 : index
    %193 = vector.load %arg9[%192, %c0_75] : memref<64x128xf32, #tpu.memory_space<vmem>>, vector<8x128xf32>
    %194 = arith.index_cast %arg0 : i32 to index
    %c0_76 = arith.constant 0 : index
    %c0_77 = arith.constant 0 : index
    %195 = vector.load %arg11[%194, %c0_76, %c0_77] : memref<2x8x32xf32, #tpu.memory_space<vmem>>, vector<1x8x32xf32>
    %196 = vector.shape_cast %195 : vector<1x8x32xf32> to vector<8x32xf32>
    %197 = arith.truncf %196 : vector<8x32xf32> to vector<8x32xbf16>
    %cst_78 = arith.constant dense<0.000000e+00> : vector<8x128xf32>
    %198 = tpu.matmul %197, %13, %cst_78 {dimension_numbers = #tpu.dot_dimension_numbers<[1], [0], [0], [1], [0, 0, 1, 1], [], []>} : vector<8x32xbf16>, vector<32x128xbf16>, vector<8x128xf32> -> vector<8x128xf32>
    %199 = arith.addf %193, %198 : vector<8x128xf32>
    %200 = vector.extract_strided_slice %199 {offsets = [0, 0], sizes = [8, 96], strides = [1, 1]} : vector<8x128xf32> to vector<8x96xf32>
    %201 = arith.negf %200 : vector<8x96xf32>
    %202 = math.exp %201 : vector<8x96xf32>
    %cst_79 = arith.constant 1.000000e+00 : f32
    %203 = vector.broadcast %cst_79 : f32 to vector<8x96xf32>
    %204 = arith.addf %203, %202 : vector<8x96xf32>
    %205 = arith.divf %203, %204 : vector<8x96xf32>
    %206 = vector.extract_strided_slice %205 {offsets = [0, 0], sizes = [8, 32], strides = [1, 1]} : vector<8x96xf32> to vector<8x32xf32>
    %207 = vector.extract_strided_slice %205 {offsets = [0, 32], sizes = [8, 32], strides = [1, 1]} : vector<8x96xf32> to vector<8x32xf32>
    %208 = vector.extract_strided_slice %205 {offsets = [0, 64], sizes = [8, 32], strides = [1, 1]} : vector<8x96xf32> to vector<8x32xf32>
    %209 = vector.extract_strided_slice %199 {offsets = [0, 96], sizes = [8, 32], strides = [1, 1]} : vector<8x128xf32> to vector<8x32xf32>
    %210 = math.tanh %209 : vector<8x32xf32>
    %211 = arith.index_cast %arg0 : i32 to index
    %c0_80 = arith.constant 0 : index
    %c0_81 = arith.constant 0 : index
    %212 = vector.load %arg12[%211, %c0_80, %c0_81] : memref<2x8x32xf32, #tpu.memory_space<vmem>>, vector<1x8x32xf32>
    %213 = vector.shape_cast %212 : vector<1x8x32xf32> to vector<8x32xf32>
    %214 = arith.mulf %207, %213 : vector<8x32xf32>
    %215 = arith.mulf %206, %210 : vector<8x32xf32>
    %216 = arith.addf %214, %215 : vector<8x32xf32>
    %217 = math.tanh %216 : vector<8x32xf32>
    %218 = arith.mulf %208, %217 : vector<8x32xf32>
    %219 = arith.index_cast %arg0 : i32 to index
    %c0_82 = arith.constant 0 : index
    %c0_83 = arith.constant 0 : index
    %220 = vector.load %arg12[%219, %c0_82, %c0_83] : memref<2x8x32xf32, #tpu.memory_space<vmem>>, vector<1x8x32xf32>
    %221 = vector.shape_cast %220 : vector<1x8x32xf32> to vector<8x32xf32>
    %222 = vector.shape_cast %216 : vector<8x32xf32> to vector<1x8x32xf32>
    tpu.vector_store %arg12[%219, %c0_82, %c0_83], %222 {strides = array<i32>} : memref<2x8x32xf32, #tpu.memory_space<vmem>>, vector<1x8x32xf32>,
    %223 = arith.index_cast %arg0 : i32 to index
    %c0_84 = arith.constant 0 : index
    %c0_85 = arith.constant 0 : index
    %224 = vector.load %arg11[%223, %c0_84, %c0_85] : memref<2x8x32xf32, #tpu.memory_space<vmem>>, vector<1x8x32xf32>
    %225 = vector.shape_cast %224 : vector<1x8x32xf32> to vector<8x32xf32>
    %226 = vector.shape_cast %218 : vector<8x32xf32> to vector<1x8x32xf32>
    tpu.vector_store %arg11[%223, %c0_84, %c0_85], %226 {strides = array<i32>} : memref<2x8x32xf32, #tpu.memory_space<vmem>>, vector<1x8x32xf32>,
    %227 = arith.index_cast %191 : i32 to index
    %c0_86 = arith.constant 0 : index
    %228 = vector.load %arg10[%227, %c0_86] : memref<64x32xf32, #tpu.memory_space<vmem>>, vector<8x32xf32>
    tpu.vector_store %arg10[%227, %c0_86], %218 {strides = array<i32>} : memref<64x32xf32, #tpu.memory_space<vmem>>, vector<8x32xf32>,
    %c5_i32 = arith.constant 5 : i32
    %c2_i32_87 = arith.constant 2 : i32
    %229 = arith.muli %c2_i32_87, %c5_i32 : i32
    %c7_i32_88 = arith.constant 7 : i32
    %230 = arith.subi %c7_i32_88, %229 : i32
    %231 = arith.muli %arg0, %230 : i32
    %232 = arith.addi %c5_i32, %231 : i32
    %c8_i32_89 = arith.constant 8 : i32
    %233 = arith.muli %232, %c8_i32_89 : i32
    %234 = tpu.assume_multiple %233, 8 : i32
    %235 = arith.index_cast %234 : i32 to index
    %c0_90 = arith.constant 0 : index
    %236 = vector.load %arg9[%235, %c0_90] : memref<64x128xf32, #tpu.memory_space<vmem>>, vector<8x128xf32>
    %237 = arith.index_cast %arg0 : i32 to index
    %c0_91 = arith.constant 0 : index
    %c0_92 = arith.constant 0 : index
    %238 = vector.load %arg11[%237, %c0_91, %c0_92] : memref<2x8x32xf32, #tpu.memory_space<vmem>>, vector<1x8x32xf32>
    %239 = vector.shape_cast %238 : vector<1x8x32xf32> to vector<8x32xf32>
    %240 = arith.truncf %239 : vector<8x32xf32> to vector<8x32xbf16>
    %cst_93 = arith.constant dense<0.000000e+00> : vector<8x128xf32>
    %241 = tpu.matmul %240, %13, %cst_93 {dimension_numbers = #tpu.dot_dimension_numbers<[1], [0], [0], [1], [0, 0, 1, 1], [], []>} : vector<8x32xbf16>, vector<32x128xbf16>, vector<8x128xf32> -> vector<8x128xf32>
    %242 = arith.addf %236, %241 : vector<8x128xf32>
    %243 = vector.extract_strided_slice %242 {offsets = [0, 0], sizes = [8, 96], strides = [1, 1]} : vector<8x128xf32> to vector<8x96xf32>
    %244 = arith.negf %243 : vector<8x96xf32>
    %245 = math.exp %244 : vector<8x96xf32>
    %cst_94 = arith.constant 1.000000e+00 : f32
    %246 = vector.broadcast %cst_94 : f32 to vector<8x96xf32>
    %247 = arith.addf %246, %245 : vector<8x96xf32>
    %248 = arith.divf %246, %247 : vector<8x96xf32>
    %249 = vector.extract_strided_slice %248 {offsets = [0, 0], sizes = [8, 32], strides = [1, 1]} : vector<8x96xf32> to vector<8x32xf32>
    %250 = vector.extract_strided_slice %248 {offsets = [0, 32], sizes = [8, 32], strides = [1, 1]} : vector<8x96xf32> to vector<8x32xf32>
    %251 = vector.extract_strided_slice %248 {offsets = [0, 64], sizes = [8, 32], strides = [1, 1]} : vector<8x96xf32> to vector<8x32xf32>
    %252 = vector.extract_strided_slice %242 {offsets = [0, 96], sizes = [8, 32], strides = [1, 1]} : vector<8x128xf32> to vector<8x32xf32>
    %253 = math.tanh %252 : vector<8x32xf32>
    %254 = arith.index_cast %arg0 : i32 to index
    %c0_95 = arith.constant 0 : index
    %c0_96 = arith.constant 0 : index
    %255 = vector.load %arg12[%254, %c0_95, %c0_96] : memref<2x8x32xf32, #tpu.memory_space<vmem>>, vector<1x8x32xf32>
    %256 = vector.shape_cast %255 : vector<1x8x32xf32> to vector<8x32xf32>
    %257 = arith.mulf %250, %256 : vector<8x32xf32>
    %258 = arith.mulf %249, %253 : vector<8x32xf32>
    %259 = arith.addf %257, %258 : vector<8x32xf32>
    %260 = math.tanh %259 : vector<8x32xf32>
    %261 = arith.mulf %251, %260 : vector<8x32xf32>
    %262 = arith.index_cast %arg0 : i32 to index
    %c0_97 = arith.constant 0 : index
    %c0_98 = arith.constant 0 : index
    %263 = vector.load %arg12[%262, %c0_97, %c0_98] : memref<2x8x32xf32, #tpu.memory_space<vmem>>, vector<1x8x32xf32>
    %264 = vector.shape_cast %263 : vector<1x8x32xf32> to vector<8x32xf32>
    %265 = vector.shape_cast %259 : vector<8x32xf32> to vector<1x8x32xf32>
    tpu.vector_store %arg12[%262, %c0_97, %c0_98], %265 {strides = array<i32>} : memref<2x8x32xf32, #tpu.memory_space<vmem>>, vector<1x8x32xf32>,
    %266 = arith.index_cast %arg0 : i32 to index
    %c0_99 = arith.constant 0 : index
    %c0_100 = arith.constant 0 : index
    %267 = vector.load %arg11[%266, %c0_99, %c0_100] : memref<2x8x32xf32, #tpu.memory_space<vmem>>, vector<1x8x32xf32>
    %268 = vector.shape_cast %267 : vector<1x8x32xf32> to vector<8x32xf32>
    %269 = vector.shape_cast %261 : vector<8x32xf32> to vector<1x8x32xf32>
    tpu.vector_store %arg11[%266, %c0_99, %c0_100], %269 {strides = array<i32>} : memref<2x8x32xf32, #tpu.memory_space<vmem>>, vector<1x8x32xf32>,
    %270 = arith.index_cast %234 : i32 to index
    %c0_101 = arith.constant 0 : index
    %271 = vector.load %arg10[%270, %c0_101] : memref<64x32xf32, #tpu.memory_space<vmem>>, vector<8x32xf32>
    tpu.vector_store %arg10[%270, %c0_101], %261 {strides = array<i32>} : memref<64x32xf32, #tpu.memory_space<vmem>>, vector<8x32xf32>,
    %c6_i32 = arith.constant 6 : i32
    %c2_i32_102 = arith.constant 2 : i32
    %272 = arith.muli %c2_i32_102, %c6_i32 : i32
    %c7_i32_103 = arith.constant 7 : i32
    %273 = arith.subi %c7_i32_103, %272 : i32
    %274 = arith.muli %arg0, %273 : i32
    %275 = arith.addi %c6_i32, %274 : i32
    %c8_i32_104 = arith.constant 8 : i32
    %276 = arith.muli %275, %c8_i32_104 : i32
    %277 = tpu.assume_multiple %276, 8 : i32
    %278 = arith.index_cast %277 : i32 to index
    %c0_105 = arith.constant 0 : index
    %279 = vector.load %arg9[%278, %c0_105] : memref<64x128xf32, #tpu.memory_space<vmem>>, vector<8x128xf32>
    %280 = arith.index_cast %arg0 : i32 to index
    %c0_106 = arith.constant 0 : index
    %c0_107 = arith.constant 0 : index
    %281 = vector.load %arg11[%280, %c0_106, %c0_107] : memref<2x8x32xf32, #tpu.memory_space<vmem>>, vector<1x8x32xf32>
    %282 = vector.shape_cast %281 : vector<1x8x32xf32> to vector<8x32xf32>
    %283 = arith.truncf %282 : vector<8x32xf32> to vector<8x32xbf16>
    %cst_108 = arith.constant dense<0.000000e+00> : vector<8x128xf32>
    %284 = tpu.matmul %283, %13, %cst_108 {dimension_numbers = #tpu.dot_dimension_numbers<[1], [0], [0], [1], [0, 0, 1, 1], [], []>} : vector<8x32xbf16>, vector<32x128xbf16>, vector<8x128xf32> -> vector<8x128xf32>
    %285 = arith.addf %279, %284 : vector<8x128xf32>
    %286 = vector.extract_strided_slice %285 {offsets = [0, 0], sizes = [8, 96], strides = [1, 1]} : vector<8x128xf32> to vector<8x96xf32>
    %287 = arith.negf %286 : vector<8x96xf32>
    %288 = math.exp %287 : vector<8x96xf32>
    %cst_109 = arith.constant 1.000000e+00 : f32
    %289 = vector.broadcast %cst_109 : f32 to vector<8x96xf32>
    %290 = arith.addf %289, %288 : vector<8x96xf32>
    %291 = arith.divf %289, %290 : vector<8x96xf32>
    %292 = vector.extract_strided_slice %291 {offsets = [0, 0], sizes = [8, 32], strides = [1, 1]} : vector<8x96xf32> to vector<8x32xf32>
    %293 = vector.extract_strided_slice %291 {offsets = [0, 32], sizes = [8, 32], strides = [1, 1]} : vector<8x96xf32> to vector<8x32xf32>
    %294 = vector.extract_strided_slice %291 {offsets = [0, 64], sizes = [8, 32], strides = [1, 1]} : vector<8x96xf32> to vector<8x32xf32>
    %295 = vector.extract_strided_slice %285 {offsets = [0, 96], sizes = [8, 32], strides = [1, 1]} : vector<8x128xf32> to vector<8x32xf32>
    %296 = math.tanh %295 : vector<8x32xf32>
    %297 = arith.index_cast %arg0 : i32 to index
    %c0_110 = arith.constant 0 : index
    %c0_111 = arith.constant 0 : index
    %298 = vector.load %arg12[%297, %c0_110, %c0_111] : memref<2x8x32xf32, #tpu.memory_space<vmem>>, vector<1x8x32xf32>
    %299 = vector.shape_cast %298 : vector<1x8x32xf32> to vector<8x32xf32>
    %300 = arith.mulf %293, %299 : vector<8x32xf32>
    %301 = arith.mulf %292, %296 : vector<8x32xf32>
    %302 = arith.addf %300, %301 : vector<8x32xf32>
    %303 = math.tanh %302 : vector<8x32xf32>
    %304 = arith.mulf %294, %303 : vector<8x32xf32>
    %305 = arith.index_cast %arg0 : i32 to index
    %c0_112 = arith.constant 0 : index
    %c0_113 = arith.constant 0 : index
    %306 = vector.load %arg12[%305, %c0_112, %c0_113] : memref<2x8x32xf32, #tpu.memory_space<vmem>>, vector<1x8x32xf32>
    %307 = vector.shape_cast %306 : vector<1x8x32xf32> to vector<8x32xf32>
    %308 = vector.shape_cast %302 : vector<8x32xf32> to vector<1x8x32xf32>
    tpu.vector_store %arg12[%305, %c0_112, %c0_113], %308 {strides = array<i32>} : memref<2x8x32xf32, #tpu.memory_space<vmem>>, vector<1x8x32xf32>,
    %309 = arith.index_cast %arg0 : i32 to index
    %c0_114 = arith.constant 0 : index
    %c0_115 = arith.constant 0 : index
    %310 = vector.load %arg11[%309, %c0_114, %c0_115] : memref<2x8x32xf32, #tpu.memory_space<vmem>>, vector<1x8x32xf32>
    %311 = vector.shape_cast %310 : vector<1x8x32xf32> to vector<8x32xf32>
    %312 = vector.shape_cast %304 : vector<8x32xf32> to vector<1x8x32xf32>
    tpu.vector_store %arg11[%309, %c0_114, %c0_115], %312 {strides = array<i32>} : memref<2x8x32xf32, #tpu.memory_space<vmem>>, vector<1x8x32xf32>,
    %313 = arith.index_cast %277 : i32 to index
    %c0_116 = arith.constant 0 : index
    %314 = vector.load %arg10[%313, %c0_116] : memref<64x32xf32, #tpu.memory_space<vmem>>, vector<8x32xf32>
    tpu.vector_store %arg10[%313, %c0_116], %304 {strides = array<i32>} : memref<64x32xf32, #tpu.memory_space<vmem>>, vector<8x32xf32>,
    %c7_i32_117 = arith.constant 7 : i32
    %c2_i32_118 = arith.constant 2 : i32
    %315 = arith.muli %c2_i32_118, %c7_i32_117 : i32
    %c7_i32_119 = arith.constant 7 : i32
    %316 = arith.subi %c7_i32_119, %315 : i32
    %317 = arith.muli %arg0, %316 : i32
    %318 = arith.addi %c7_i32_117, %317 : i32
    %c8_i32_120 = arith.constant 8 : i32
    %319 = arith.muli %318, %c8_i32_120 : i32
    %320 = tpu.assume_multiple %319, 8 : i32
    %321 = arith.index_cast %320 : i32 to index
    %c0_121 = arith.constant 0 : index
    %322 = vector.load %arg9[%321, %c0_121] : memref<64x128xf32, #tpu.memory_space<vmem>>, vector<8x128xf32>
    %323 = arith.index_cast %arg0 : i32 to index
    %c0_122 = arith.constant 0 : index
    %c0_123 = arith.constant 0 : index
    %324 = vector.load %arg11[%323, %c0_122, %c0_123] : memref<2x8x32xf32, #tpu.memory_space<vmem>>, vector<1x8x32xf32>
    %325 = vector.shape_cast %324 : vector<1x8x32xf32> to vector<8x32xf32>
    %326 = arith.truncf %325 : vector<8x32xf32> to vector<8x32xbf16>
    %cst_124 = arith.constant dense<0.000000e+00> : vector<8x128xf32>
    %327 = tpu.matmul %326, %13, %cst_124 {dimension_numbers = #tpu.dot_dimension_numbers<[1], [0], [0], [1], [0, 0, 1, 1], [], []>} : vector<8x32xbf16>, vector<32x128xbf16>, vector<8x128xf32> -> vector<8x128xf32>
    %328 = arith.addf %322, %327 : vector<8x128xf32>
    %329 = vector.extract_strided_slice %328 {offsets = [0, 0], sizes = [8, 96], strides = [1, 1]} : vector<8x128xf32> to vector<8x96xf32>
    %330 = arith.negf %329 : vector<8x96xf32>
    %331 = math.exp %330 : vector<8x96xf32>
    %cst_125 = arith.constant 1.000000e+00 : f32
    %332 = vector.broadcast %cst_125 : f32 to vector<8x96xf32>
    %333 = arith.addf %332, %331 : vector<8x96xf32>
    %334 = arith.divf %332, %333 : vector<8x96xf32>
    %335 = vector.extract_strided_slice %334 {offsets = [0, 0], sizes = [8, 32], strides = [1, 1]} : vector<8x96xf32> to vector<8x32xf32>
    %336 = vector.extract_strided_slice %334 {offsets = [0, 32], sizes = [8, 32], strides = [1, 1]} : vector<8x96xf32> to vector<8x32xf32>
    %337 = vector.extract_strided_slice %334 {offsets = [0, 64], sizes = [8, 32], strides = [1, 1]} : vector<8x96xf32> to vector<8x32xf32>
    %338 = vector.extract_strided_slice %328 {offsets = [0, 96], sizes = [8, 32], strides = [1, 1]} : vector<8x128xf32> to vector<8x32xf32>
    %339 = math.tanh %338 : vector<8x32xf32>
    %340 = arith.index_cast %arg0 : i32 to index
    %c0_126 = arith.constant 0 : index
    %c0_127 = arith.constant 0 : index
    %341 = vector.load %arg12[%340, %c0_126, %c0_127] : memref<2x8x32xf32, #tpu.memory_space<vmem>>, vector<1x8x32xf32>
    %342 = vector.shape_cast %341 : vector<1x8x32xf32> to vector<8x32xf32>
    %343 = arith.mulf %336, %342 : vector<8x32xf32>
    %344 = arith.mulf %335, %339 : vector<8x32xf32>
    %345 = arith.addf %343, %344 : vector<8x32xf32>
    %346 = math.tanh %345 : vector<8x32xf32>
    %347 = arith.mulf %337, %346 : vector<8x32xf32>
    %348 = arith.index_cast %arg0 : i32 to index
    %c0_128 = arith.constant 0 : index
    %c0_129 = arith.constant 0 : index
    %349 = vector.load %arg12[%348, %c0_128, %c0_129] : memref<2x8x32xf32, #tpu.memory_space<vmem>>, vector<1x8x32xf32>
    %350 = vector.shape_cast %349 : vector<1x8x32xf32> to vector<8x32xf32>
    %351 = vector.shape_cast %345 : vector<8x32xf32> to vector<1x8x32xf32>
    tpu.vector_store %arg12[%348, %c0_128, %c0_129], %351 {strides = array<i32>} : memref<2x8x32xf32, #tpu.memory_space<vmem>>, vector<1x8x32xf32>,
    %352 = arith.index_cast %arg0 : i32 to index
    %c0_130 = arith.constant 0 : index
    %c0_131 = arith.constant 0 : index
    %353 = vector.load %arg11[%352, %c0_130, %c0_131] : memref<2x8x32xf32, #tpu.memory_space<vmem>>, vector<1x8x32xf32>
    %354 = vector.shape_cast %353 : vector<1x8x32xf32> to vector<8x32xf32>
    %355 = vector.shape_cast %347 : vector<8x32xf32> to vector<1x8x32xf32>
    tpu.vector_store %arg11[%352, %c0_130, %c0_131], %355 {strides = array<i32>} : memref<2x8x32xf32, #tpu.memory_space<vmem>>, vector<1x8x32xf32>,
    %356 = arith.index_cast %320 : i32 to index
    %c0_132 = arith.constant 0 : index
    %357 = vector.load %arg10[%356, %c0_132] : memref<64x32xf32, #tpu.memory_space<vmem>>, vector<8x32xf32>
    tpu.vector_store %arg10[%356, %c0_132], %347 {strides = array<i32>} : memref<64x32xf32, #tpu.memory_space<vmem>>, vector<8x32xf32>,
    %c8_i32_133 = arith.constant 8 : i32
    %c0_134 = arith.constant 0 : index
    %c0_135 = arith.constant 0 : index
    %358 = vector.load %arg10[%c0_134, %c0_135] : memref<64x32xf32, #tpu.memory_space<vmem>>, vector<64x32xf32>
    %359 = arith.truncf %358 : vector<64x32xf32> to vector<64x32xbf16>
    %c0_136 = arith.constant 0 : index
    %c0_137 = arith.constant 0 : index
    %c0_138 = arith.constant 0 : index
    %360 = vector.load %arg8[%c0_136, %c0_137, %c0_138] : memref<1x64x32xbf16, #tpu.memory_space<vmem>>, vector<1x64x32xbf16>
    %361 = vector.shape_cast %360 : vector<1x64x32xbf16> to vector<64x32xbf16>
    %362 = vector.shape_cast %359 : vector<64x32xbf16> to vector<1x64x32xbf16>
    tpu.vector_store %arg8[%c0_136, %c0_137, %c0_138], %362 {strides = array<i32>} : memref<1x64x32xbf16, #tpu.memory_space<vmem>>, vector<1x64x32xbf16>,
    return
  }
  func.func @transform_0(%arg0: i32, %arg1: i32) -> (i32, i32) {
    %c2_i32 = arith.constant 2 : i32
    %0 = arith.muli %c2_i32, %arg0 : i32
    %c1_i32 = arith.constant 1 : i32
    %1 = arith.subi %c1_i32, %0 : i32
    %2 = arith.muli %arg1, %1 : i32
    %c0_i32 = arith.constant 0 : i32
    %3 = arith.muli %arg0, %c0_i32 : i32
    %4 = arith.addi %2, %3 : i32
    %c0_i32_0 = arith.constant 0 : i32
    %c0_i32_1 = arith.constant 0 : i32
    return %4, %c0_i32_0 : i32, i32
  }
  func.func @transform_1(%arg0: i32, %arg1: i32) -> (i32, i32, i32) {
    %c0_i32 = arith.constant 0 : i32
    %c0_i32_0 = arith.constant 0 : i32
    %c0_i32_1 = arith.constant 0 : i32
    return %arg0, %c0_i32, %c0_i32_0 : i32, i32, i32
  }
  func.func @transform_2(%arg0: i32, %arg1: i32) -> (i32, i32, i32) {
    %c0_i32 = arith.constant 0 : i32
    %c0_i32_0 = arith.constant 0 : i32
    %c0_i32_1 = arith.constant 0 : i32
    return %arg0, %c0_i32, %c0_i32_0 : i32, i32, i32
  }
  func.func @transform_3(%arg0: i32, %arg1: i32) -> (i32, i32, i32) {
    %c0_i32 = arith.constant 0 : i32
    %c0_i32_0 = arith.constant 0 : i32
    %c0_i32_1 = arith.constant 0 : i32
    return %arg0, %c0_i32, %c0_i32_0 : i32, i32, i32
  }
  func.func @transform_4(%arg0: i32, %arg1: i32) -> (i32, i32, i32) {
    %c0_i32 = arith.constant 0 : i32
    %c0_i32_0 = arith.constant 0 : i32
    %c0_i32_1 = arith.constant 0 : i32
    return %arg0, %c0_i32, %c0_i32_0 : i32, i32, i32
  }
  func.func @transform_5(%arg0: i32, %arg1: i32) -> (i32, i32, i32) {
    %c0_i32 = arith.constant 0 : i32
    %c0_i32_0 = arith.constant 0 : i32
    %c0_i32_1 = arith.constant 0 : i32
    return %arg0, %c0_i32, %c0_i32_0 : i32, i32, i32
  }
  func.func @transform_6(%arg0: i32, %arg1: i32) -> (i32, i32, i32) {
    %c2_i32 = arith.constant 2 : i32
    %0 = arith.muli %c2_i32, %arg0 : i32
    %c1_i32 = arith.constant 1 : i32
    %1 = arith.subi %c1_i32, %0 : i32
    %2 = arith.muli %arg1, %1 : i32
    %c0_i32 = arith.constant 0 : i32
    %3 = arith.muli %arg0, %c0_i32 : i32
    %4 = arith.addi %2, %3 : i32
    %c0_i32_0 = arith.constant 0 : i32
    %c0_i32_1 = arith.constant 0 : i32
    return %arg0, %4, %c0_i32_0 : i32, i32, i32
  }
}

module attributes {stable_mosaic.version = 11 : i64} {
  func.func @_lstm_layer_kernel(%arg0: i32, %arg1: i32, %arg2: memref<64x16xbf16, #tpu.memory_space<vmem>>, %arg3: memref<1x16x128xbf16, #tpu.memory_space<vmem>>, %arg4: memref<1x32x128xbf16, #tpu.memory_space<vmem>>, %arg5: memref<1x1x128xf32, #tpu.memory_space<vmem>>, %arg6: memref<1x8x32xf32, #tpu.memory_space<vmem>>, %arg7: memref<1x8x32xf32, #tpu.memory_space<vmem>>, %arg8: memref<1x64x32xbf16, #tpu.memory_space<vmem>>, %arg9: memref<64x128xf32, #tpu.memory_space<vmem>>, %arg10: memref<64x32xf32, #tpu.memory_space<vmem>>, %arg11: memref<2x8x32xf32, #tpu.memory_space<vmem>>, %arg12: memref<2x8x32xf32, #tpu.memory_space<vmem>>) attributes {dimension_semantics = [#tpu.dimension_semantics<parallel>, #tpu.dimension_semantics<arbitrary>], iteration_bounds = array<i64: 2, 1>, scalar_prefetch = 0 : i64, scratch_operands = 4 : i64, tpu.core_type = #tpu.core_type<tc>, window_params = [{transform_indices = @transform_0, window_bounds = array<i64: 64, 16>}, {transform_indices = @transform_1, window_bounds = array<i64: 1, 16, 128>}, {transform_indices = @transform_2, window_bounds = array<i64: 1, 32, 128>}, {transform_indices = @transform_3, window_bounds = array<i64: 1, 1, 128>}, {transform_indices = @transform_4, window_bounds = array<i64: 1, 8, 32>}, {transform_indices = @transform_5, window_bounds = array<i64: 1, 8, 32>}, {transform_indices = @transform_6, window_bounds = array<i64: 1, 64, 32>}]} {
    %c0_i32 = arith.constant 0 : i32
    %0 = arith.cmpi eq, %arg1, %c0_i32 : i32
    %1 = arith.extui %0 : i1 to i32
    %c0_i32_0 = arith.constant 0 : i32
    %2 = arith.cmpi ne, %1, %c0_i32_0 : i32
    scf.if %2 {
      %c0_139 = arith.constant 0 : index
      %c0_140 = arith.constant 0 : index
      %c0_141 = arith.constant 0 : index
      %363 = vector.load %arg6[%c0_139, %c0_140, %c0_141] : memref<1x8x32xf32, #tpu.memory_space<vmem>>, vector<1x8x32xf32>
      %364 = vector.shape_cast %363 : vector<1x8x32xf32> to vector<8x32xf32>
      %365 = arith.index_cast %arg0 : i32 to index
      %c0_142 = arith.constant 0 : index
      %c0_143 = arith.constant 0 : index
      %366 = vector.load %arg11[%365, %c0_142, %c0_143] : memref<2x8x32xf32, #tpu.memory_space<vmem>>, vector<1x8x32xf32>
      %367 = vector.shape_cast %366 : vector<1x8x32xf32> to vector<8x32xf32>
      %368 = vector.shape_cast %364 : vector<8x32xf32> to vector<1x8x32xf32>
      tpu.vector_store %arg11[%365, %c0_142, %c0_143], %368 {strides = array<i32>} : memref<2x8x32xf32, #tpu.memory_space<vmem>>, vector<1x8x32xf32>,
      %c0_144 = arith.constant 0 : index
      %c0_145 = arith.constant 0 : index
      %c0_146 = arith.constant 0 : index
      %369 = vector.load %arg7[%c0_144, %c0_145, %c0_146] : memref<1x8x32xf32, #tpu.memory_space<vmem>>, vector<1x8x32xf32>
      %370 = vector.shape_cast %369 : vector<1x8x32xf32> to vector<8x32xf32>
      %371 = arith.index_cast %arg0 : i32 to index
      %c0_147 = arith.constant 0 : index
      %c0_148 = arith.constant 0 : index
      %372 = vector.load %arg12[%371, %c0_147, %c0_148] : memref<2x8x32xf32, #tpu.memory_space<vmem>>, vector<1x8x32xf32>
      %373 = vector.shape_cast %372 : vector<1x8x32xf32> to vector<8x32xf32>
      %374 = vector.shape_cast %370 : vector<8x32xf32> to vector<1x8x32xf32>
      tpu.vector_store %arg12[%371, %c0_147, %c0_148], %374 {strides = array<i32>} : memref<2x8x32xf32, #tpu.memory_space<vmem>>, vector<1x8x32xf32>,
    } else {
    }
    %c0 = arith.constant 0 : index
    %c0_1 = arith.constant 0 : index
    %3 = vector.load %arg2[%c0, %c0_1] : memref<64x16xbf16, #tpu.memory_space<vmem>>, vector<64x16xbf16>
    %c0_2 = arith.constant 0 : index
    %c0_3 = arith.constant 0 : index
    %c0_4 = arith.constant 0 : index
    %4 = vector.load %arg3[%c0_2, %c0_3, %c0_4] : memref<1x16x128xbf16, #tpu.memory_space<vmem>>, vector<1x16x128xbf16>
    %5 = vector.shape_cast %4 : vector<1x16x128xbf16> to vector<16x128xbf16>
    %cst = arith.constant dense<0.000000e+00> : vector<64x128xf32>
    %6 = tpu.matmul %3, %5, %cst {dimension_numbers = #tpu.dot_dimension_numbers<[1], [0], [0], [1], [0, 0, 1, 1], [], []>} : vector<64x16xbf16>, vector<16x128xbf16>, vector<64x128xf32> -> vector<64x128xf32>
    %c0_5 = arith.constant 0 : index
    %c0_6 = arith.constant 0 : index
    %c0_7 = arith.constant 0 : index
    %7 = vector.load %arg5[%c0_5, %c0_6, %c0_7] : memref<1x1x128xf32, #tpu.memory_space<vmem>>, vector<1x1x128xf32>
    %8 = vector.shape_cast %7 : vector<1x1x128xf32> to vector<1x128xf32>
    %9 = vector.broadcast %8 : vector<1x128xf32> to vector<64x128xf32>
    %10 = arith.addf %6, %9 : vector<64x128xf32>
    %c0_8 = arith.constant 0 : index
    %c0_9 = arith.constant 0 : index
    %11 = vector.load %arg9[%c0_8, %c0_9] : memref<64x128xf32, #tpu.memory_space<vmem>>, vector<64x128xf32>
    tpu.vector_store %arg9[%c0_8, %c0_9], %10 {strides = array<i32>} : memref<64x128xf32, #tpu.memory_space<vmem>>, vector<64x128xf32>,
    %c0_10 = arith.constant 0 : index
    %c0_11 = arith.constant 0 : index
    %c0_12 = arith.constant 0 : index
    %12 = vector.load %arg4[%c0_10, %c0_11, %c0_12] : memref<1x32x128xbf16, #tpu.memory_space<vmem>>, vector<1x32x128xbf16>
    %13 = vector.shape_cast %12 : vector<1x32x128xbf16> to vector<32x128xbf16>
    %c0_i32_13 = arith.constant 0 : i32
    %c2_i32 = arith.constant 2 : i32
    %14 = arith.muli %c2_i32, %c0_i32_13 : i32
    %c7_i32 = arith.constant 7 : i32
    %15 = arith.subi %c7_i32, %14 : i32
    %16 = arith.muli %arg0, %15 : i32
    %17 = arith.addi %c0_i32_13, %16 : i32
    %c8_i32 = arith.constant 8 : i32
    %18 = arith.muli %17, %c8_i32 : i32
    %19 = tpu.assume_multiple %18, 8 : i32
    %20 = arith.index_cast %19 : i32 to index
    %c0_14 = arith.constant 0 : index
    %21 = vector.load %arg9[%20, %c0_14] : memref<64x128xf32, #tpu.memory_space<vmem>>, vector<8x128xf32>
    %22 = arith.index_cast %arg0 : i32 to index
    %c0_15 = arith.constant 0 : index
    %c0_16 = arith.constant 0 : index
    %23 = vector.load %arg11[%22, %c0_15, %c0_16] : memref<2x8x32xf32, #tpu.memory_space<vmem>>, vector<1x8x32xf32>
    %24 = vector.shape_cast %23 : vector<1x8x32xf32> to vector<8x32xf32>
    %25 = arith.truncf %24 : vector<8x32xf32> to vector<8x32xbf16>
    %cst_17 = arith.constant dense<0.000000e+00> : vector<8x128xf32>
    %26 = tpu.matmul %25, %13, %cst_17 {dimension_numbers = #tpu.dot_dimension_numbers<[1], [0], [0], [1], [0, 0, 1, 1], [], []>} : vector<8x32xbf16>, vector<32x128xbf16>, vector<8x128xf32> -> vector<8x128xf32>
    %27 = arith.addf %21, %26 : vector<8x128xf32>
    %28 = vector.extract_strided_slice %27 {offsets = [0, 0], sizes = [8, 96], strides = [1, 1]} : vector<8x128xf32> to vector<8x96xf32>
    %29 = arith.negf %28 : vector<8x96xf32>
    %30 = math.exp %29 : vector<8x96xf32>
    %cst_18 = arith.constant 1.000000e+00 : f32
    %31 = vector.broadcast %cst_18 : f32 to vector<8x96xf32>
    %32 = arith.addf %31, %30 : vector<8x96xf32>
    %33 = arith.divf %31, %32 : vector<8x96xf32>
    %34 = vector.extract_strided_slice %33 {offsets = [0, 0], sizes = [8, 32], strides = [1, 1]} : vector<8x96xf32> to vector<8x32xf32>
    %35 = vector.extract_strided_slice %33 {offsets = [0, 32], sizes = [8, 32], strides = [1, 1]} : vector<8x96xf32> to vector<8x32xf32>
    %36 = vector.extract_strided_slice %33 {offsets = [0, 64], sizes = [8, 32], strides = [1, 1]} : vector<8x96xf32> to vector<8x32xf32>
    %37 = vector.extract_strided_slice %27 {offsets = [0, 96], sizes = [8, 32], strides = [1, 1]} : vector<8x128xf32> to vector<8x32xf32>
    %38 = math.tanh %37 : vector<8x32xf32>
    %39 = arith.index_cast %arg0 : i32 to index
    %c0_19 = arith.constant 0 : index
    %c0_20 = arith.constant 0 : index
    %40 = vector.load %arg12[%39, %c0_19, %c0_20] : memref<2x8x32xf32, #tpu.memory_space<vmem>>, vector<1x8x32xf32>
    %41 = vector.shape_cast %40 : vector<1x8x32xf32> to vector<8x32xf32>
    %42 = arith.mulf %35, %41 : vector<8x32xf32>
    %43 = arith.mulf %34, %38 : vector<8x32xf32>
    %44 = arith.addf %42, %43 : vector<8x32xf32>
    %45 = math.tanh %44 : vector<8x32xf32>
    %46 = arith.mulf %36, %45 : vector<8x32xf32>
    %47 = arith.index_cast %arg0 : i32 to index
    %c0_21 = arith.constant 0 : index
    %c0_22 = arith.constant 0 : index
    %48 = vector.load %arg12[%47, %c0_21, %c0_22] : memref<2x8x32xf32, #tpu.memory_space<vmem>>, vector<1x8x32xf32>
    %49 = vector.shape_cast %48 : vector<1x8x32xf32> to vector<8x32xf32>
    %50 = vector.shape_cast %44 : vector<8x32xf32> to vector<1x8x32xf32>
    tpu.vector_store %arg12[%47, %c0_21, %c0_22], %50 {strides = array<i32>} : memref<2x8x32xf32, #tpu.memory_space<vmem>>, vector<1x8x32xf32>,
    %51 = arith.index_cast %arg0 : i32 to index
    %c0_23 = arith.constant 0 : index
    %c0_24 = arith.constant 0 : index
    %52 = vector.load %arg11[%51, %c0_23, %c0_24] : memref<2x8x32xf32, #tpu.memory_space<vmem>>, vector<1x8x32xf32>
    %53 = vector.shape_cast %52 : vector<1x8x32xf32> to vector<8x32xf32>
    %54 = vector.shape_cast %46 : vector<8x32xf32> to vector<1x8x32xf32>
    tpu.vector_store %arg11[%51, %c0_23, %c0_24], %54 {strides = array<i32>} : memref<2x8x32xf32, #tpu.memory_space<vmem>>, vector<1x8x32xf32>,
    %55 = arith.index_cast %19 : i32 to index
    %c0_25 = arith.constant 0 : index
    %56 = vector.load %arg10[%55, %c0_25] : memref<64x32xf32, #tpu.memory_space<vmem>>, vector<8x32xf32>
    tpu.vector_store %arg10[%55, %c0_25], %46 {strides = array<i32>} : memref<64x32xf32, #tpu.memory_space<vmem>>, vector<8x32xf32>,
    %c1_i32 = arith.constant 1 : i32
    %c2_i32_26 = arith.constant 2 : i32
    %57 = arith.muli %c2_i32_26, %c1_i32 : i32
    %c7_i32_27 = arith.constant 7 : i32
    %58 = arith.subi %c7_i32_27, %57 : i32
    %59 = arith.muli %arg0, %58 : i32
    %60 = arith.addi %c1_i32, %59 : i32
    %c8_i32_28 = arith.constant 8 : i32
    %61 = arith.muli %60, %c8_i32_28 : i32
    %62 = tpu.assume_multiple %61, 8 : i32
    %63 = arith.index_cast %62 : i32 to index
    %c0_29 = arith.constant 0 : index
    %64 = vector.load %arg9[%63, %c0_29] : memref<64x128xf32, #tpu.memory_space<vmem>>, vector<8x128xf32>
    %65 = arith.index_cast %arg0 : i32 to index
    %c0_30 = arith.constant 0 : index
    %c0_31 = arith.constant 0 : index
    %66 = vector.load %arg11[%65, %c0_30, %c0_31] : memref<2x8x32xf32, #tpu.memory_space<vmem>>, vector<1x8x32xf32>
    %67 = vector.shape_cast %66 : vector<1x8x32xf32> to vector<8x32xf32>
    %68 = arith.truncf %67 : vector<8x32xf32> to vector<8x32xbf16>
    %cst_32 = arith.constant dense<0.000000e+00> : vector<8x128xf32>
    %69 = tpu.matmul %68, %13, %cst_32 {dimension_numbers = #tpu.dot_dimension_numbers<[1], [0], [0], [1], [0, 0, 1, 1], [], []>} : vector<8x32xbf16>, vector<32x128xbf16>, vector<8x128xf32> -> vector<8x128xf32>
    %70 = arith.addf %64, %69 : vector<8x128xf32>
    %71 = vector.extract_strided_slice %70 {offsets = [0, 0], sizes = [8, 96], strides = [1, 1]} : vector<8x128xf32> to vector<8x96xf32>
    %72 = arith.negf %71 : vector<8x96xf32>
    %73 = math.exp %72 : vector<8x96xf32>
    %cst_33 = arith.constant 1.000000e+00 : f32
    %74 = vector.broadcast %cst_33 : f32 to vector<8x96xf32>
    %75 = arith.addf %74, %73 : vector<8x96xf32>
    %76 = arith.divf %74, %75 : vector<8x96xf32>
    %77 = vector.extract_strided_slice %76 {offsets = [0, 0], sizes = [8, 32], strides = [1, 1]} : vector<8x96xf32> to vector<8x32xf32>
    %78 = vector.extract_strided_slice %76 {offsets = [0, 32], sizes = [8, 32], strides = [1, 1]} : vector<8x96xf32> to vector<8x32xf32>
    %79 = vector.extract_strided_slice %76 {offsets = [0, 64], sizes = [8, 32], strides = [1, 1]} : vector<8x96xf32> to vector<8x32xf32>
    %80 = vector.extract_strided_slice %70 {offsets = [0, 96], sizes = [8, 32], strides = [1, 1]} : vector<8x128xf32> to vector<8x32xf32>
    %81 = math.tanh %80 : vector<8x32xf32>
    %82 = arith.index_cast %arg0 : i32 to index
    %c0_34 = arith.constant 0 : index
    %c0_35 = arith.constant 0 : index
    %83 = vector.load %arg12[%82, %c0_34, %c0_35] : memref<2x8x32xf32, #tpu.memory_space<vmem>>, vector<1x8x32xf32>
    %84 = vector.shape_cast %83 : vector<1x8x32xf32> to vector<8x32xf32>
    %85 = arith.mulf %78, %84 : vector<8x32xf32>
    %86 = arith.mulf %77, %81 : vector<8x32xf32>
    %87 = arith.addf %85, %86 : vector<8x32xf32>
    %88 = math.tanh %87 : vector<8x32xf32>
    %89 = arith.mulf %79, %88 : vector<8x32xf32>
    %90 = arith.index_cast %arg0 : i32 to index
    %c0_36 = arith.constant 0 : index
    %c0_37 = arith.constant 0 : index
    %91 = vector.load %arg12[%90, %c0_36, %c0_37] : memref<2x8x32xf32, #tpu.memory_space<vmem>>, vector<1x8x32xf32>
    %92 = vector.shape_cast %91 : vector<1x8x32xf32> to vector<8x32xf32>
    %93 = vector.shape_cast %87 : vector<8x32xf32> to vector<1x8x32xf32>
    tpu.vector_store %arg12[%90, %c0_36, %c0_37], %93 {strides = array<i32>} : memref<2x8x32xf32, #tpu.memory_space<vmem>>, vector<1x8x32xf32>,
    %94 = arith.index_cast %arg0 : i32 to index
    %c0_38 = arith.constant 0 : index
    %c0_39 = arith.constant 0 : index
    %95 = vector.load %arg11[%94, %c0_38, %c0_39] : memref<2x8x32xf32, #tpu.memory_space<vmem>>, vector<1x8x32xf32>
    %96 = vector.shape_cast %95 : vector<1x8x32xf32> to vector<8x32xf32>
    %97 = vector.shape_cast %89 : vector<8x32xf32> to vector<1x8x32xf32>
    tpu.vector_store %arg11[%94, %c0_38, %c0_39], %97 {strides = array<i32>} : memref<2x8x32xf32, #tpu.memory_space<vmem>>, vector<1x8x32xf32>,
    %98 = arith.index_cast %62 : i32 to index
    %c0_40 = arith.constant 0 : index
    %99 = vector.load %arg10[%98, %c0_40] : memref<64x32xf32, #tpu.memory_space<vmem>>, vector<8x32xf32>
    tpu.vector_store %arg10[%98, %c0_40], %89 {strides = array<i32>} : memref<64x32xf32, #tpu.memory_space<vmem>>, vector<8x32xf32>,
    %c2_i32_41 = arith.constant 2 : i32
    %c2_i32_42 = arith.constant 2 : i32
    %100 = arith.muli %c2_i32_42, %c2_i32_41 : i32
    %c7_i32_43 = arith.constant 7 : i32
    %101 = arith.subi %c7_i32_43, %100 : i32
    %102 = arith.muli %arg0, %101 : i32
    %103 = arith.addi %c2_i32_41, %102 : i32
    %c8_i32_44 = arith.constant 8 : i32
    %104 = arith.muli %103, %c8_i32_44 : i32
    %105 = tpu.assume_multiple %104, 8 : i32
    %106 = arith.index_cast %105 : i32 to index
    %c0_45 = arith.constant 0 : index
    %107 = vector.load %arg9[%106, %c0_45] : memref<64x128xf32, #tpu.memory_space<vmem>>, vector<8x128xf32>
    %108 = arith.index_cast %arg0 : i32 to index
    %c0_46 = arith.constant 0 : index
    %c0_47 = arith.constant 0 : index
    %109 = vector.load %arg11[%108, %c0_46, %c0_47] : memref<2x8x32xf32, #tpu.memory_space<vmem>>, vector<1x8x32xf32>
    %110 = vector.shape_cast %109 : vector<1x8x32xf32> to vector<8x32xf32>
    %111 = arith.truncf %110 : vector<8x32xf32> to vector<8x32xbf16>
    %cst_48 = arith.constant dense<0.000000e+00> : vector<8x128xf32>
    %112 = tpu.matmul %111, %13, %cst_48 {dimension_numbers = #tpu.dot_dimension_numbers<[1], [0], [0], [1], [0, 0, 1, 1], [], []>} : vector<8x32xbf16>, vector<32x128xbf16>, vector<8x128xf32> -> vector<8x128xf32>
    %113 = arith.addf %107, %112 : vector<8x128xf32>
    %114 = vector.extract_strided_slice %113 {offsets = [0, 0], sizes = [8, 96], strides = [1, 1]} : vector<8x128xf32> to vector<8x96xf32>
    %115 = arith.negf %114 : vector<8x96xf32>
    %116 = math.exp %115 : vector<8x96xf32>
    %cst_49 = arith.constant 1.000000e+00 : f32
    %117 = vector.broadcast %cst_49 : f32 to vector<8x96xf32>
    %118 = arith.addf %117, %116 : vector<8x96xf32>
    %119 = arith.divf %117, %118 : vector<8x96xf32>
    %120 = vector.extract_strided_slice %119 {offsets = [0, 0], sizes = [8, 32], strides = [1, 1]} : vector<8x96xf32> to vector<8x32xf32>
    %121 = vector.extract_strided_slice %119 {offsets = [0, 32], sizes = [8, 32], strides = [1, 1]} : vector<8x96xf32> to vector<8x32xf32>
    %122 = vector.extract_strided_slice %119 {offsets = [0, 64], sizes = [8, 32], strides = [1, 1]} : vector<8x96xf32> to vector<8x32xf32>
    %123 = vector.extract_strided_slice %113 {offsets = [0, 96], sizes = [8, 32], strides = [1, 1]} : vector<8x128xf32> to vector<8x32xf32>
    %124 = math.tanh %123 : vector<8x32xf32>
    %125 = arith.index_cast %arg0 : i32 to index
    %c0_50 = arith.constant 0 : index
    %c0_51 = arith.constant 0 : index
    %126 = vector.load %arg12[%125, %c0_50, %c0_51] : memref<2x8x32xf32, #tpu.memory_space<vmem>>, vector<1x8x32xf32>
    %127 = vector.shape_cast %126 : vector<1x8x32xf32> to vector<8x32xf32>
    %128 = arith.mulf %121, %127 : vector<8x32xf32>
    %129 = arith.mulf %120, %124 : vector<8x32xf32>
    %130 = arith.addf %128, %129 : vector<8x32xf32>
    %131 = math.tanh %130 : vector<8x32xf32>
    %132 = arith.mulf %122, %131 : vector<8x32xf32>
    %133 = arith.index_cast %arg0 : i32 to index
    %c0_52 = arith.constant 0 : index
    %c0_53 = arith.constant 0 : index
    %134 = vector.load %arg12[%133, %c0_52, %c0_53] : memref<2x8x32xf32, #tpu.memory_space<vmem>>, vector<1x8x32xf32>
    %135 = vector.shape_cast %134 : vector<1x8x32xf32> to vector<8x32xf32>
    %136 = vector.shape_cast %130 : vector<8x32xf32> to vector<1x8x32xf32>
    tpu.vector_store %arg12[%133, %c0_52, %c0_53], %136 {strides = array<i32>} : memref<2x8x32xf32, #tpu.memory_space<vmem>>, vector<1x8x32xf32>,
    %137 = arith.index_cast %arg0 : i32 to index
    %c0_54 = arith.constant 0 : index
    %c0_55 = arith.constant 0 : index
    %138 = vector.load %arg11[%137, %c0_54, %c0_55] : memref<2x8x32xf32, #tpu.memory_space<vmem>>, vector<1x8x32xf32>
    %139 = vector.shape_cast %138 : vector<1x8x32xf32> to vector<8x32xf32>
    %140 = vector.shape_cast %132 : vector<8x32xf32> to vector<1x8x32xf32>
    tpu.vector_store %arg11[%137, %c0_54, %c0_55], %140 {strides = array<i32>} : memref<2x8x32xf32, #tpu.memory_space<vmem>>, vector<1x8x32xf32>,
    %141 = arith.index_cast %105 : i32 to index
    %c0_56 = arith.constant 0 : index
    %142 = vector.load %arg10[%141, %c0_56] : memref<64x32xf32, #tpu.memory_space<vmem>>, vector<8x32xf32>
    tpu.vector_store %arg10[%141, %c0_56], %132 {strides = array<i32>} : memref<64x32xf32, #tpu.memory_space<vmem>>, vector<8x32xf32>,
    %c3_i32 = arith.constant 3 : i32
    %c2_i32_57 = arith.constant 2 : i32
    %143 = arith.muli %c2_i32_57, %c3_i32 : i32
    %c7_i32_58 = arith.constant 7 : i32
    %144 = arith.subi %c7_i32_58, %143 : i32
    %145 = arith.muli %arg0, %144 : i32
    %146 = arith.addi %c3_i32, %145 : i32
    %c8_i32_59 = arith.constant 8 : i32
    %147 = arith.muli %146, %c8_i32_59 : i32
    %148 = tpu.assume_multiple %147, 8 : i32
    %149 = arith.index_cast %148 : i32 to index
    %c0_60 = arith.constant 0 : index
    %150 = vector.load %arg9[%149, %c0_60] : memref<64x128xf32, #tpu.memory_space<vmem>>, vector<8x128xf32>
    %151 = arith.index_cast %arg0 : i32 to index
    %c0_61 = arith.constant 0 : index
    %c0_62 = arith.constant 0 : index
    %152 = vector.load %arg11[%151, %c0_61, %c0_62] : memref<2x8x32xf32, #tpu.memory_space<vmem>>, vector<1x8x32xf32>
    %153 = vector.shape_cast %152 : vector<1x8x32xf32> to vector<8x32xf32>
    %154 = arith.truncf %153 : vector<8x32xf32> to vector<8x32xbf16>
    %cst_63 = arith.constant dense<0.000000e+00> : vector<8x128xf32>
    %155 = tpu.matmul %154, %13, %cst_63 {dimension_numbers = #tpu.dot_dimension_numbers<[1], [0], [0], [1], [0, 0, 1, 1], [], []>} : vector<8x32xbf16>, vector<32x128xbf16>, vector<8x128xf32> -> vector<8x128xf32>
    %156 = arith.addf %150, %155 : vector<8x128xf32>
    %157 = vector.extract_strided_slice %156 {offsets = [0, 0], sizes = [8, 96], strides = [1, 1]} : vector<8x128xf32> to vector<8x96xf32>
    %158 = arith.negf %157 : vector<8x96xf32>
    %159 = math.exp %158 : vector<8x96xf32>
    %cst_64 = arith.constant 1.000000e+00 : f32
    %160 = vector.broadcast %cst_64 : f32 to vector<8x96xf32>
    %161 = arith.addf %160, %159 : vector<8x96xf32>
    %162 = arith.divf %160, %161 : vector<8x96xf32>
    %163 = vector.extract_strided_slice %162 {offsets = [0, 0], sizes = [8, 32], strides = [1, 1]} : vector<8x96xf32> to vector<8x32xf32>
    %164 = vector.extract_strided_slice %162 {offsets = [0, 32], sizes = [8, 32], strides = [1, 1]} : vector<8x96xf32> to vector<8x32xf32>
    %165 = vector.extract_strided_slice %162 {offsets = [0, 64], sizes = [8, 32], strides = [1, 1]} : vector<8x96xf32> to vector<8x32xf32>
    %166 = vector.extract_strided_slice %156 {offsets = [0, 96], sizes = [8, 32], strides = [1, 1]} : vector<8x128xf32> to vector<8x32xf32>
    %167 = math.tanh %166 : vector<8x32xf32>
    %168 = arith.index_cast %arg0 : i32 to index
    %c0_65 = arith.constant 0 : index
    %c0_66 = arith.constant 0 : index
    %169 = vector.load %arg12[%168, %c0_65, %c0_66] : memref<2x8x32xf32, #tpu.memory_space<vmem>>, vector<1x8x32xf32>
    %170 = vector.shape_cast %169 : vector<1x8x32xf32> to vector<8x32xf32>
    %171 = arith.mulf %164, %170 : vector<8x32xf32>
    %172 = arith.mulf %163, %167 : vector<8x32xf32>
    %173 = arith.addf %171, %172 : vector<8x32xf32>
    %174 = math.tanh %173 : vector<8x32xf32>
    %175 = arith.mulf %165, %174 : vector<8x32xf32>
    %176 = arith.index_cast %arg0 : i32 to index
    %c0_67 = arith.constant 0 : index
    %c0_68 = arith.constant 0 : index
    %177 = vector.load %arg12[%176, %c0_67, %c0_68] : memref<2x8x32xf32, #tpu.memory_space<vmem>>, vector<1x8x32xf32>
    %178 = vector.shape_cast %177 : vector<1x8x32xf32> to vector<8x32xf32>
    %179 = vector.shape_cast %173 : vector<8x32xf32> to vector<1x8x32xf32>
    tpu.vector_store %arg12[%176, %c0_67, %c0_68], %179 {strides = array<i32>} : memref<2x8x32xf32, #tpu.memory_space<vmem>>, vector<1x8x32xf32>,
    %180 = arith.index_cast %arg0 : i32 to index
    %c0_69 = arith.constant 0 : index
    %c0_70 = arith.constant 0 : index
    %181 = vector.load %arg11[%180, %c0_69, %c0_70] : memref<2x8x32xf32, #tpu.memory_space<vmem>>, vector<1x8x32xf32>
    %182 = vector.shape_cast %181 : vector<1x8x32xf32> to vector<8x32xf32>
    %183 = vector.shape_cast %175 : vector<8x32xf32> to vector<1x8x32xf32>
    tpu.vector_store %arg11[%180, %c0_69, %c0_70], %183 {strides = array<i32>} : memref<2x8x32xf32, #tpu.memory_space<vmem>>, vector<1x8x32xf32>,
    %184 = arith.index_cast %148 : i32 to index
    %c0_71 = arith.constant 0 : index
    %185 = vector.load %arg10[%184, %c0_71] : memref<64x32xf32, #tpu.memory_space<vmem>>, vector<8x32xf32>
    tpu.vector_store %arg10[%184, %c0_71], %175 {strides = array<i32>} : memref<64x32xf32, #tpu.memory_space<vmem>>, vector<8x32xf32>,
    %c4_i32 = arith.constant 4 : i32
    %c2_i32_72 = arith.constant 2 : i32
    %186 = arith.muli %c2_i32_72, %c4_i32 : i32
    %c7_i32_73 = arith.constant 7 : i32
    %187 = arith.subi %c7_i32_73, %186 : i32
    %188 = arith.muli %arg0, %187 : i32
    %189 = arith.addi %c4_i32, %188 : i32
    %c8_i32_74 = arith.constant 8 : i32
    %190 = arith.muli %189, %c8_i32_74 : i32
    %191 = tpu.assume_multiple %190, 8 : i32
    %192 = arith.index_cast %191 : i32 to index
    %c0_75 = arith.constant 0 : index
    %193 = vector.load %arg9[%192, %c0_75] : memref<64x128xf32, #tpu.memory_space<vmem>>, vector<8x128xf32>
    %194 = arith.index_cast %arg0 : i32 to index
    %c0_76 = arith.constant 0 : index
    %c0_77 = arith.constant 0 : index
    %195 = vector.load %arg11[%194, %c0_76, %c0_77] : memref<2x8x32xf32, #tpu.memory_space<vmem>>, vector<1x8x32xf32>
    %196 = vector.shape_cast %195 : vector<1x8x32xf32> to vector<8x32xf32>
    %197 = arith.truncf %196 : vector<8x32xf32> to vector<8x32xbf16>
    %cst_78 = arith.constant dense<0.000000e+00> : vector<8x128xf32>
    %198 = tpu.matmul %197, %13, %cst_78 {dimension_numbers = #tpu.dot_dimension_numbers<[1], [0], [0], [1], [0, 0, 1, 1], [], []>} : vector<8x32xbf16>, vector<32x128xbf16>, vector<8x128xf32> -> vector<8x128xf32>
    %199 = arith.addf %193, %198 : vector<8x128xf32>
    %200 = vector.extract_strided_slice %199 {offsets = [0, 0], sizes = [8, 96], strides = [1, 1]} : vector<8x128xf32> to vector<8x96xf32>
    %201 = arith.negf %200 : vector<8x96xf32>
    %202 = math.exp %201 : vector<8x96xf32>
    %cst_79 = arith.constant 1.000000e+00 : f32
    %203 = vector.broadcast %cst_79 : f32 to vector<8x96xf32>
    %204 = arith.addf %203, %202 : vector<8x96xf32>
    %205 = arith.divf %203, %204 : vector<8x96xf32>
    %206 = vector.extract_strided_slice %205 {offsets = [0, 0], sizes = [8, 32], strides = [1, 1]} : vector<8x96xf32> to vector<8x32xf32>
    %207 = vector.extract_strided_slice %205 {offsets = [0, 32], sizes = [8, 32], strides = [1, 1]} : vector<8x96xf32> to vector<8x32xf32>
    %208 = vector.extract_strided_slice %205 {offsets = [0, 64], sizes = [8, 32], strides = [1, 1]} : vector<8x96xf32> to vector<8x32xf32>
    %209 = vector.extract_strided_slice %199 {offsets = [0, 96], sizes = [8, 32], strides = [1, 1]} : vector<8x128xf32> to vector<8x32xf32>
    %210 = math.tanh %209 : vector<8x32xf32>
    %211 = arith.index_cast %arg0 : i32 to index
    %c0_80 = arith.constant 0 : index
    %c0_81 = arith.constant 0 : index
    %212 = vector.load %arg12[%211, %c0_80, %c0_81] : memref<2x8x32xf32, #tpu.memory_space<vmem>>, vector<1x8x32xf32>
    %213 = vector.shape_cast %212 : vector<1x8x32xf32> to vector<8x32xf32>
    %214 = arith.mulf %207, %213 : vector<8x32xf32>
    %215 = arith.mulf %206, %210 : vector<8x32xf32>
    %216 = arith.addf %214, %215 : vector<8x32xf32>
    %217 = math.tanh %216 : vector<8x32xf32>
    %218 = arith.mulf %208, %217 : vector<8x32xf32>
    %219 = arith.index_cast %arg0 : i32 to index
    %c0_82 = arith.constant 0 : index
    %c0_83 = arith.constant 0 : index
    %220 = vector.load %arg12[%219, %c0_82, %c0_83] : memref<2x8x32xf32, #tpu.memory_space<vmem>>, vector<1x8x32xf32>
    %221 = vector.shape_cast %220 : vector<1x8x32xf32> to vector<8x32xf32>
    %222 = vector.shape_cast %216 : vector<8x32xf32> to vector<1x8x32xf32>
    tpu.vector_store %arg12[%219, %c0_82, %c0_83], %222 {strides = array<i32>} : memref<2x8x32xf32, #tpu.memory_space<vmem>>, vector<1x8x32xf32>,
    %223 = arith.index_cast %arg0 : i32 to index
    %c0_84 = arith.constant 0 : index
    %c0_85 = arith.constant 0 : index
    %224 = vector.load %arg11[%223, %c0_84, %c0_85] : memref<2x8x32xf32, #tpu.memory_space<vmem>>, vector<1x8x32xf32>
    %225 = vector.shape_cast %224 : vector<1x8x32xf32> to vector<8x32xf32>
    %226 = vector.shape_cast %218 : vector<8x32xf32> to vector<1x8x32xf32>
    tpu.vector_store %arg11[%223, %c0_84, %c0_85], %226 {strides = array<i32>} : memref<2x8x32xf32, #tpu.memory_space<vmem>>, vector<1x8x32xf32>,
    %227 = arith.index_cast %191 : i32 to index
    %c0_86 = arith.constant 0 : index
    %228 = vector.load %arg10[%227, %c0_86] : memref<64x32xf32, #tpu.memory_space<vmem>>, vector<8x32xf32>
    tpu.vector_store %arg10[%227, %c0_86], %218 {strides = array<i32>} : memref<64x32xf32, #tpu.memory_space<vmem>>, vector<8x32xf32>,
    %c5_i32 = arith.constant 5 : i32
    %c2_i32_87 = arith.constant 2 : i32
    %229 = arith.muli %c2_i32_87, %c5_i32 : i32
    %c7_i32_88 = arith.constant 7 : i32
    %230 = arith.subi %c7_i32_88, %229 : i32
    %231 = arith.muli %arg0, %230 : i32
    %232 = arith.addi %c5_i32, %231 : i32
    %c8_i32_89 = arith.constant 8 : i32
    %233 = arith.muli %232, %c8_i32_89 : i32
    %234 = tpu.assume_multiple %233, 8 : i32
    %235 = arith.index_cast %234 : i32 to index
    %c0_90 = arith.constant 0 : index
    %236 = vector.load %arg9[%235, %c0_90] : memref<64x128xf32, #tpu.memory_space<vmem>>, vector<8x128xf32>
    %237 = arith.index_cast %arg0 : i32 to index
    %c0_91 = arith.constant 0 : index
    %c0_92 = arith.constant 0 : index
    %238 = vector.load %arg11[%237, %c0_91, %c0_92] : memref<2x8x32xf32, #tpu.memory_space<vmem>>, vector<1x8x32xf32>
    %239 = vector.shape_cast %238 : vector<1x8x32xf32> to vector<8x32xf32>
    %240 = arith.truncf %239 : vector<8x32xf32> to vector<8x32xbf16>
    %cst_93 = arith.constant dense<0.000000e+00> : vector<8x128xf32>
    %241 = tpu.matmul %240, %13, %cst_93 {dimension_numbers = #tpu.dot_dimension_numbers<[1], [0], [0], [1], [0, 0, 1, 1], [], []>} : vector<8x32xbf16>, vector<32x128xbf16>, vector<8x128xf32> -> vector<8x128xf32>
    %242 = arith.addf %236, %241 : vector<8x128xf32>
    %243 = vector.extract_strided_slice %242 {offsets = [0, 0], sizes = [8, 96], strides = [1, 1]} : vector<8x128xf32> to vector<8x96xf32>
    %244 = arith.negf %243 : vector<8x96xf32>
    %245 = math.exp %244 : vector<8x96xf32>
    %cst_94 = arith.constant 1.000000e+00 : f32
    %246 = vector.broadcast %cst_94 : f32 to vector<8x96xf32>
    %247 = arith.addf %246, %245 : vector<8x96xf32>
    %248 = arith.divf %246, %247 : vector<8x96xf32>
    %249 = vector.extract_strided_slice %248 {offsets = [0, 0], sizes = [8, 32], strides = [1, 1]} : vector<8x96xf32> to vector<8x32xf32>
    %250 = vector.extract_strided_slice %248 {offsets = [0, 32], sizes = [8, 32], strides = [1, 1]} : vector<8x96xf32> to vector<8x32xf32>
    %251 = vector.extract_strided_slice %248 {offsets = [0, 64], sizes = [8, 32], strides = [1, 1]} : vector<8x96xf32> to vector<8x32xf32>
    %252 = vector.extract_strided_slice %242 {offsets = [0, 96], sizes = [8, 32], strides = [1, 1]} : vector<8x128xf32> to vector<8x32xf32>
    %253 = math.tanh %252 : vector<8x32xf32>
    %254 = arith.index_cast %arg0 : i32 to index
    %c0_95 = arith.constant 0 : index
    %c0_96 = arith.constant 0 : index
    %255 = vector.load %arg12[%254, %c0_95, %c0_96] : memref<2x8x32xf32, #tpu.memory_space<vmem>>, vector<1x8x32xf32>
    %256 = vector.shape_cast %255 : vector<1x8x32xf32> to vector<8x32xf32>
    %257 = arith.mulf %250, %256 : vector<8x32xf32>
    %258 = arith.mulf %249, %253 : vector<8x32xf32>
    %259 = arith.addf %257, %258 : vector<8x32xf32>
    %260 = math.tanh %259 : vector<8x32xf32>
    %261 = arith.mulf %251, %260 : vector<8x32xf32>
    %262 = arith.index_cast %arg0 : i32 to index
    %c0_97 = arith.constant 0 : index
    %c0_98 = arith.constant 0 : index
    %263 = vector.load %arg12[%262, %c0_97, %c0_98] : memref<2x8x32xf32, #tpu.memory_space<vmem>>, vector<1x8x32xf32>
    %264 = vector.shape_cast %263 : vector<1x8x32xf32> to vector<8x32xf32>
    %265 = vector.shape_cast %259 : vector<8x32xf32> to vector<1x8x32xf32>
    tpu.vector_store %arg12[%262, %c0_97, %c0_98], %265 {strides = array<i32>} : memref<2x8x32xf32, #tpu.memory_space<vmem>>, vector<1x8x32xf32>,
    %266 = arith.index_cast %arg0 : i32 to index
    %c0_99 = arith.constant 0 : index
    %c0_100 = arith.constant 0 : index
    %267 = vector.load %arg11[%266, %c0_99, %c0_100] : memref<2x8x32xf32, #tpu.memory_space<vmem>>, vector<1x8x32xf32>
    %268 = vector.shape_cast %267 : vector<1x8x32xf32> to vector<8x32xf32>
    %269 = vector.shape_cast %261 : vector<8x32xf32> to vector<1x8x32xf32>
    tpu.vector_store %arg11[%266, %c0_99, %c0_100], %269 {strides = array<i32>} : memref<2x8x32xf32, #tpu.memory_space<vmem>>, vector<1x8x32xf32>,
    %270 = arith.index_cast %234 : i32 to index
    %c0_101 = arith.constant 0 : index
    %271 = vector.load %arg10[%270, %c0_101] : memref<64x32xf32, #tpu.memory_space<vmem>>, vector<8x32xf32>
    tpu.vector_store %arg10[%270, %c0_101], %261 {strides = array<i32>} : memref<64x32xf32, #tpu.memory_space<vmem>>, vector<8x32xf32>,
    %c6_i32 = arith.constant 6 : i32
    %c2_i32_102 = arith.constant 2 : i32
    %272 = arith.muli %c2_i32_102, %c6_i32 : i32
    %c7_i32_103 = arith.constant 7 : i32
    %273 = arith.subi %c7_i32_103, %272 : i32
    %274 = arith.muli %arg0, %273 : i32
    %275 = arith.addi %c6_i32, %274 : i32
    %c8_i32_104 = arith.constant 8 : i32
    %276 = arith.muli %275, %c8_i32_104 : i32
    %277 = tpu.assume_multiple %276, 8 : i32
    %278 = arith.index_cast %277 : i32 to index
    %c0_105 = arith.constant 0 : index
    %279 = vector.load %arg9[%278, %c0_105] : memref<64x128xf32, #tpu.memory_space<vmem>>, vector<8x128xf32>
    %280 = arith.index_cast %arg0 : i32 to index
    %c0_106 = arith.constant 0 : index
    %c0_107 = arith.constant 0 : index
    %281 = vector.load %arg11[%280, %c0_106, %c0_107] : memref<2x8x32xf32, #tpu.memory_space<vmem>>, vector<1x8x32xf32>
    %282 = vector.shape_cast %281 : vector<1x8x32xf32> to vector<8x32xf32>
    %283 = arith.truncf %282 : vector<8x32xf32> to vector<8x32xbf16>
    %cst_108 = arith.constant dense<0.000000e+00> : vector<8x128xf32>
    %284 = tpu.matmul %283, %13, %cst_108 {dimension_numbers = #tpu.dot_dimension_numbers<[1], [0], [0], [1], [0, 0, 1, 1], [], []>} : vector<8x32xbf16>, vector<32x128xbf16>, vector<8x128xf32> -> vector<8x128xf32>
    %285 = arith.addf %279, %284 : vector<8x128xf32>
    %286 = vector.extract_strided_slice %285 {offsets = [0, 0], sizes = [8, 96], strides = [1, 1]} : vector<8x128xf32> to vector<8x96xf32>
    %287 = arith.negf %286 : vector<8x96xf32>
    %288 = math.exp %287 : vector<8x96xf32>
    %cst_109 = arith.constant 1.000000e+00 : f32
    %289 = vector.broadcast %cst_109 : f32 to vector<8x96xf32>
    %290 = arith.addf %289, %288 : vector<8x96xf32>
    %291 = arith.divf %289, %290 : vector<8x96xf32>
    %292 = vector.extract_strided_slice %291 {offsets = [0, 0], sizes = [8, 32], strides = [1, 1]} : vector<8x96xf32> to vector<8x32xf32>
    %293 = vector.extract_strided_slice %291 {offsets = [0, 32], sizes = [8, 32], strides = [1, 1]} : vector<8x96xf32> to vector<8x32xf32>
    %294 = vector.extract_strided_slice %291 {offsets = [0, 64], sizes = [8, 32], strides = [1, 1]} : vector<8x96xf32> to vector<8x32xf32>
    %295 = vector.extract_strided_slice %285 {offsets = [0, 96], sizes = [8, 32], strides = [1, 1]} : vector<8x128xf32> to vector<8x32xf32>
    %296 = math.tanh %295 : vector<8x32xf32>
    %297 = arith.index_cast %arg0 : i32 to index
    %c0_110 = arith.constant 0 : index
    %c0_111 = arith.constant 0 : index
    %298 = vector.load %arg12[%297, %c0_110, %c0_111] : memref<2x8x32xf32, #tpu.memory_space<vmem>>, vector<1x8x32xf32>
    %299 = vector.shape_cast %298 : vector<1x8x32xf32> to vector<8x32xf32>
    %300 = arith.mulf %293, %299 : vector<8x32xf32>
    %301 = arith.mulf %292, %296 : vector<8x32xf32>
    %302 = arith.addf %300, %301 : vector<8x32xf32>
    %303 = math.tanh %302 : vector<8x32xf32>
    %304 = arith.mulf %294, %303 : vector<8x32xf32>
    %305 = arith.index_cast %arg0 : i32 to index
    %c0_112 = arith.constant 0 : index
    %c0_113 = arith.constant 0 : index
    %306 = vector.load %arg12[%305, %c0_112, %c0_113] : memref<2x8x32xf32, #tpu.memory_space<vmem>>, vector<1x8x32xf32>
    %307 = vector.shape_cast %306 : vector<1x8x32xf32> to vector<8x32xf32>
    %308 = vector.shape_cast %302 : vector<8x32xf32> to vector<1x8x32xf32>
    tpu.vector_store %arg12[%305, %c0_112, %c0_113], %308 {strides = array<i32>} : memref<2x8x32xf32, #tpu.memory_space<vmem>>, vector<1x8x32xf32>,
    %309 = arith.index_cast %arg0 : i32 to index
    %c0_114 = arith.constant 0 : index
    %c0_115 = arith.constant 0 : index
    %310 = vector.load %arg11[%309, %c0_114, %c0_115] : memref<2x8x32xf32, #tpu.memory_space<vmem>>, vector<1x8x32xf32>
    %311 = vector.shape_cast %310 : vector<1x8x32xf32> to vector<8x32xf32>
    %312 = vector.shape_cast %304 : vector<8x32xf32> to vector<1x8x32xf32>
    tpu.vector_store %arg11[%309, %c0_114, %c0_115], %312 {strides = array<i32>} : memref<2x8x32xf32, #tpu.memory_space<vmem>>, vector<1x8x32xf32>,
    %313 = arith.index_cast %277 : i32 to index
    %c0_116 = arith.constant 0 : index
    %314 = vector.load %arg10[%313, %c0_116] : memref<64x32xf32, #tpu.memory_space<vmem>>, vector<8x32xf32>
    tpu.vector_store %arg10[%313, %c0_116], %304 {strides = array<i32>} : memref<64x32xf32, #tpu.memory_space<vmem>>, vector<8x32xf32>,
    %c7_i32_117 = arith.constant 7 : i32
    %c2_i32_118 = arith.constant 2 : i32
    %315 = arith.muli %c2_i32_118, %c7_i32_117 : i32
    %c7_i32_119 = arith.constant 7 : i32
    %316 = arith.subi %c7_i32_119, %315 : i32
    %317 = arith.muli %arg0, %316 : i32
    %318 = arith.addi %c7_i32_117, %317 : i32
    %c8_i32_120 = arith.constant 8 : i32
    %319 = arith.muli %318, %c8_i32_120 : i32
    %320 = tpu.assume_multiple %319, 8 : i32
    %321 = arith.index_cast %320 : i32 to index
    %c0_121 = arith.constant 0 : index
    %322 = vector.load %arg9[%321, %c0_121] : memref<64x128xf32, #tpu.memory_space<vmem>>, vector<8x128xf32>
    %323 = arith.index_cast %arg0 : i32 to index
    %c0_122 = arith.constant 0 : index
    %c0_123 = arith.constant 0 : index
    %324 = vector.load %arg11[%323, %c0_122, %c0_123] : memref<2x8x32xf32, #tpu.memory_space<vmem>>, vector<1x8x32xf32>
    %325 = vector.shape_cast %324 : vector<1x8x32xf32> to vector<8x32xf32>
    %326 = arith.truncf %325 : vector<8x32xf32> to vector<8x32xbf16>
    %cst_124 = arith.constant dense<0.000000e+00> : vector<8x128xf32>
    %327 = tpu.matmul %326, %13, %cst_124 {dimension_numbers = #tpu.dot_dimension_numbers<[1], [0], [0], [1], [0, 0, 1, 1], [], []>} : vector<8x32xbf16>, vector<32x128xbf16>, vector<8x128xf32> -> vector<8x128xf32>
    %328 = arith.addf %322, %327 : vector<8x128xf32>
    %329 = vector.extract_strided_slice %328 {offsets = [0, 0], sizes = [8, 96], strides = [1, 1]} : vector<8x128xf32> to vector<8x96xf32>
    %330 = arith.negf %329 : vector<8x96xf32>
    %331 = math.exp %330 : vector<8x96xf32>
    %cst_125 = arith.constant 1.000000e+00 : f32
    %332 = vector.broadcast %cst_125 : f32 to vector<8x96xf32>
    %333 = arith.addf %332, %331 : vector<8x96xf32>
    %334 = arith.divf %332, %333 : vector<8x96xf32>
    %335 = vector.extract_strided_slice %334 {offsets = [0, 0], sizes = [8, 32], strides = [1, 1]} : vector<8x96xf32> to vector<8x32xf32>
    %336 = vector.extract_strided_slice %334 {offsets = [0, 32], sizes = [8, 32], strides = [1, 1]} : vector<8x96xf32> to vector<8x32xf32>
    %337 = vector.extract_strided_slice %334 {offsets = [0, 64], sizes = [8, 32], strides = [1, 1]} : vector<8x96xf32> to vector<8x32xf32>
    %338 = vector.extract_strided_slice %328 {offsets = [0, 96], sizes = [8, 32], strides = [1, 1]} : vector<8x128xf32> to vector<8x32xf32>
    %339 = math.tanh %338 : vector<8x32xf32>
    %340 = arith.index_cast %arg0 : i32 to index
    %c0_126 = arith.constant 0 : index
    %c0_127 = arith.constant 0 : index
    %341 = vector.load %arg12[%340, %c0_126, %c0_127] : memref<2x8x32xf32, #tpu.memory_space<vmem>>, vector<1x8x32xf32>
    %342 = vector.shape_cast %341 : vector<1x8x32xf32> to vector<8x32xf32>
    %343 = arith.mulf %336, %342 : vector<8x32xf32>
    %344 = arith.mulf %335, %339 : vector<8x32xf32>
    %345 = arith.addf %343, %344 : vector<8x32xf32>
    %346 = math.tanh %345 : vector<8x32xf32>
    %347 = arith.mulf %337, %346 : vector<8x32xf32>
    %348 = arith.index_cast %arg0 : i32 to index
    %c0_128 = arith.constant 0 : index
    %c0_129 = arith.constant 0 : index
    %349 = vector.load %arg12[%348, %c0_128, %c0_129] : memref<2x8x32xf32, #tpu.memory_space<vmem>>, vector<1x8x32xf32>
    %350 = vector.shape_cast %349 : vector<1x8x32xf32> to vector<8x32xf32>
    %351 = vector.shape_cast %345 : vector<8x32xf32> to vector<1x8x32xf32>
    tpu.vector_store %arg12[%348, %c0_128, %c0_129], %351 {strides = array<i32>} : memref<2x8x32xf32, #tpu.memory_space<vmem>>, vector<1x8x32xf32>,
    %352 = arith.index_cast %arg0 : i32 to index
    %c0_130 = arith.constant 0 : index
    %c0_131 = arith.constant 0 : index
    %353 = vector.load %arg11[%352, %c0_130, %c0_131] : memref<2x8x32xf32, #tpu.memory_space<vmem>>, vector<1x8x32xf32>
    %354 = vector.shape_cast %353 : vector<1x8x32xf32> to vector<8x32xf32>
    %355 = vector.shape_cast %347 : vector<8x32xf32> to vector<1x8x32xf32>
    tpu.vector_store %arg11[%352, %c0_130, %c0_131], %355 {strides = array<i32>} : memref<2x8x32xf32, #tpu.memory_space<vmem>>, vector<1x8x32xf32>,
    %356 = arith.index_cast %320 : i32 to index
    %c0_132 = arith.constant 0 : index
    %357 = vector.load %arg10[%356, %c0_132] : memref<64x32xf32, #tpu.memory_space<vmem>>, vector<8x32xf32>
    tpu.vector_store %arg10[%356, %c0_132], %347 {strides = array<i32>} : memref<64x32xf32, #tpu.memory_space<vmem>>, vector<8x32xf32>,
    %c8_i32_133 = arith.constant 8 : i32
    %c0_134 = arith.constant 0 : index
    %c0_135 = arith.constant 0 : index
    %358 = vector.load %arg10[%c0_134, %c0_135] : memref<64x32xf32, #tpu.memory_space<vmem>>, vector<64x32xf32>
    %359 = arith.truncf %358 : vector<64x32xf32> to vector<64x32xbf16>
    %c0_136 = arith.constant 0 : index
    %c0_137 = arith.constant 0 : index
    %c0_138 = arith.constant 0 : index
    %360 = vector.load %arg8[%c0_136, %c0_137, %c0_138] : memref<1x64x32xbf16, #tpu.memory_space<vmem>>, vector<1x64x32xbf16>
    %361 = vector.shape_cast %360 : vector<1x64x32xbf16> to vector<64x32xbf16>
    %362 = vector.shape_cast %359 : vector<64x32xbf16> to vector<1x64x32xbf16>
    tpu.vector_store %arg8[%c0_136, %c0_137, %c0_138], %362 {strides = array<i32>} : memref<1x64x32xbf16, #tpu.memory_space<vmem>>, vector<1x64x32xbf16>,
    return
  }
  func.func @transform_0(%arg0: i32, %arg1: i32) -> (i32, i32) {
    %c2_i32 = arith.constant 2 : i32
    %0 = arith.muli %c2_i32, %arg0 : i32
    %c1_i32 = arith.constant 1 : i32
    %1 = arith.subi %c1_i32, %0 : i32
    %2 = arith.muli %arg1, %1 : i32
    %c0_i32 = arith.constant 0 : i32
    %3 = arith.muli %arg0, %c0_i32 : i32
    %4 = arith.addi %2, %3 : i32
    %c0_i32_0 = arith.constant 0 : i32
    %c0_i32_1 = arith.constant 0 : i32
    return %4, %c0_i32_0 : i32, i32
  }
  func.func @transform_1(%arg0: i32, %arg1: i32) -> (i32, i32, i32) {
    %c0_i32 = arith.constant 0 : i32
    %c0_i32_0 = arith.constant 0 : i32
    %c0_i32_1 = arith.constant 0 : i32
    return %arg0, %c0_i32, %c0_i32_0 : i32, i32, i32
  }
  func.func @transform_2(%arg0: i32, %arg1: i32) -> (i32, i32, i32) {
    %c0_i32 = arith.constant 0 : i32
    %c0_i32_0 = arith.constant 0 : i32
    %c0_i32_1 = arith.constant 0 : i32
    return %arg0, %c0_i32, %c0_i32_0 : i32, i32, i32
  }
  func.func @transform_3(%arg0: i32, %arg1: i32) -> (i32, i32, i32) {
    %c0_i32 = arith.constant 0 : i32
    %c0_i32_0 = arith.constant 0 : i32
    %c0_i32_1 = arith.constant 0 : i32
    return %arg0, %c0_i32, %c0_i32_0 : i32, i32, i32
  }
  func.func @transform_4(%arg0: i32, %arg1: i32) -> (i32, i32, i32) {
    %c0_i32 = arith.constant 0 : i32
    %c0_i32_0 = arith.constant 0 : i32
    %c0_i32_1 = arith.constant 0 : i32
    return %arg0, %c0_i32, %c0_i32_0 : i32, i32, i32
  }
  func.func @transform_5(%arg0: i32, %arg1: i32) -> (i32, i32, i32) {
    %c0_i32 = arith.constant 0 : i32
    %c0_i32_0 = arith.constant 0 : i32
    %c0_i32_1 = arith.constant 0 : i32
    return %arg0, %c0_i32, %c0_i32_0 : i32, i32, i32
  }
  func.func @transform_6(%arg0: i32, %arg1: i32) -> (i32, i32, i32) {
    %c2_i32 = arith.constant 2 : i32
    %0 = arith.muli %c2_i32, %arg0 : i32
    %c1_i32 = arith.constant 1 : i32
    %1 = arith.subi %c1_i32, %0 : i32
    %2 = arith.muli %arg1, %1 : i32
    %c0_i32 = arith.constant 0 : i32
    %3 = arith.muli %arg0, %c0_i32 : i32
    %4 = arith.addi %2, %3 : i32
    %c0_i32_0 = arith.constant 0 : i32
    %c0_i32_1 = arith.constant 0 : i32
    return %arg0, %4, %c0_i32_0 : i32, i32, i32
  }
}

</mosaic_0001>

<bundles_post_ra>
// kernel: lstm_encoder_forward.3
= control target key start
LH: loop header
LB: loop body
LE: loop exit
PB: predicated region body
PF: predicated region fallthrough
CT: control target
= control target key end

     0   :  { %s1955_s21 = smov 0   ;;  %s1957_s22 = smov 0   ;;  %s2256_s0 = inlined_call_operand.vmem [shape: bf16[64,64], index: 0, kind: input, shape index: {}]   ;;  %s2257_s1 = inlined_call_operand.vmem [shape: bf16[2,64,128], index: 1, kind: input, shape index: {}]   ;;  %s2258_s2 = inlined_call_operand.vmem [shape: bf16[2,32,128], index: 2, kind: input, shape index: {}]   ;;  %s2259_s3 = inlined_call_operand.vmem [shape: f32[2,1,128], index: 3, kind: input, shape index: {}]   ;;  %s2260_s4 = inlined_call_operand.vmem [shape: f32[2,8,32], index: 4, kind: input, shape index: {}]   ;;  %s2261_s5 = inlined_call_operand.vmem [shape: f32[2,8,32], index: 5, kind: input, shape index: {}]   ;;  %s2262_s6 = inlined_call_operand.vmem [shape: bf16[2,64,32], index: 6, kind: output, shape index: {}]  }
   0x1   :  { %s1959_s23 = smov 0  }
   0x2 LB: > { %s28_s24 = sadd.s32 1, %s1909_s22  ;;  %p1586_p0 = scmp.ge.s32.totalorder %s1913_s23, 1  ;;  %s1913_s23 = sphi %s1959_s23, %s16_s23   ;;  %s1909_s22 = sphi %s1957_s22, %s2264_s22   ;;  %s1905_s21 = sphi %s1955_s21, %s2263_s21  }
   0x3   : > { %p30_p1 = scmp.ge.s32.totalorder %s28_s24, 2  ;;  %p291_p2 = scmp.lt.s32.totalorder %s1913_s23, 3 }
   0x5   : > { %s2266_s24 = smov (%p30_p1, %s28_s24), 0  ;;  %p292_p3 = pnand %p1586_p0, %p291_p2 }
   0x6   : > { %p364_p4 = scmp.lt.s32.totalorder (!%p292_p3), %s1905_s21, 1  ;;  %v1821_v0 = vld [vmem:[%s2256_s0] sm:$0xff] (!%p292_p3)   ;;  %s1980_s27 = sshll.u32 (!%p292_p3), %s1905_s21, 3  ;;  %vm481_vm0 = vcmask (!%p292_p3), 523264   ;;  %v1915_v1 = vmov (!%p292_p3), 0.0   ;;  %vm409_vm1 = vcmask (!%p292_p3), 261120  }
   0x7   : > { %295 = sbr.rel (%p292_p3) target bundleno = 5756 (0x167c), region = 44  ;;  %1716 = vmatprep.mubr.msk.bf16.mxu0 (!%p292_p3), %vm481_vm0, %v1821_v0  ;;  %1724 = vmatprep.subr.bf16.mxu1 (!%p292_p3), %v1915_v1  ;;  %vm1916_vm2 = vmmov (!%p292_p3), 0   ;;  %s2006_s17 = scalar_lea.vmem (!%p292_p3), [#allocation4], %s1980_s27  ;;  %v1822_v11 = vld [vmem:[%s2256_s0 + $0x8] sm:$0xff] (!%p292_p3)   ;;  %v1823_v12 = vld [vmem:[%s2256_s0 + $0x10] sm:$0xff] (!%p292_p3)   ;;  %v1824_v13 = vld [vmem:[%s2256_s0 + $0x18] sm:$0xff] (!%p292_p3)  }
   0x8   : > { %1728 = vmatprep.mubr.msk.bf16.mxu1 (!%p292_p3), %vm1916_vm2, %v1915_v1  ;;  %s2051_s11 = scalar_lea.vmem (!%p292_p3), [#allocation5], %s1980_s27  ;;  %s1918_s18 = smov (!%p292_p3), 96   ;;  %vm1359_vm3 = vcmask (!%p292_p3), 257024  }
   0x9   : > { %s1919_s19 = smov (!%p292_p3), 64   ;;  %s1616_s25 = smul.u32 (!%p292_p3), 40, %s1905_s21 }
   0xa   : > { %s1622_s7 = smul.u32 (!%p292_p3), 24, %s1905_s21  ;;  %s1477_s12 = scalar_lea.vmem (!%p292_p3), [#allocation2], %s1980_s27 }
   0xb   : > { %s1462_s26 = scalar_lea.vmem (!%p292_p3), [#allocation2], %s1616_s25  ;;  %s1466_s30 = scalar_lea.vmem (!%p292_p3), [#allocation3], %s1616_s25 }
   0xe   : > { %s1983_s28 = scalar_select %p364_p4, %s1905_s21, 1 }
  0x10   : > { %s1665_s29 = sshll.u32 %s1983_s28, 5  ;;  %s1666_s9 = sshll.u32 %s1983_s28, 4 }
  0x11   : > { %s368_s8 = scalar_lea.vmem %s2257_s1, %s1665_s29  ;;  %s1592_s10 = sshll.u32 %s1983_s28, 3 }
  0x12   : > { %v1817_v2 = vld [vmem:[%s368_s8] sm:$0xff]   ;;  %s380_s13 = scalar_lea.vmem %s2260_s4, %s1592_s10  ;;  %v1818_v3 = vld [vmem:[%s368_s8 + $0x8] sm:$0xff]   ;;  %s373_s16 = scalar_lea.vmem %s2258_s2, %s1666_s9  ;;  %v1819_v5 = vld [vmem:[%s368_s8 + $0x10] sm:$0xff]  }
  0x13   : > { %v406_v4 = vld [vmem:[%s380_s13] sm:$0xff]  ;;  %1708 = vmatprep.subr.bf16.mxu0 %v1817_v2  ;;  %v2013_v7 = vld [vmem:[%s373_s16 + $0x8] sm:$0xff]   ;;  %v1820_v8 = vld [vmem:[%s368_s8 + $0x18] sm:$0xff]   ;;  %s384_s9 = scalar_lea.vmem %s2261_s5, %s1592_s10  ;;  %s376_s14 = scalar_lea.vmem %s2259_s3, %s1983_s28 }
  0x14   : > { %410 = vst.msk [vmem:[%s2006_s17] sm:$0xff] %vm409_vm1, %v406_v4  ;;  %1709 = vmatpush3.bf16.msra.mxu0 %v1817_v2  ;;  %v2010_v6 = vld [vmem:[%s373_s16] sm:$0xff]   ;;  %s571_s10 = smul.u32 56, %s1905_s21  ;;  %s1917_s16 = smov 32  }
  0x15   : > { %1710 = vmatprep.subr.bf16.mxu0 %v1818_v3  ;;  %1725 = vmatpush3.bf16.msra.mxu1 %v2010_v6  ;;  %v411_v14 = vld [vmem:[%s384_s9] sm:$0xff]  ;;  %s1470_s8 = scalar_lea.vmem [#allocation2], %s1622_s7  ;;  %s1474_s9 = scalar_lea.vmem [#allocation3], %s1622_s7 }
  0x16   : > { %1726 = vmatprep.subr.bf16.mxu1 %v1915_v1  ;;  %413 = vst.msk [vmem:[%s2051_s11] sm:$0xff] %vm409_vm1, %v411_v14  ;;  %v1598_v17 = vld [vmem:[%s376_s14] ss:$0 sm:$0xff]  ;;  %s572_s15 = scalar_lea.vmem [#allocation2], %s571_s10  ;;  %s675_s20 = scalar_lea.vmem [#allocation3], %s571_s10 }
  0x17   : > { %s1480_s13 = scalar_lea.vmem [#allocation3], %s1980_s27  ;;  %s952_s14 = ssub.s32 4, %s1905_s21 }
  0x18   : > { %1711 = vmatpush3.bf16.msra.mxu0 %v1818_v3  ;;  %s2158_s10 = sshll.u32 %s952_s14, 3 }
  0x19   : > { %1712 = vmatprep.subr.bf16.mxu0 %v1819_v5  ;;  %1727 = vmatpush3.bf16.msra.mxu1 %v2013_v7  ;;  %s954_s27 = scalar_lea.vmem [#allocation2], %s2158_s10 }
  0x1a   : > { %1732 = vmatprep.subr.bf16.mxu1 %v1915_v1 }
  0x1b   : > { %v576_v9 = vld [vmem:[%s2006_s17] sm:$0xff] }
  0x1c   : > { %1713 = vmatpush3.bf16.msra.mxu0 %v1819_v5  ;;  %v577_v10 = vpack.c.bf16 %v576_v9, %v576_v9 }
  0x1d   : > { %1714 = vmatprep.subr.bf16.mxu0 %v1820_v8  ;;  %v643_v39 = vld [vmem:[%s2051_s11] sm:$0xff] }
  0x1e   : > { %1729 = vmatmul.mubr.msk.bf16.vlgmr.msra.gmra.mrb[0].mxu1 %vm409_vm1, %v577_v10 }
  0x1f   : > { %1733 = vmatpush3.bf16.msra.mxu1 %v2010_v6  ;;  %1736 = vmatprep.mubr.msk.bf16.mxu1 %vm1916_vm2, %v1915_v1 }
  0x20   : > { %1715 = vmatpush3.bf16.msra.mxu0 %v1820_v8  ;;  %1734 = vmatprep.subr.bf16.mxu1 %v1915_v1 }
  0x21   : > { %1748 = vmatprep.subr.bf16.mxu0 %v1915_v1 }
  0x23   : > { %1717 = vmatmul.mubr.msk.bf16.vlgmr.msra.gmra.mrb[0].mxu0 %vm481_vm0, %v1822_v11  ;;  %1735 = vmatpush3.bf16.msra.mxu1 %v2013_v7 }
  0x24   : > { %1720 = vmatprep.mubr.msk.bf16.mxu0 %vm481_vm0, %v1823_v12  ;;  %1740 = vmatprep.subr.bf16.mxu1 %v1915_v1 }
  0x25   : > { %1749 = vmatpush3.bf16.msra.mxu0 %v2010_v6 }
  0x26   : > { %1750 = vmatprep.subr.bf16.mxu0 %v1915_v1 }
  0x29   : > { %1751 = vmatpush3.bf16.msra.mxu0 %v2013_v7 }
  0x2a   : > { %1764 = vmatprep.subr.bf16.mxu0 %v1915_v1 }
  0x2b   : > { %1721 = vmatmul.mubr.msk.bf16.gmra.mrb[4].mxu0 %vm481_vm0, %v1824_v13 }
  0x2c   : > { %1752 = vmatprep.mubr.msk.bf16.mxu0 %vm1916_vm2, %v1915_v1 }
  0xf1   : > { %v628_v15 = vpop.f32.mrb[0].mxu1 }
  0xf2   : > { %v1730_v16 = vpop.f32.mrb[1].mxu1 }
  0xf3   : > { %v631_v18 = vpop.f32.mrb[2].mxu1 }
  0xf4   : > { %v1731_v19 = vpop.f32.mrb[3].mxu1 }
  0xf6   : > { %v1718_v20 = vpop.f32.mrb[0].mxu0 }
  0xf7   : > { %v537_v21 = vadd.f32 %v1718_v20, %v1598_v17  ;;  %v528_v22 = vpop.f32.mrb[1].mxu0 }
  0xf8   : > { %v529_v23 = vadd.f32 %v1598_v17, %v528_v22  ;;  %v1719_v24 = vpop.f32.mrb[2].mxu0 }
  0xf9   : > { %561 = vst [vmem:[#allocation2 + $0x10] sm:$0xff] %v537_v21  ;;  %v540_v25 = vadd.f32 %v1719_v24, %v1598_v17  ;;  %v531_v26 = vpop.f32.mrb[3].mxu0 }
  0xfa   : > { %559 = vst [vmem:[#allocation2] sm:$0xff] %v529_v23  ;;  %v532_v27 = vadd.f32 %v1598_v17, %v531_v26 }
  0xfb   : > { %562 = vst [vmem:[#allocation2 + $0x18] sm:$0xff] %v540_v25 }
  0xfc   : > { %560 = vst [vmem:[#allocation2 + $0x8] sm:$0xff] %v532_v27 }
  0xfe   : > { %v1722_v28 = vpop.f32.mrb[4].mxu0 }
  0xff   : > { %v553_v29 = vadd.f32 %v1722_v28, %v1598_v17  ;;  %v544_v30 = vpop.f32.mrb[5].mxu0 }
 0x100   : > { %v545_v31 = vadd.f32 %v1598_v17, %v544_v30  ;;  %v1723_v32 = vpop.f32.mrb[6].mxu0 }
 0x101   : > { %565 = vst [vmem:[#allocation2 + $0x30] sm:$0xff] %v553_v29  ;;  %v556_v33 = vadd.f32 %v1723_v32, %v1598_v17  ;;  %v547_v34 = vpop.f32.mrb[7].mxu0 }
 0x102   : > { %563 = vst [vmem:[#allocation2 + $0x20] sm:$0xff] %v545_v31  ;;  %v548_v35 = vadd.f32 %v1598_v17, %v547_v34 }
 0x103   : > { %566 = vst [vmem:[#allocation2 + $0x38] sm:$0xff] %v556_v33 }
 0x104   : > { %564 = vst [vmem:[#allocation2 + $0x28] sm:$0xff] %v548_v35 }
 0x10b   : > { %v573_v36 = vld [vmem:[%s572_s15] sm:$0xff]  ;;  %v1617_v58 = vld [vmem:[%s1462_s26 + $0x8] sm:$0xff]  ;;  %v1623_v22 = vld [vmem:[%s1470_s8 + $0x10] sm:$0xff]  ;;  %s1041_s15 = scalar_lea.vmem [#allocation3], %s2158_s10 }
 0x10c   : > { %v634_v37 = vadd.f32 %v628_v15, %v573_v36 }
 0x10e   : > { %1827 = vtanh.f32 %v634_v37  ;;  %v1615_v40 = vmul.f32 -1.442695, %v634_v37 }
 0x110   : > { %1829 = vpow2.f32 %v1615_v40 }
 0x118   : > { %v1828_v38 = vpop.eup %1827 }
 0x119   : > { %650 = vrot.lane.b32.xlu0 %v1828_v38, %s1917_s16 }
 0x11a   : > { %v1830_v41 = vpop.eup %1829 }
 0x11b   : > { %v638_v42 = vadd.f32 1.0, %v1830_v41 }
 0x11d   : > { %645 = vrot.lane.b32.xlu0 %v643_v39, %s1917_s16  ;;  %1831 = vrcp.f32 %v638_v42 }
 0x127   : > { %v1832_v43 = vpop.eup %1831 }
 0x18b   : > { %v651_v44 = vpop.permute.xlu0 %650 }
 0x18c   : > { %v653_v45 = vmul.f32 %v1832_v43, %v651_v44 }
 0x18e   : > { %655 = vrot.lane.b32.xlu1 %v653_v45, %s1917_s16 }
 0x18f   : > { %v646_v46 = vpop.permute.xlu0 %645 }
 0x190   : > { %v648_v47 = vmul.f32 %v1832_v43, %v646_v46 }
 0x200   : > { %v656_v48 = vpop.permute.xlu1 %655 }
 0x201   : > { %v658_v49 = vadd.f32 %v656_v48, %v648_v47  ;;  %v1629_v47 = vld [vmem:[%s1477_s12 + $0x18] sm:$0xff] }
 0x203   : > { %1833 = vtanh.f32 %v658_v49 }
 0x20d   : > { %v1834_v50 = vpop.eup %1833 }
 0x20e   : > { %661 = vrot.lane.b32.xlu1 %v1834_v50, %s1917_s16 }
 0x212   : > { %666 = vrot.lane.b32.xlu1 %v658_v49, %s1918_s18 }
 0x280   : > { %v662_v51 = vpop.permute.xlu1 %661 }
 0x281   : > { %v664_v52 = vmul.f32 %v1832_v43, %v662_v51 }
 0x283   : > { %671 = vrot.lane.b32.xlu0 %v664_v52, %s1919_s19 }
 0x284   : > { %v667_v53 = vpop.permute.xlu1 %666 }
 0x285   : > { %669 = vst.msk [vmem:[%s2051_s11] sm:$0xff] %vm409_vm1, %v667_v53 }
 0x28c   : > { %v735_v54 = vld [vmem:[%s2051_s11] sm:$0xff] }
 0x28d   : > { %737 = vrot.lane.b32.xlu1 %v735_v54, %s1917_s16 }
 0x2f5   : > { %v672_v55 = vpop.permute.xlu0 %671 }
 0x2f6   : > { %674 = vst.msk [vmem:[%s2006_s17] sm:$0xff] %vm409_vm1, %v672_v55  ;;  %676 = vst.msk [vmem:[%s675_s20] sm:$0xff] %vm409_vm1, %v672_v55  ;;  %s1637_s20 = smul.u32 4294967272, %s1905_s21 }
 0x2f8   : > { %s1488_s25 = scalar_lea.vmem [#allocation2], %s1637_s20  ;;  %s1492_s26 = scalar_lea.vmem [#allocation3], %s1637_s20 }
 0x2fd   : > { %v682_v56 = vld [vmem:[%s2006_s17] sm:$0xff] }
 0x2fe   : > { %v683_v57 = vpack.c.bf16 %v682_v56, %v682_v56 }
 0x2ff   : > { %v738_v10 = vpop.permute.xlu1 %737 }
 0x300   : > { %1737 = vmatmul.mubr.msk.bf16.vlgmr.msra.gmra.mrb[4].mxu1 %vm409_vm1, %v683_v57 }
 0x301   : > { %1741 = vmatpush3.bf16.msra.mxu1 %v2010_v6  ;;  %1744 = vmatprep.mubr.msk.bf16.mxu1 %vm1916_vm2, %v1915_v1 }
 0x302   : > { %1742 = vmatprep.subr.bf16.mxu1 %v1915_v1 }
 0x305   : > { %1743 = vmatpush3.bf16.msra.mxu1 %v2013_v7 }
 0x306   : > { %1756 = vmatprep.subr.bf16.mxu1 %v1915_v1 }
 0x3d3   : > { %v721_v59 = vpop.f32.mrb[4].mxu1 }
 0x3d4   : > { %v727_v60 = vadd.f32 %v1617_v58, %v721_v59  ;;  %v1738_v61 = vpop.f32.mrb[5].mxu1 }
 0x3d5   : > { %v724_v62 = vpop.f32.mrb[6].mxu1 }
 0x3d6   : > { %1835 = vtanh.f32 %v727_v60  ;;  %v1739_v63 = vpop.f32.mrb[7].mxu1  ;;  %v1619_v2 = vmul.f32 -1.442695, %v727_v60 }
 0x3d8   : > { %1837 = vpow2.f32 %v1619_v2 }
 0x3e0   : > { %v1836_v0 = vpop.eup %1835 }
 0x3e1   : > { %742 = vrot.lane.b32.xlu0 %v1836_v0, %s1917_s16 }
 0x3e2   : > { %v1838_v3 = vpop.eup %1837 }
 0x3e3   : > { %v731_v4 = vadd.f32 1.0, %v1838_v3 }
 0x3e5   : > { %1839 = vrcp.f32 %v731_v4 }
 0x3ef   : > { %v1840_v5 = vpop.eup %1839 }
 0x3f0   : > { %v740_v11 = vmul.f32 %v1840_v5, %v738_v10 }
 0x453   : > { %v743_v8 = vpop.permute.xlu0 %742 }
 0x454   : > { %v745_v9 = vmul.f32 %v1840_v5, %v743_v8 }
 0x456   : > { %747 = vrot.lane.b32.xlu0 %v745_v9, %s1917_s16 }
 0x4c8   : > { %v748_v12 = vpop.permute.xlu0 %747 }
 0x4c9   : > { %v750_v13 = vadd.f32 %v748_v12, %v740_v11  ;;  %v955_v11 = vld [vmem:[%s954_s27] sm:$0xff] }
 0x4cb   : > { %1841 = vtanh.f32 %v750_v13 }
 0x4d5   : > { %v1842_v14 = vpop.eup %1841 }
 0x4d6   : > { %753 = vrot.lane.b32.xlu1 %v1842_v14, %s1917_s16 }
 0x4da   : > { %758 = vrot.lane.b32.xlu1 %v750_v13, %s1918_s18 }
 0x548   : > { %v754_v15 = vpop.permute.xlu1 %753 }
 0x549   : > { %v756_v16 = vmul.f32 %v1840_v5, %v754_v15 }
 0x54b   : > { %763 = vrot.lane.b32.xlu0 %v756_v16, %s1919_s19 }
 0x54c   : > { %v759_v17 = vpop.permute.xlu1 %758 }
 0x54d   : > { %761 = vst.msk [vmem:[%s2051_s11] sm:$0xff] %vm409_vm1, %v759_v17 }
 0x554   : > { %v827_v18 = vld [vmem:[%s2051_s11] sm:$0xff] }
 0x555   : > { %829 = vrot.lane.b32.xlu1 %v827_v18, %s1917_s16 }
 0x5bd   : > { %v764_v19 = vpop.permute.xlu0 %763 }
 0x5be   : > { %766 = vst.msk [vmem:[%s2006_s17] sm:$0xff] %vm409_vm1, %v764_v19  ;;  %1621 = vst.msk [vmem:[%s1466_s30 + $0x8] sm:$0xff] %vm409_vm1, %v764_v19  ;;  %s1643_s30 = smul.u32 4294967256, %s1905_s21 }
 0x5c0   : > { %s1496_s7 = scalar_lea.vmem [#allocation2], %s1643_s30  ;;  %s1500_s8 = scalar_lea.vmem [#allocation3], %s1643_s30 }
 0x5c5   : > { %v774_v20 = vld [vmem:[%s2006_s17] sm:$0xff] }
 0x5c6   : > { %v775_v21 = vpack.c.bf16 %v774_v20, %v774_v20 }
 0x5c7   : > { %v830_v35 = vpop.permute.xlu1 %829 }
 0x5c8   : > { %1745 = vmatmul.mubr.msk.bf16.vlgmr.msra.gmra.mrb[8].mxu1 %vm409_vm1, %v775_v21 }
 0x5c9   : > { %1757 = vmatpush3.bf16.msra.mxu1 %v2010_v6  ;;  %1760 = vmatprep.mubr.msk.bf16.mxu1 %vm1916_vm2, %v1915_v1 }
 0x5ca   : > { %1758 = vmatprep.subr.bf16.mxu1 %v1915_v1 }
 0x5cd   : > { %1759 = vmatpush3.bf16.msra.mxu1 %v2013_v7 }
 0x5ce   : > { %1772 = vmatprep.subr.bf16.mxu1 %v1915_v1 }
 0x69b   : > { %v813_v23 = vpop.f32.mrb[8].mxu1 }
 0x69c   : > { %v819_v24 = vadd.f32 %v1623_v22, %v813_v23  ;;  %v1746_v25 = vpop.f32.mrb[9].mxu1 }
 0x69d   : > { %v816_v26 = vpop.f32.mrb[10].mxu1 }
 0x69e   : > { %1843 = vtanh.f32 %v819_v24  ;;  %v1747_v27 = vpop.f32.mrb[11].mxu1  ;;  %v1625_v29 = vmul.f32 -1.442695, %v819_v24 }
 0x6a0   : > { %1845 = vpow2.f32 %v1625_v29 }
 0x6a8   : > { %v1844_v28 = vpop.eup %1843 }
 0x6a9   : > { %834 = vrot.lane.b32.xlu0 %v1844_v28, %s1917_s16 }
 0x6aa   : > { %v1846_v30 = vpop.eup %1845 }
 0x6ab   : > { %v823_v31 = vadd.f32 1.0, %v1846_v30 }
 0x6ad   : > { %1847 = vrcp.f32 %v823_v31 }
 0x6b7   : > { %v1848_v32 = vpop.eup %1847 }
 0x6b8   : > { %v832_v36 = vmul.f32 %v1848_v32, %v830_v35 }
 0x71b   : > { %v835_v33 = vpop.permute.xlu0 %834 }
 0x71c   : > { %v837_v34 = vmul.f32 %v1848_v32, %v835_v33 }
 0x71e   : > { %839 = vrot.lane.b32.xlu0 %v837_v34, %s1917_s16 }
 0x790   : > { %v840_v37 = vpop.permute.xlu0 %839 }
 0x791   : > { %v842_v38 = vadd.f32 %v840_v37, %v832_v36  ;;  %v1638_v36 = vld [vmem:[%s1488_s25 + $0x28] sm:$0xff] }
 0x793   : > { %1849 = vtanh.f32 %v842_v38 }
 0x79d   : > { %v1850_v39 = vpop.eup %1849 }
 0x79e   : > { %845 = vrot.lane.b32.xlu1 %v1850_v39, %s1917_s16 }
 0x7a2   : > { %850 = vrot.lane.b32.xlu1 %v842_v38, %s1918_s18 }
 0x810   : > { %v846_v40 = vpop.permute.xlu1 %845 }
 0x811   : > { %v848_v41 = vmul.f32 %v1848_v32, %v846_v40 }
 0x813   : > { %855 = vrot.lane.b32.xlu0 %v848_v41, %s1919_s19 }
 0x814   : > { %v851_v42 = vpop.permute.xlu1 %850 }
 0x815   : > { %853 = vst.msk [vmem:[%s2051_s11] sm:$0xff] %vm409_vm1, %v851_v42 }
 0x81c   : > { %v918_v43 = vld [vmem:[%s2051_s11] sm:$0xff] }
 0x81d   : > { %920 = vrot.lane.b32.xlu1 %v918_v43, %s1917_s16 }
 0x885   : > { %v856_v44 = vpop.permute.xlu0 %855 }
 0x886   : > { %858 = vst.msk [vmem:[%s2006_s17] sm:$0xff] %vm409_vm1, %v856_v44  ;;  %1627 = vst.msk [vmem:[%s1474_s9 + $0x10] sm:$0xff] %vm409_vm1, %v856_v44  ;;  %s1649_s9 = smul.u32 4294967240, %s1905_s21 }
 0x888   : > { %s1504_s12 = scalar_lea.vmem [#allocation2], %s1649_s9 }
 0x88d   : > { %v865_v45 = vld [vmem:[%s2006_s17] sm:$0xff] }
 0x88e   : > { %v866_v46 = vpack.c.bf16 %v865_v45, %v865_v45 }
 0x88f   : > { %v921_v60 = vpop.permute.xlu1 %920 }
 0x890   : > { %1753 = vmatmul.mubr.msk.bf16.vlgmr.msra.gmra.mrb[8].mxu0 %vm409_vm1, %v866_v46 }
 0x891   : > { %1765 = vmatpush3.bf16.msra.mxu0 %v2010_v6  ;;  %1768 = vmatprep.mubr.msk.bf16.mxu0 %vm1916_vm2, %v1915_v1 }
 0x892   : > { %1766 = vmatprep.subr.bf16.mxu0 %v1915_v1 }
 0x895   : > { %1767 = vmatpush3.bf16.msra.mxu0 %v2013_v7 }
 0x896   : > { %1780 = vmatprep.subr.bf16.mxu0 %v1915_v1 }
 0x963   : > { %v904_v48 = vpop.f32.mrb[8].mxu0 }
 0x964   : > { %v910_v49 = vadd.f32 %v1629_v47, %v904_v48  ;;  %v1754_v50 = vpop.f32.mrb[9].mxu0 }
 0x965   : > { %v907_v51 = vpop.f32.mrb[10].mxu0 }
 0x966   : > { %1851 = vtanh.f32 %v910_v49  ;;  %v1755_v52 = vpop.f32.mrb[11].mxu0  ;;  %v1631_v54 = vmul.f32 -1.442695, %v910_v49 }
 0x968   : > { %1853 = vpow2.f32 %v1631_v54 }
 0x970   : > { %v1852_v53 = vpop.eup %1851 }
 0x971   : > { %925 = vrot.lane.b32.xlu0 %v1852_v53, %s1917_s16 }
 0x972   : > { %v1854_v55 = vpop.eup %1853 }
 0x973   : > { %v914_v56 = vadd.f32 1.0, %v1854_v55 }
 0x975   : > { %1855 = vrcp.f32 %v914_v56 }
 0x97f   : > { %v1856_v57 = vpop.eup %1855 }
 0x980   : > { %v923_v61 = vmul.f32 %v1856_v57, %v921_v60 }
 0x9e3   : > { %v926_v58 = vpop.permute.xlu0 %925 }
 0x9e4   : > { %v928_v59 = vmul.f32 %v1856_v57, %v926_v58  ;;  %v1644_v58 = vld [vmem:[%s1496_s7 + $0x30] sm:$0xff] }
 0x9e6   : > { %930 = vrot.lane.b32.xlu0 %v928_v59, %s1917_s16 }
 0xa58   : > { %v931_v62 = vpop.permute.xlu0 %930 }
 0xa59   : > { %v933_v63 = vadd.f32 %v931_v62, %v923_v61 }
 0xa5b   : > { %1857 = vtanh.f32 %v933_v63 }
 0xa65   : > { %v1858_v0 = vpop.eup %1857 }
 0xa66   : > { %936 = vrot.lane.b32.xlu1 %v1858_v0, %s1917_s16 }
 0xa6a   : > { %941 = vrot.lane.b32.xlu1 %v933_v63, %s1918_s18 }
 0xad8   : > { %v937_v2 = vpop.permute.xlu1 %936 }
 0xad9   : > { %v939_v3 = vmul.f32 %v1856_v57, %v937_v2 }
 0xadb   : > { %946 = vrot.lane.b32.xlu0 %v939_v3, %s1919_s19 }
 0xadc   : > { %v942_v4 = vpop.permute.xlu1 %941 }
 0xadd   : > { %944 = vst.msk [vmem:[%s2051_s11] sm:$0xff] %vm409_vm1, %v942_v4 }
 0xae4   : > { %v1009_v5 = vld [vmem:[%s2051_s11] sm:$0xff] }
 0xae5   : > { %1011 = vrot.lane.b32.xlu1 %v1009_v5, %s1917_s16 }
 0xb4d   : > { %v947_v8 = vpop.permute.xlu0 %946 }
 0xb4e   : > { %949 = vst.msk [vmem:[%s2006_s17] sm:$0xff] %vm409_vm1, %v947_v8  ;;  %1633 = vst.msk [vmem:[%s1480_s13 + $0x18] sm:$0xff] %vm409_vm1, %v947_v8  ;;  %s1508_s13 = scalar_lea.vmem [#allocation3], %s1649_s9 }
 0xb55   : > { %v956_v9 = vld [vmem:[%s2006_s17] sm:$0xff] }
 0xb56   : > { %v957_v10 = vpack.c.bf16 %v956_v9, %v956_v9 }
 0xb57   : > { %v1012_v24 = vpop.permute.xlu1 %1011 }
 0xb58   : > { %1761 = vmatmul.mubr.msk.bf16.vlgmr.msra.gmra.mrb[12].mxu1 %vm409_vm1, %v957_v10 }
 0xb59   : > { %1773 = vmatpush3.bf16.msra.mxu1 %v2010_v6  ;;  %1776 = vmatprep.mubr.msk.bf16.mxu1 %vm1916_vm2, %v1915_v1 }
 0xb5a   : > { %1774 = vmatprep.subr.bf16.mxu1 %v1915_v1 }
 0xb5d   : > { %1775 = vmatpush3.bf16.msra.mxu1 %v2013_v7 }
 0xc2b   : > { %v995_v12 = vpop.f32.mrb[12].mxu1 }
 0xc2c   : > { %v1001_v13 = vadd.f32 %v995_v12, %v955_v11  ;;  %v1762_v14 = vpop.f32.mrb[13].mxu1 }
 0xc2d   : > { %v998_v15 = vpop.f32.mrb[14].mxu1 }
 0xc2e   : > { %1859 = vtanh.f32 %v1001_v13  ;;  %v1763_v16 = vpop.f32.mrb[15].mxu1  ;;  %v1636_v18 = vmul.f32 -1.442695, %v1001_v13 }
 0xc30   : > { %1861 = vpow2.f32 %v1636_v18 }
 0xc38   : > { %v1860_v17 = vpop.eup %1859 }
 0xc39   : > { %1016 = vrot.lane.b32.xlu0 %v1860_v17, %s1917_s16 }
 0xc3a   : > { %v1862_v19 = vpop.eup %1861 }
 0xc3b   : > { %v1005_v20 = vadd.f32 1.0, %v1862_v19 }
 0xc3d   : > { %1863 = vrcp.f32 %v1005_v20 }
 0xc47   : > { %v1864_v21 = vpop.eup %1863 }
 0xc48   : > { %v1014_v25 = vmul.f32 %v1864_v21, %v1012_v24 }
 0xcab   : > { %v1017_v22 = vpop.permute.xlu0 %1016 }
 0xcac   : > { %v1019_v23 = vmul.f32 %v1864_v21, %v1017_v22  ;;  %v1650_v22 = vld [vmem:[%s1504_s12 + $0x38] sm:$0xff] }
 0xcae   : > { %1021 = vrot.lane.b32.xlu0 %v1019_v23, %s1917_s16 }
 0xd20   : > { %v1022_v26 = vpop.permute.xlu0 %1021 }
 0xd21   : > { %v1024_v27 = vadd.f32 %v1022_v26, %v1014_v25 }
 0xd23   : > { %1865 = vtanh.f32 %v1024_v27 }
 0xd2d   : > { %v1866_v28 = vpop.eup %1865 }
 0xd2e   : > { %1027 = vrot.lane.b32.xlu1 %v1866_v28, %s1917_s16 }
 0xd32   : > { %1032 = vrot.lane.b32.xlu1 %v1024_v27, %s1918_s18 }
 0xda0   : > { %v1028_v29 = vpop.permute.xlu1 %1027 }
 0xda1   : > { %v1030_v30 = vmul.f32 %v1864_v21, %v1028_v29 }
 0xda3   : > { %1037 = vrot.lane.b32.xlu0 %v1030_v30, %s1919_s19 }
 0xda4   : > { %v1033_v31 = vpop.permute.xlu1 %1032 }
 0xda5   : > { %1035 = vst.msk [vmem:[%s2051_s11] sm:$0xff] %vm409_vm1, %v1033_v31 }
 0xdac   : > { %v1101_v32 = vld [vmem:[%s2051_s11] sm:$0xff] }
 0xdad   : > { %1103 = vrot.lane.b32.xlu1 %v1101_v32, %s1917_s16 }
 0xe15   : > { %v1038_v33 = vpop.permute.xlu0 %1037 }
 0xe16   : > { %1040 = vst.msk [vmem:[%s2006_s17] sm:$0xff] %vm409_vm1, %v1038_v33  ;;  %1042 = vst.msk [vmem:[%s1041_s15] sm:$0xff] %vm409_vm1, %v1038_v33 }
 0xe1d   : > { %v1048_v34 = vld [vmem:[%s2006_s17] sm:$0xff] }
 0xe1e   : > { %v1049_v35 = vpack.c.bf16 %v1048_v34, %v1048_v34 }
 0xe1f   : > { %v1104_v46 = vpop.permute.xlu1 %1103 }
 0xe20   : > { %1769 = vmatmul.mubr.msk.bf16.vlgmr.msra.gmra.mrb[12].mxu0 %vm409_vm1, %v1049_v35 }
 0xe21   : > { %1781 = vmatpush3.bf16.msra.mxu0 %v2010_v6  ;;  %1784 = vmatprep.mubr.msk.bf16.mxu0 %vm1916_vm2, %v1915_v1 }
 0xe22   : > { %1782 = vmatprep.subr.bf16.mxu0 %v1915_v1 }
 0xe25   : > { %1783 = vmatpush3.bf16.msra.mxu0 %v2013_v7 }
 0xef3   : > { %v1087_v37 = vpop.f32.mrb[12].mxu0 }
 0xef4   : > { %v1093_v38 = vadd.f32 %v1638_v36, %v1087_v37  ;;  %v1770_v39 = vpop.f32.mrb[13].mxu0 }
 0xef5   : > { %v1090_v40 = vpop.f32.mrb[14].mxu0 }
 0xef6   : > { %1867 = vtanh.f32 %v1093_v38  ;;  %v1771_v41 = vpop.f32.mrb[15].mxu0  ;;  %v1640_v6 = vmul.f32 -1.442695, %v1093_v38 }
 0xef8   : > { %1869 = vpow2.f32 %v1640_v6 }
 0xf00   : > { %v1868_v42 = vpop.eup %1867 }
 0xf01   : > { %1108 = vrot.lane.b32.xlu0 %v1868_v42, %s1917_s16 }
 0xf02   : > { %v1870_v43 = vpop.eup %1869 }
 0xf03   : > { %v1097_v44 = vadd.f32 1.0, %v1870_v43 }
 0xf05   : > { %1871 = vrcp.f32 %v1097_v44 }
 0xf0f   : > { %v1872_v1 = vpop.eup %1871 }
 0xf10   : > { %v1106_v47 = vmul.f32 %v1872_v1, %v1104_v46 }
 0xf73   : > { %v1109_v7 = vpop.permute.xlu0 %1108 }
 0xf74   : > { %v1111_v45 = vmul.f32 %v1872_v1, %v1109_v7 }
 0xf76   : > { %1113 = vrot.lane.b32.xlu0 %v1111_v45, %s1917_s16 }
 0xfe8   : > { %v1114_v48 = vpop.permute.xlu0 %1113 }
 0xfe9   : > { %v1116_v49 = vadd.f32 %v1114_v48, %v1106_v47 }
 0xfeb   : > { %1873 = vtanh.f32 %v1116_v49 }
 0xff5   : > { %v1874_v50 = vpop.eup %1873 }
 0xff6   : > { %1119 = vrot.lane.b32.xlu1 %v1874_v50, %s1917_s16 }
 0xffa   : > { %1124 = vrot.lane.b32.xlu1 %v1116_v49, %s1918_s18 }
0x1068   : > { %v1120_v51 = vpop.permute.xlu1 %1119 }
0x1069   : > { %v1122_v52 = vmul.f32 %v1872_v1, %v1120_v51 }
0x106b   : > { %1129 = vrot.lane.b32.xlu0 %v1122_v52, %s1919_s19 }
0x106c   : > { %v1125_v53 = vpop.permute.xlu1 %1124 }
0x106d   : > { %1127 = vst.msk [vmem:[%s2051_s11] sm:$0xff] %vm409_vm1, %v1125_v53 }
0x1074   : > { %v1193_v54 = vld [vmem:[%s2051_s11] sm:$0xff] }
0x1075   : > { %1195 = vrot.lane.b32.xlu1 %v1193_v54, %s1917_s16 }
0x10dd   : > { %v1130_v55 = vpop.permute.xlu0 %1129 }
0x10de   : > { %1132 = vst.msk [vmem:[%s2006_s17] sm:$0xff] %vm409_vm1, %v1130_v55  ;;  %1642 = vst.msk [vmem:[%s1492_s26 + $0x28] sm:$0xff] %vm409_vm1, %v1130_v55 }
0x10e5   : > { %v1140_v56 = vld [vmem:[%s2006_s17] sm:$0xff] }
0x10e6   : > { %v1141_v57 = vpack.c.bf16 %v1140_v56, %v1140_v56 }
0x10e7   : > { %v1196_v10 = vpop.permute.xlu1 %1195 }
0x10e8   : > { %1777 = vmatmul.mubr.msk.bf16.vlgmr.msra.gmra.mrb[16].mxu1 %vm409_vm1, %v1141_v57 }
0x11bb   : > { %v1179_v59 = vpop.f32.mrb[16].mxu1 }
0x11bc   : > { %v1185_v60 = vadd.f32 %v1644_v58, %v1179_v59  ;;  %v1778_v61 = vpop.f32.mrb[17].mxu1 }
0x11bd   : > { %v1182_v62 = vpop.f32.mrb[18].mxu1 }
0x11be   : > { %1875 = vtanh.f32 %v1185_v60  ;;  %v1779_v63 = vpop.f32.mrb[19].mxu1  ;;  %v1646_v2 = vmul.f32 -1.442695, %v1185_v60 }
0x11c0   : > { %1877 = vpow2.f32 %v1646_v2 }
0x11c8   : > { %v1876_v0 = vpop.eup %1875 }
0x11c9   : > { %1200 = vrot.lane.b32.xlu0 %v1876_v0, %s1917_s16 }
0x11ca   : > { %v1878_v3 = vpop.eup %1877 }
0x11cb   : > { %v1189_v4 = vadd.f32 1.0, %v1878_v3 }
0x11cd   : > { %1879 = vrcp.f32 %v1189_v4 }
0x11d7   : > { %v1880_v5 = vpop.eup %1879 }
0x11d8   : > { %v1198_v11 = vmul.f32 %v1880_v5, %v1196_v10 }
0x123b   : > { %v1201_v8 = vpop.permute.xlu0 %1200 }
0x123c   : > { %v1203_v9 = vmul.f32 %v1880_v5, %v1201_v8 }
0x123e   : > { %1205 = vrot.lane.b32.xlu0 %v1203_v9, %s1917_s16 }
0x12b0   : > { %v1206_v12 = vpop.permute.xlu0 %1205 }
0x12b1   : > { %v1208_v13 = vadd.f32 %v1206_v12, %v1198_v11 }
0x12b3   : > { %1881 = vtanh.f32 %v1208_v13 }
0x12bd   : > { %v1882_v14 = vpop.eup %1881 }
0x12be   : > { %1211 = vrot.lane.b32.xlu1 %v1882_v14, %s1917_s16 }
0x12c2   : > { %1216 = vrot.lane.b32.xlu1 %v1208_v13, %s1918_s18 }
0x1330   : > { %v1212_v15 = vpop.permute.xlu1 %1211 }
0x1331   : > { %v1214_v16 = vmul.f32 %v1880_v5, %v1212_v15 }
0x1333   : > { %1221 = vrot.lane.b32.xlu0 %v1214_v16, %s1919_s19 }
0x1334   : > { %v1217_v17 = vpop.permute.xlu1 %1216 }
0x1335   : > { %1219 = vst.msk [vmem:[%s2051_s11] sm:$0xff] %vm409_vm1, %v1217_v17 }
0x133c   : > { %v1285_v18 = vld [vmem:[%s2051_s11] sm:$0xff] }
0x133d   : > { %1287 = vrot.lane.b32.xlu1 %v1285_v18, %s1917_s16 }
0x13a5   : > { %v1222_v19 = vpop.permute.xlu0 %1221 }
0x13a6   : > { %1224 = vst.msk [vmem:[%s2006_s17] sm:$0xff] %vm409_vm1, %v1222_v19  ;;  %1648 = vst.msk [vmem:[%s1500_s8 + $0x30] sm:$0xff] %vm409_vm1, %v1222_v19 }
0x13ad   : > { %v1232_v20 = vld [vmem:[%s2006_s17] sm:$0xff] }
0x13ae   : > { %v1233_v21 = vpack.c.bf16 %v1232_v20, %v1232_v20 }
0x13af   : > { %v1288_v35 = vpop.permute.xlu1 %1287 }
0x13b0   : > { %1785 = vmatmul.mubr.msk.bf16.vlgmr.msra.gmra.mrb[16].mxu0 %vm409_vm1, %v1233_v21 }
0x1483   : > { %v1271_v23 = vpop.f32.mrb[16].mxu0 }
0x1484   : > { %v1277_v24 = vadd.f32 %v1650_v22, %v1271_v23  ;;  %v1786_v25 = vpop.f32.mrb[17].mxu0 }
0x1485   : > { %v1274_v26 = vpop.f32.mrb[18].mxu0 }
0x1486   : > { %1883 = vtanh.f32 %v1277_v24  ;;  %v1787_v27 = vpop.f32.mrb[19].mxu0  ;;  %v1652_v29 = vmul.f32 -1.442695, %v1277_v24 }
0x1488   : > { %1885 = vpow2.f32 %v1652_v29 }
0x1490   : > { %v1884_v28 = vpop.eup %1883 }
0x1491   : > { %1292 = vrot.lane.b32.xlu0 %v1884_v28, %s1917_s16 }
0x1492   : > { %v1886_v30 = vpop.eup %1885 }
0x1493   : > { %v1281_v31 = vadd.f32 1.0, %v1886_v30 }
0x1495   : > { %1887 = vrcp.f32 %v1281_v31 }
0x149f   : > { %v1888_v32 = vpop.eup %1887 }
0x14a0   : > { %v1290_v36 = vmul.f32 %v1888_v32, %v1288_v35 }
0x1503   : > { %v1293_v33 = vpop.permute.xlu0 %1292 }
0x1504   : > { %v1295_v34 = vmul.f32 %v1888_v32, %v1293_v33 }
0x1506   : > { %1297 = vrot.lane.b32.xlu0 %v1295_v34, %s1917_s16 }
0x1578   : > { %v1298_v37 = vpop.permute.xlu0 %1297 }
0x1579   : > { %v1300_v38 = vadd.f32 %v1298_v37, %v1290_v36 }
0x157b   : > { %1889 = vtanh.f32 %v1300_v38 }
0x1585   : > { %v1890_v39 = vpop.eup %1889 }
0x1586   : > { %1303 = vrot.lane.b32.xlu1 %v1890_v39, %s1917_s16  ;;  %s396_s16 = scalar_lea.vmem %s2262_s6, %s1665_s29 }
0x158a   : > { %1308 = vrot.lane.b32.xlu1 %v1300_v38, %s1918_s18 }
0x15f8   : > { %v1304_v40 = vpop.permute.xlu1 %1303 }
0x15f9   : > { %v1306_v41 = vmul.f32 %v1888_v32, %v1304_v40 }
0x15fb   : > { %1313 = vrot.lane.b32.xlu0 %v1306_v41, %s1919_s19 }
0x15fc   : > { %v1309_v42 = vpop.permute.xlu1 %1308 }
0x15fd   : > { %1311 = vst.msk [vmem:[%s2051_s11] sm:$0xff] %vm409_vm1, %v1309_v42 }
0x166d   : > { %v1314_v6 = vpop.permute.xlu0 %1313 }
0x166e   : > { %1316 = vst.msk [vmem:[%s2006_s17] sm:$0xff] %vm409_vm1, %v1314_v6  ;;  %1654 = vst.msk [vmem:[%s1508_s13 + $0x38] sm:$0xff] %vm409_vm1, %v1314_v6 }
0x1675   : > { %v1319_v43 = vld [vmem:[#allocation3] sm:$0xff]  ;;  %v1320_v44 = vld [vmem:[#allocation3 + $0x8] sm:$0xff]  ;;  %v1321_v1 = vld [vmem:[#allocation3 + $0x10] sm:$0xff] }
0x1676   : > { %v1322_v7 = vld [vmem:[#allocation3 + $0x18] sm:$0xff]  ;;  %v1323_v45 = vld [vmem:[#allocation3 + $0x20] sm:$0xff]  ;;  %v1324_v46 = vld [vmem:[#allocation3 + $0x28] sm:$0xff]  ;;  %v1668_v47 = vpack.c.bf16 %v1319_v43, %v1319_v43  ;;  %v1669_v48 = vpack.c.bf16 %v1320_v44, %v1320_v44  ;;  %v1670_v49 = vpack.c.bf16 %v1321_v1, %v1321_v1 }
0x1677   : > { %v1325_v50 = vld [vmem:[#allocation3 + $0x30] sm:$0xff]  ;;  %v1326_v51 = vld [vmem:[#allocation3 + $0x38] sm:$0xff]  ;;  %v1671_v52 = vpack.c.bf16 %v1322_v7, %v1322_v7  ;;  %v1672_v53 = vpack.c.bf16 %v1323_v45, %v1323_v45  ;;  %v1673_v54 = vpack.c.bf16 %v1324_v46, %v1324_v46 }
0x1678   : > { %v1674_v55 = vpack.c.bf16 %v1325_v50, %v1325_v50  ;;  %v1675_v56 = vpack.c.bf16 %v1326_v51, %v1326_v51  ;;  %1360 = vst.msk [vmem:[%s396_s16] sm:$0xf] %vm1359_vm3, %v1668_v47  ;;  %1361 = vst.msk [vmem:[%s396_s16 + $0x4] sm:$0xf] %vm1359_vm3, %v1669_v48 }
0x1679   : > { %1362 = vst.msk [vmem:[%s396_s16 + $0x8] sm:$0xf] %vm1359_vm3, %v1670_v49  ;;  %1363 = vst.msk [vmem:[%s396_s16 + $0xc] sm:$0xf] %vm1359_vm3, %v1671_v52 }
0x167a   : > { %1364 = vst.msk [vmem:[%s396_s16 + $0x10] sm:$0xf] %vm1359_vm3, %v1672_v53  ;;  %1365 = vst.msk [vmem:[%s396_s16 + $0x14] sm:$0xf] %vm1359_vm3, %v1673_v54 }
0x167b   : > { %1366 = vst.msk [vmem:[%s396_s16 + $0x18] sm:$0xf] %vm1359_vm3, %v1674_v55  ;;  %1367 = vst.msk [vmem:[%s396_s16 + $0x1c] sm:$0xf] %vm1359_vm3, %v1675_v56 }
0x167c PF: > { %s16_s23 = sadd.s32 1, %s1913_s23   ;;  %s2263_s21 = smov %s1909_s22 }
0x167d   : > { %p13_p5 = scmp.ge.s32.totalorder %s16_s23, 4   ;;  %s2264_s22 = smov %s2266_s24 }
0x167f   :  { %15 = sbr.rel (!%p13_p5) target bundleno = 2 (0x2), region = 113 }

// kernel: lstm_encoder_forward.2
= control target key start
LH: loop header
LB: loop body
LE: loop exit
PB: predicated region body
PF: predicated region fallthrough
CT: control target
= control target key end

     0   :  { %s1916_s21 = smov 0   ;;  %s1918_s22 = smov 0   ;;  %s2209_s0 = inlined_call_operand.vmem [shape: bf16[64,16], index: 0, kind: input, shape index: {}]   ;;  %s2210_s1 = inlined_call_operand.vmem [shape: bf16[2,16,128], index: 1, kind: input, shape index: {}]   ;;  %s2211_s2 = inlined_call_operand.vmem [shape: bf16[2,32,128], index: 2, kind: input, shape index: {}]   ;;  %s2212_s3 = inlined_call_operand.vmem [shape: f32[2,1,128], index: 3, kind: input, shape index: {}]   ;;  %s2213_s4 = inlined_call_operand.vmem [shape: f32[2,8,32], index: 4, kind: input, shape index: {}]   ;;  %s2214_s5 = inlined_call_operand.vmem [shape: f32[2,8,32], index: 5, kind: input, shape index: {}]   ;;  %s2215_s6 = inlined_call_operand.vmem [shape: bf16[2,64,32], index: 6, kind: output, shape index: {}]  }
   0x1   :  { %s1920_s23 = smov 0  }
   0x2 LB: > { %s28_s24 = sadd.s32 1, %s1870_s22  ;;  %p1562_p0 = scmp.ge.s32.totalorder %s1874_s23, 1  ;;  %s1874_s23 = sphi %s1920_s23, %s16_s23   ;;  %s1870_s22 = sphi %s1918_s22, %s2217_s22   ;;  %s1866_s21 = sphi %s1916_s21, %s2216_s21  }
   0x3   : > { %p30_p1 = scmp.ge.s32.totalorder %s28_s24, 2  ;;  %p291_p2 = scmp.lt.s32.totalorder %s1874_s23, 3 }
   0x5   : > { %s2219_s24 = smov (%p30_p1, %s28_s24), 0  ;;  %p292_p3 = pnand %p1562_p0, %p291_p2 }
   0x6   : > { %p364_p4 = scmp.lt.s32.totalorder (!%p292_p3), %s1866_s21, 1  ;;  %s1938_s25 = sshll.u32 (!%p292_p3), %s1866_s21, 3  ;;  %v1784_v0 = vld [vmem:[%s2209_s0] sm:$0xff] (!%p292_p3)   ;;  %vm457_vm0 = vcmask (!%p292_p3), 130048   ;;  %vm409_vm1 = vcmask (!%p292_p3), 261120   ;;  %v1876_v1 = vmov (!%p292_p3), 0.0  }
   0x7   : > { %295 = sbr.rel (%p292_p3) target bundleno = 5745 (0x1671), region = 44  ;;  %1680 = vmatprep.mubr.msk.bf16.mxu0 (!%p292_p3), %vm457_vm0, %v1784_v0  ;;  %1688 = vmatprep.subr.bf16.mxu1 (!%p292_p3), %v1876_v1  ;;  %v1785_v3 = vld [vmem:[%s2209_s0 + $0x8] sm:$0xff] (!%p292_p3)   ;;  %vm1877_vm2 = vmmov (!%p292_p3), 0   ;;  %s1968_s26 = scalar_lea.vmem (!%p292_p3), [#allocation4], %s1938_s25  ;;  %v1786_v7 = vld [vmem:[%s2209_s0 + $0x10] sm:$0xff] (!%p292_p3)   ;;  %v1787_v10 = vld [vmem:[%s2209_s0 + $0x18] sm:$0xff] (!%p292_p3)  }
   0x8   : > { %1692 = vmatprep.mubr.msk.bf16.mxu1 (!%p292_p3), %vm1877_vm2, %v1876_v1  ;;  %s1973_s27 = scalar_lea.vmem (!%p292_p3), [#allocation5], %s1938_s25  ;;  %s1878_s14 = smov (!%p292_p3), 32   ;;  %vm1335_vm3 = vcmask (!%p292_p3), 257024  }
   0x9   : > { %s1880_s16 = smov (!%p292_p3), 64   ;;  %s1453_s8 = scalar_lea.vmem (!%p292_p3), [#allocation2], %s1938_s25 }
   0xa   : > { %s928_s10 = ssub.s32 (!%p292_p3), 4, %s1866_s21 }
   0xe   : > { %s1944_s28 = scalar_select %p364_p4, %s1866_s21, 1 }
  0x10   : > { %s1638_s29 = sshll.u32 %s1944_s28, 3  ;;  %s1639_s30 = sshll.u32 %s1944_s28, 4 }
  0x11   : > { %s368_s9 = scalar_lea.vmem %s2210_s1, %s1638_s29  ;;  %s373_s12 = scalar_lea.vmem %s2211_s2, %s1639_s30 }
  0x12   : > { %s380_s15 = scalar_lea.vmem %s2213_s4, %s1638_s29  ;;  %s384_s18 = scalar_lea.vmem %s2214_s5, %s1638_s29  ;;  %v1781_v2 = vld [vmem:[%s368_s9] sm:$0xff]   ;;  %v1983_v8 = vld [vmem:[%s373_s12 + $0x8] sm:$0xff]  }
  0x13   : > { %v406_v4 = vld [vmem:[%s380_s15] sm:$0xff]  ;;  %1678 = vmatprep.subr.bf16.mxu0 %v1781_v2  ;;  %s376_s11 = scalar_lea.vmem %s2212_s3, %s1944_s28  ;;  %s1879_s15 = smov 96  }
  0x14   : > { %v411_v5 = vld [vmem:[%s384_s18] sm:$0xff]  ;;  %410 = vst.msk [vmem:[%s1968_s26] sm:$0xff] %vm409_vm1, %v406_v4  ;;  %1679 = vmatpush3.bf16.msra.mxu0 %v1781_v2  ;;  %s1589_s18 = smul.u32 40, %s1866_s21  ;;  %s1456_s9 = scalar_lea.vmem [#allocation3], %s1938_s25 }
  0x15   : > { %413 = vst.msk [vmem:[%s1973_s27] sm:$0xff] %vm409_vm1, %v411_v5  ;;  %v1977_v6 = vld [vmem:[%s373_s12] sm:$0xff]   ;;  %1704 = vmatprep.subr.bf16.mxu0 %v1876_v1  ;;  %s547_s12 = smul.u32 56, %s1866_s21 }
  0x16   : > { %1689 = vmatpush3.bf16.msra.mxu1 %v1977_v6  ;;  %v1574_v12 = vld [vmem:[%s376_s11] ss:$0 sm:$0xff]  ;;  %s1438_s19 = scalar_lea.vmem [#allocation2], %s1589_s18  ;;  %s1442_s20 = scalar_lea.vmem [#allocation3], %s1589_s18 }
  0x17   : > { %1681 = vmatmul.mubr.msk.bf16.vlgmr.msra.gmra.mrb[0].mxu0 %vm457_vm0, %v1785_v3  ;;  %1690 = vmatprep.subr.bf16.mxu1 %v1876_v1  ;;  %s548_s13 = scalar_lea.vmem [#allocation2], %s547_s12  ;;  %s651_s17 = scalar_lea.vmem [#allocation3], %s547_s12 }
  0x18   : > { %1684 = vmatprep.mubr.msk.bf16.mxu0 %vm457_vm0, %v1786_v7  ;;  %1705 = vmatpush3.bf16.msra.mxu0 %v1977_v6  ;;  %s1595_s29 = smul.u32 24, %s1866_s21  ;;  %s2112_s11 = sshll.u32 %s928_s10, 3 }
  0x19   : > { %1706 = vmatprep.subr.bf16.mxu0 %v1876_v1  ;;  %s930_s25 = scalar_lea.vmem [#allocation2], %s2112_s11  ;;  %s1017_s12 = scalar_lea.vmem [#allocation3], %s2112_s11 }
  0x1a   : > { %1691 = vmatpush3.bf16.msra.mxu1 %v1983_v8  ;;  %s1446_s30 = scalar_lea.vmem [#allocation2], %s1595_s29  ;;  %s1450_s7 = scalar_lea.vmem [#allocation3], %s1595_s29 }
  0x1b   : > { %v552_v9 = vld [vmem:[%s1968_s26] sm:$0xff]  ;;  %1696 = vmatprep.subr.bf16.mxu1 %v1876_v1 }
  0x1c   : > { %v553_v11 = vpack.c.bf16 %v552_v9, %v552_v9  ;;  %1707 = vmatpush3.bf16.msra.mxu0 %v1983_v8  ;;  %v619_v36 = vld [vmem:[%s1973_s27] sm:$0xff] }
  0x1d   : > { %1720 = vmatprep.subr.bf16.mxu0 %v1876_v1 }
  0x1e   : > { %1693 = vmatmul.mubr.msk.bf16.vlgmr.msra.gmra.mrb[0].mxu1 %vm409_vm1, %v553_v11 }
  0x1f   : > { %1697 = vmatpush3.bf16.msra.mxu1 %v1977_v6  ;;  %1700 = vmatprep.mubr.msk.bf16.mxu1 %vm1877_vm2, %v1876_v1 }
  0x20   : > { %1685 = vmatmul.mubr.msk.bf16.gmra.mrb[4].mxu0 %vm457_vm0, %v1787_v10  ;;  %1698 = vmatprep.subr.bf16.mxu1 %v1876_v1 }
  0x21   : > { %1708 = vmatprep.mubr.msk.bf16.mxu0 %vm1877_vm2, %v1876_v1 }
  0x23   : > { %1699 = vmatpush3.bf16.msra.mxu1 %v1983_v8 }
  0x24   : > { %1712 = vmatprep.subr.bf16.mxu1 %v1876_v1 }
  0xea   : > { %v1682_v13 = vpop.f32.mrb[0].mxu0 }
  0xeb   : > { %v513_v14 = vadd.f32 %v1682_v13, %v1574_v12  ;;  %v504_v15 = vpop.f32.mrb[1].mxu0 }
  0xec   : > { %v505_v16 = vadd.f32 %v1574_v12, %v504_v15  ;;  %v1683_v17 = vpop.f32.mrb[2].mxu0 }
  0xed   : > { %537 = vst [vmem:[#allocation2 + $0x10] sm:$0xff] %v513_v14  ;;  %v516_v18 = vadd.f32 %v1683_v17, %v1574_v12  ;;  %v507_v19 = vpop.f32.mrb[3].mxu0 }
  0xee   : > { %535 = vst [vmem:[#allocation2] sm:$0xff] %v505_v16  ;;  %v508_v20 = vadd.f32 %v1574_v12, %v507_v19 }
  0xef   : > { %538 = vst [vmem:[#allocation2 + $0x18] sm:$0xff] %v516_v18 }
  0xf0   : > { %536 = vst [vmem:[#allocation2 + $0x8] sm:$0xff] %v508_v20 }
  0xf1   : > { %v604_v21 = vpop.f32.mrb[0].mxu1 }
  0xf2   : > { %v1694_v22 = vpop.f32.mrb[1].mxu1 }
  0xf3   : > { %v1686_v23 = vpop.f32.mrb[4].mxu0  ;;  %v607_v24 = vpop.f32.mrb[2].mxu1 }
  0xf4   : > { %v529_v25 = vadd.f32 %v1686_v23, %v1574_v12  ;;  %v520_v26 = vpop.f32.mrb[5].mxu0  ;;  %v1695_v27 = vpop.f32.mrb[3].mxu1 }
  0xf5   : > { %v521_v28 = vadd.f32 %v1574_v12, %v520_v26  ;;  %v1687_v29 = vpop.f32.mrb[6].mxu0 }
  0xf6   : > { %541 = vst [vmem:[#allocation2 + $0x30] sm:$0xff] %v529_v25  ;;  %v532_v30 = vadd.f32 %v1687_v29, %v1574_v12  ;;  %v523_v31 = vpop.f32.mrb[7].mxu0 }
  0xf7   : > { %539 = vst [vmem:[#allocation2 + $0x20] sm:$0xff] %v521_v28  ;;  %v524_v32 = vadd.f32 %v1574_v12, %v523_v31 }
  0xf8   : > { %542 = vst [vmem:[#allocation2 + $0x38] sm:$0xff] %v532_v30 }
  0xf9   : > { %540 = vst [vmem:[#allocation2 + $0x28] sm:$0xff] %v524_v32 }
 0x100   : > { %v549_v33 = vld [vmem:[%s548_s13] sm:$0xff]  ;;  %v1590_v55 = vld [vmem:[%s1438_s19 + $0x8] sm:$0xff]  ;;  %v1596_v19 = vld [vmem:[%s1446_s30 + $0x10] sm:$0xff]  ;;  %s1610_s13 = smul.u32 4294967272, %s1866_s21 }
 0x101   : > { %v610_v34 = vadd.f32 %v604_v21, %v549_v33  ;;  %s1616_s19 = smul.u32 4294967256, %s1866_s21 }
 0x102   : > { %s1468_s18 = scalar_lea.vmem [#allocation3], %s1610_s13  ;;  %s1622_s30 = smul.u32 4294967240, %s1866_s21 }
 0x103   : > { %1788 = vtanh.f32 %v610_v34  ;;  %v1588_v37 = vmul.f32 -1.442695, %v610_v34  ;;  %s1476_s29 = scalar_lea.vmem [#allocation3], %s1616_s19 }
 0x105   : > { %1790 = vpow2.f32 %v1588_v37 }
 0x10d   : > { %v1789_v35 = vpop.eup %1788 }
 0x10e   : > { %626 = vrot.lane.b32.xlu0 %v1789_v35, %s1878_s14 }
 0x10f   : > { %v1791_v38 = vpop.eup %1790 }
 0x110   : > { %v614_v39 = vadd.f32 1.0, %v1791_v38 }
 0x112   : > { %621 = vrot.lane.b32.xlu0 %v619_v36, %s1878_s14  ;;  %1792 = vrcp.f32 %v614_v39 }
 0x11c   : > { %v1793_v40 = vpop.eup %1792 }
 0x180   : > { %v627_v41 = vpop.permute.xlu0 %626 }
 0x181   : > { %v629_v42 = vmul.f32 %v1793_v40, %v627_v41 }
 0x183   : > { %631 = vrot.lane.b32.xlu1 %v629_v42, %s1878_s14 }
 0x184   : > { %v622_v43 = vpop.permute.xlu0 %621 }
 0x185   : > { %v624_v44 = vmul.f32 %v1793_v40, %v622_v43 }
 0x1f5   : > { %v632_v45 = vpop.permute.xlu1 %631 }
 0x1f6   : > { %v634_v46 = vadd.f32 %v632_v45, %v624_v44  ;;  %v1602_v44 = vld [vmem:[%s1453_s8 + $0x18] sm:$0xff]  ;;  %s1484_s8 = scalar_lea.vmem [#allocation3], %s1622_s30 }
 0x1f8   : > { %1794 = vtanh.f32 %v634_v46 }
 0x202   : > { %v1795_v47 = vpop.eup %1794 }
 0x203   : > { %637 = vrot.lane.b32.xlu1 %v1795_v47, %s1878_s14 }
 0x207   : > { %642 = vrot.lane.b32.xlu1 %v634_v46, %s1879_s15 }
 0x275   : > { %v638_v48 = vpop.permute.xlu1 %637 }
 0x276   : > { %v640_v49 = vmul.f32 %v1793_v40, %v638_v48 }
 0x278   : > { %647 = vrot.lane.b32.xlu0 %v640_v49, %s1880_s16 }
 0x279   : > { %v643_v50 = vpop.permute.xlu1 %642 }
 0x27a   : > { %645 = vst.msk [vmem:[%s1973_s27] sm:$0xff] %vm409_vm1, %v643_v50 }
 0x281   : > { %v711_v51 = vld [vmem:[%s1973_s27] sm:$0xff] }
 0x282   : > { %713 = vrot.lane.b32.xlu1 %v711_v51, %s1878_s14 }
 0x2ea   : > { %v648_v52 = vpop.permute.xlu0 %647 }
 0x2eb   : > { %650 = vst.msk [vmem:[%s1968_s26] sm:$0xff] %vm409_vm1, %v648_v52  ;;  %652 = vst.msk [vmem:[%s651_s17] sm:$0xff] %vm409_vm1, %v648_v52  ;;  %s1464_s17 = scalar_lea.vmem [#allocation2], %s1610_s13 }
 0x2f2   : > { %v658_v53 = vld [vmem:[%s1968_s26] sm:$0xff] }
 0x2f3   : > { %v659_v54 = vpack.c.bf16 %v658_v53, %v658_v53 }
 0x2f4   : > { %v714_v5 = vpop.permute.xlu1 %713 }
 0x2f5   : > { %1701 = vmatmul.mubr.msk.bf16.vlgmr.msra.gmra.mrb[4].mxu1 %vm409_vm1, %v659_v54 }
 0x2f6   : > { %1713 = vmatpush3.bf16.msra.mxu1 %v1977_v6  ;;  %1716 = vmatprep.mubr.msk.bf16.mxu1 %vm1877_vm2, %v1876_v1 }
 0x2f7   : > { %1714 = vmatprep.subr.bf16.mxu1 %v1876_v1 }
 0x2fa   : > { %1715 = vmatpush3.bf16.msra.mxu1 %v1983_v8 }
 0x2fb   : > { %1728 = vmatprep.subr.bf16.mxu1 %v1876_v1 }
 0x3c8   : > { %v697_v56 = vpop.f32.mrb[4].mxu1 }
 0x3c9   : > { %v703_v57 = vadd.f32 %v1590_v55, %v697_v56  ;;  %v1702_v58 = vpop.f32.mrb[5].mxu1 }
 0x3ca   : > { %v700_v59 = vpop.f32.mrb[6].mxu1 }
 0x3cb   : > { %1796 = vtanh.f32 %v703_v57  ;;  %v1703_v60 = vpop.f32.mrb[7].mxu1  ;;  %v1592_v62 = vmul.f32 -1.442695, %v703_v57 }
 0x3cd   : > { %1798 = vpow2.f32 %v1592_v62 }
 0x3d5   : > { %v1797_v61 = vpop.eup %1796 }
 0x3d6   : > { %718 = vrot.lane.b32.xlu0 %v1797_v61, %s1878_s14 }
 0x3d7   : > { %v1799_v63 = vpop.eup %1798 }
 0x3d8   : > { %v707_v0 = vadd.f32 1.0, %v1799_v63 }
 0x3da   : > { %1800 = vrcp.f32 %v707_v0 }
 0x3e4   : > { %v1801_v2 = vpop.eup %1800 }
 0x3e5   : > { %v716_v7 = vmul.f32 %v1801_v2, %v714_v5 }
 0x448   : > { %v719_v3 = vpop.permute.xlu0 %718 }
 0x449   : > { %v721_v4 = vmul.f32 %v1801_v2, %v719_v3 }
 0x44b   : > { %723 = vrot.lane.b32.xlu0 %v721_v4, %s1878_s14 }
 0x4bd   : > { %v724_v9 = vpop.permute.xlu0 %723 }
 0x4be   : > { %v726_v10 = vadd.f32 %v724_v9, %v716_v7  ;;  %v931_v7 = vld [vmem:[%s930_s25] sm:$0xff] }
 0x4c0   : > { %1802 = vtanh.f32 %v726_v10 }
 0x4ca   : > { %v1803_v11 = vpop.eup %1802 }
 0x4cb   : > { %729 = vrot.lane.b32.xlu1 %v1803_v11, %s1878_s14 }
 0x4cf   : > { %734 = vrot.lane.b32.xlu1 %v726_v10, %s1879_s15 }
 0x53d   : > { %v730_v12 = vpop.permute.xlu1 %729 }
 0x53e   : > { %v732_v13 = vmul.f32 %v1801_v2, %v730_v12 }
 0x540   : > { %739 = vrot.lane.b32.xlu0 %v732_v13, %s1880_s16 }
 0x541   : > { %v735_v14 = vpop.permute.xlu1 %734 }
 0x542   : > { %737 = vst.msk [vmem:[%s1973_s27] sm:$0xff] %vm409_vm1, %v735_v14 }
 0x549   : > { %v803_v15 = vld [vmem:[%s1973_s27] sm:$0xff] }
 0x54a   : > { %805 = vrot.lane.b32.xlu1 %v803_v15, %s1878_s14 }
 0x5b2   : > { %v740_v16 = vpop.permute.xlu0 %739 }
 0x5b3   : > { %742 = vst.msk [vmem:[%s1968_s26] sm:$0xff] %vm409_vm1, %v740_v16  ;;  %1594 = vst.msk [vmem:[%s1442_s20 + $0x8] sm:$0xff] %vm409_vm1, %v740_v16  ;;  %s1472_s20 = scalar_lea.vmem [#allocation2], %s1616_s19 }
 0x5ba   : > { %v750_v17 = vld [vmem:[%s1968_s26] sm:$0xff] }
 0x5bb   : > { %v751_v18 = vpack.c.bf16 %v750_v17, %v750_v17 }
 0x5bc   : > { %v806_v32 = vpop.permute.xlu1 %805 }
 0x5bd   : > { %1709 = vmatmul.mubr.msk.bf16.vlgmr.msra.gmra.mrb[8].mxu0 %vm409_vm1, %v751_v18 }
 0x5be   : > { %1721 = vmatpush3.bf16.msra.mxu0 %v1977_v6  ;;  %1724 = vmatprep.mubr.msk.bf16.mxu0 %vm1877_vm2, %v1876_v1 }
 0x5bf   : > { %1722 = vmatprep.subr.bf16.mxu0 %v1876_v1 }
 0x5c2   : > { %1723 = vmatpush3.bf16.msra.mxu0 %v1983_v8 }
 0x5c3   : > { %1736 = vmatprep.subr.bf16.mxu0 %v1876_v1 }
 0x690   : > { %v789_v20 = vpop.f32.mrb[8].mxu0 }
 0x691   : > { %v795_v21 = vadd.f32 %v1596_v19, %v789_v20  ;;  %v1710_v22 = vpop.f32.mrb[9].mxu0 }
 0x692   : > { %v792_v23 = vpop.f32.mrb[10].mxu0 }
 0x693   : > { %1804 = vtanh.f32 %v795_v21  ;;  %v1711_v24 = vpop.f32.mrb[11].mxu0  ;;  %v1598_v26 = vmul.f32 -1.442695, %v795_v21 }
 0x695   : > { %1806 = vpow2.f32 %v1598_v26 }
 0x69d   : > { %v1805_v25 = vpop.eup %1804 }
 0x69e   : > { %810 = vrot.lane.b32.xlu0 %v1805_v25, %s1878_s14 }
 0x69f   : > { %v1807_v27 = vpop.eup %1806 }
 0x6a0   : > { %v799_v28 = vadd.f32 1.0, %v1807_v27 }
 0x6a2   : > { %1808 = vrcp.f32 %v799_v28 }
 0x6ac   : > { %v1809_v29 = vpop.eup %1808 }
 0x6ad   : > { %v808_v33 = vmul.f32 %v1809_v29, %v806_v32 }
 0x710   : > { %v811_v30 = vpop.permute.xlu0 %810 }
 0x711   : > { %v813_v31 = vmul.f32 %v1809_v29, %v811_v30 }
 0x713   : > { %815 = vrot.lane.b32.xlu0 %v813_v31, %s1878_s14 }
 0x785   : > { %v816_v34 = vpop.permute.xlu0 %815 }
 0x786   : > { %v818_v35 = vadd.f32 %v816_v34, %v808_v33  ;;  %v1611_v33 = vld [vmem:[%s1464_s17 + $0x28] sm:$0xff] }
 0x788   : > { %1810 = vtanh.f32 %v818_v35 }
 0x792   : > { %v1811_v36 = vpop.eup %1810 }
 0x793   : > { %821 = vrot.lane.b32.xlu1 %v1811_v36, %s1878_s14 }
 0x797   : > { %826 = vrot.lane.b32.xlu1 %v818_v35, %s1879_s15 }
 0x805   : > { %v822_v37 = vpop.permute.xlu1 %821 }
 0x806   : > { %v824_v38 = vmul.f32 %v1809_v29, %v822_v37 }
 0x808   : > { %831 = vrot.lane.b32.xlu0 %v824_v38, %s1880_s16 }
 0x809   : > { %v827_v39 = vpop.permute.xlu1 %826 }
 0x80a   : > { %829 = vst.msk [vmem:[%s1973_s27] sm:$0xff] %vm409_vm1, %v827_v39 }
 0x811   : > { %v894_v40 = vld [vmem:[%s1973_s27] sm:$0xff] }
 0x812   : > { %896 = vrot.lane.b32.xlu1 %v894_v40, %s1878_s14 }
 0x87a   : > { %v832_v41 = vpop.permute.xlu0 %831 }
 0x87b   : > { %834 = vst.msk [vmem:[%s1968_s26] sm:$0xff] %vm409_vm1, %v832_v41  ;;  %1600 = vst.msk [vmem:[%s1450_s7 + $0x10] sm:$0xff] %vm409_vm1, %v832_v41  ;;  %s1480_s7 = scalar_lea.vmem [#allocation2], %s1622_s30 }
 0x882   : > { %v841_v42 = vld [vmem:[%s1968_s26] sm:$0xff] }
 0x883   : > { %v842_v43 = vpack.c.bf16 %v841_v42, %v841_v42 }
 0x884   : > { %v897_v57 = vpop.permute.xlu1 %896 }
 0x885   : > { %1717 = vmatmul.mubr.msk.bf16.vlgmr.msra.gmra.mrb[8].mxu1 %vm409_vm1, %v842_v43 }
 0x886   : > { %1729 = vmatpush3.bf16.msra.mxu1 %v1977_v6  ;;  %1732 = vmatprep.mubr.msk.bf16.mxu1 %vm1877_vm2, %v1876_v1 }
 0x887   : > { %1730 = vmatprep.subr.bf16.mxu1 %v1876_v1 }
 0x88a   : > { %1731 = vmatpush3.bf16.msra.mxu1 %v1983_v8 }
 0x88b   : > { %1744 = vmatprep.subr.bf16.mxu1 %v1876_v1 }
 0x958   : > { %v880_v45 = vpop.f32.mrb[8].mxu1 }
 0x959   : > { %v886_v46 = vadd.f32 %v1602_v44, %v880_v45  ;;  %v1718_v47 = vpop.f32.mrb[9].mxu1 }
 0x95a   : > { %v883_v48 = vpop.f32.mrb[10].mxu1 }
 0x95b   : > { %1812 = vtanh.f32 %v886_v46  ;;  %v1719_v49 = vpop.f32.mrb[11].mxu1  ;;  %v1604_v51 = vmul.f32 -1.442695, %v886_v46 }
 0x95d   : > { %1814 = vpow2.f32 %v1604_v51 }
 0x965   : > { %v1813_v50 = vpop.eup %1812 }
 0x966   : > { %901 = vrot.lane.b32.xlu0 %v1813_v50, %s1878_s14 }
 0x967   : > { %v1815_v52 = vpop.eup %1814 }
 0x968   : > { %v890_v53 = vadd.f32 1.0, %v1815_v52 }
 0x96a   : > { %1816 = vrcp.f32 %v890_v53 }
 0x974   : > { %v1817_v54 = vpop.eup %1816 }
 0x975   : > { %v899_v58 = vmul.f32 %v1817_v54, %v897_v57 }
 0x9d8   : > { %v902_v55 = vpop.permute.xlu0 %901 }
 0x9d9   : > { %v904_v56 = vmul.f32 %v1817_v54, %v902_v55  ;;  %v1617_v55 = vld [vmem:[%s1472_s20 + $0x30] sm:$0xff] }
 0x9db   : > { %906 = vrot.lane.b32.xlu0 %v904_v56, %s1878_s14 }
 0xa4d   : > { %v907_v59 = vpop.permute.xlu0 %906 }
 0xa4e   : > { %v909_v60 = vadd.f32 %v907_v59, %v899_v58 }
 0xa50   : > { %1818 = vtanh.f32 %v909_v60 }
 0xa5a   : > { %v1819_v61 = vpop.eup %1818 }
 0xa5b   : > { %912 = vrot.lane.b32.xlu1 %v1819_v61, %s1878_s14 }
 0xa5f   : > { %917 = vrot.lane.b32.xlu1 %v909_v60, %s1879_s15 }
 0xacd   : > { %v913_v62 = vpop.permute.xlu1 %912 }
 0xace   : > { %v915_v63 = vmul.f32 %v1817_v54, %v913_v62 }
 0xad0   : > { %922 = vrot.lane.b32.xlu0 %v915_v63, %s1880_s16 }
 0xad1   : > { %v918_v0 = vpop.permute.xlu1 %917 }
 0xad2   : > { %920 = vst.msk [vmem:[%s1973_s27] sm:$0xff] %vm409_vm1, %v918_v0 }
 0xad9   : > { %v985_v2 = vld [vmem:[%s1973_s27] sm:$0xff] }
 0xada   : > { %987 = vrot.lane.b32.xlu1 %v985_v2, %s1878_s14 }
 0xb42   : > { %v923_v3 = vpop.permute.xlu0 %922 }
 0xb43   : > { %925 = vst.msk [vmem:[%s1968_s26] sm:$0xff] %vm409_vm1, %v923_v3  ;;  %1606 = vst.msk [vmem:[%s1456_s9 + $0x18] sm:$0xff] %vm409_vm1, %v923_v3  ;;  %s1640_s9 = sshll.u32 %s1944_s28, 5 }
 0xb4a   : > { %v932_v4 = vld [vmem:[%s1968_s26] sm:$0xff] }
 0xb4b   : > { %v933_v5 = vpack.c.bf16 %v932_v4, %v932_v4 }
 0xb4c   : > { %v988_v21 = vpop.permute.xlu1 %987 }
 0xb4d   : > { %1725 = vmatmul.mubr.msk.bf16.vlgmr.msra.gmra.mrb[12].mxu0 %vm409_vm1, %v933_v5 }
 0xb4e   : > { %1737 = vmatpush3.bf16.msra.mxu0 %v1977_v6  ;;  %1740 = vmatprep.mubr.msk.bf16.mxu0 %vm1877_vm2, %v1876_v1 }
 0xb4f   : > { %1738 = vmatprep.subr.bf16.mxu0 %v1876_v1 }
 0xb52   : > { %1739 = vmatpush3.bf16.msra.mxu0 %v1983_v8 }
 0xc20   : > { %v971_v9 = vpop.f32.mrb[12].mxu0 }
 0xc21   : > { %v977_v10 = vadd.f32 %v971_v9, %v931_v7  ;;  %v1726_v11 = vpop.f32.mrb[13].mxu0 }
 0xc22   : > { %v974_v12 = vpop.f32.mrb[14].mxu0 }
 0xc23   : > { %1820 = vtanh.f32 %v977_v10  ;;  %v1727_v13 = vpop.f32.mrb[15].mxu0  ;;  %v1609_v15 = vmul.f32 -1.442695, %v977_v10 }
 0xc25   : > { %1822 = vpow2.f32 %v1609_v15 }
 0xc2d   : > { %v1821_v14 = vpop.eup %1820 }
 0xc2e   : > { %992 = vrot.lane.b32.xlu0 %v1821_v14, %s1878_s14 }
 0xc2f   : > { %v1823_v16 = vpop.eup %1822 }
 0xc30   : > { %v981_v17 = vadd.f32 1.0, %v1823_v16 }
 0xc32   : > { %1824 = vrcp.f32 %v981_v17 }
 0xc3c   : > { %v1825_v18 = vpop.eup %1824 }
 0xc3d   : > { %v990_v22 = vmul.f32 %v1825_v18, %v988_v21 }
 0xca0   : > { %v993_v19 = vpop.permute.xlu0 %992 }
 0xca1   : > { %v995_v20 = vmul.f32 %v1825_v18, %v993_v19  ;;  %v1623_v19 = vld [vmem:[%s1480_s7 + $0x38] sm:$0xff] }
 0xca3   : > { %997 = vrot.lane.b32.xlu0 %v995_v20, %s1878_s14 }
 0xd15   : > { %v998_v23 = vpop.permute.xlu0 %997 }
 0xd16   : > { %v1000_v24 = vadd.f32 %v998_v23, %v990_v22 }
 0xd18   : > { %1826 = vtanh.f32 %v1000_v24 }
 0xd22   : > { %v1827_v25 = vpop.eup %1826 }
 0xd23   : > { %1003 = vrot.lane.b32.xlu1 %v1827_v25, %s1878_s14 }
 0xd27   : > { %1008 = vrot.lane.b32.xlu1 %v1000_v24, %s1879_s15 }
 0xd95   : > { %v1004_v26 = vpop.permute.xlu1 %1003 }
 0xd96   : > { %v1006_v27 = vmul.f32 %v1825_v18, %v1004_v26 }
 0xd98   : > { %1013 = vrot.lane.b32.xlu0 %v1006_v27, %s1880_s16 }
 0xd99   : > { %v1009_v28 = vpop.permute.xlu1 %1008 }
 0xd9a   : > { %1011 = vst.msk [vmem:[%s1973_s27] sm:$0xff] %vm409_vm1, %v1009_v28 }
 0xda1   : > { %v1077_v29 = vld [vmem:[%s1973_s27] sm:$0xff] }
 0xda2   : > { %1079 = vrot.lane.b32.xlu1 %v1077_v29, %s1878_s14 }
 0xe0a   : > { %v1014_v30 = vpop.permute.xlu0 %1013 }
 0xe0b   : > { %1016 = vst.msk [vmem:[%s1968_s26] sm:$0xff] %vm409_vm1, %v1014_v30  ;;  %1018 = vst.msk [vmem:[%s1017_s12] sm:$0xff] %vm409_vm1, %v1014_v30 }
 0xe12   : > { %v1024_v31 = vld [vmem:[%s1968_s26] sm:$0xff] }
 0xe13   : > { %v1025_v32 = vpack.c.bf16 %v1024_v31, %v1024_v31 }
 0xe14   : > { %v1080_v43 = vpop.permute.xlu1 %1079 }
 0xe15   : > { %1733 = vmatmul.mubr.msk.bf16.vlgmr.msra.gmra.mrb[12].mxu1 %vm409_vm1, %v1025_v32 }
 0xe16   : > { %1745 = vmatpush3.bf16.msra.mxu1 %v1977_v6  ;;  %1748 = vmatprep.mubr.msk.bf16.mxu1 %vm1877_vm2, %v1876_v1 }
 0xe17   : > { %1746 = vmatprep.subr.bf16.mxu1 %v1876_v1 }
 0xe1a   : > { %1747 = vmatpush3.bf16.msra.mxu1 %v1983_v8 }
 0xee8   : > { %v1063_v34 = vpop.f32.mrb[12].mxu1 }
 0xee9   : > { %v1069_v35 = vadd.f32 %v1611_v33, %v1063_v34  ;;  %v1734_v36 = vpop.f32.mrb[13].mxu1 }
 0xeea   : > { %v1066_v37 = vpop.f32.mrb[14].mxu1 }
 0xeeb   : > { %1828 = vtanh.f32 %v1069_v35  ;;  %v1735_v38 = vpop.f32.mrb[15].mxu1  ;;  %v1613_v6 = vmul.f32 -1.442695, %v1069_v35 }
 0xeed   : > { %1830 = vpow2.f32 %v1613_v6 }
 0xef5   : > { %v1829_v39 = vpop.eup %1828 }
 0xef6   : > { %1084 = vrot.lane.b32.xlu0 %v1829_v39, %s1878_s14 }
 0xef7   : > { %v1831_v40 = vpop.eup %1830 }
 0xef8   : > { %v1073_v41 = vadd.f32 1.0, %v1831_v40 }
 0xefa   : > { %1832 = vrcp.f32 %v1073_v41 }
 0xf04   : > { %v1833_v1 = vpop.eup %1832 }
 0xf05   : > { %v1082_v44 = vmul.f32 %v1833_v1, %v1080_v43 }
 0xf68   : > { %v1085_v8 = vpop.permute.xlu0 %1084 }
 0xf69   : > { %v1087_v42 = vmul.f32 %v1833_v1, %v1085_v8 }
 0xf6b   : > { %1089 = vrot.lane.b32.xlu0 %v1087_v42, %s1878_s14 }
 0xfdd   : > { %v1090_v45 = vpop.permute.xlu0 %1089 }
 0xfde   : > { %v1092_v46 = vadd.f32 %v1090_v45, %v1082_v44 }
 0xfe0   : > { %1834 = vtanh.f32 %v1092_v46 }
 0xfea   : > { %v1835_v47 = vpop.eup %1834 }
 0xfeb   : > { %1095 = vrot.lane.b32.xlu1 %v1835_v47, %s1878_s14 }
 0xfef   : > { %1100 = vrot.lane.b32.xlu1 %v1092_v46, %s1879_s15 }
0x105d   : > { %v1096_v48 = vpop.permute.xlu1 %1095 }
0x105e   : > { %v1098_v49 = vmul.f32 %v1833_v1, %v1096_v48 }
0x1060   : > { %1105 = vrot.lane.b32.xlu0 %v1098_v49, %s1880_s16 }
0x1061   : > { %v1101_v50 = vpop.permute.xlu1 %1100 }
0x1062   : > { %1103 = vst.msk [vmem:[%s1973_s27] sm:$0xff] %vm409_vm1, %v1101_v50 }
0x1069   : > { %v1169_v51 = vld [vmem:[%s1973_s27] sm:$0xff] }
0x106a   : > { %1171 = vrot.lane.b32.xlu1 %v1169_v51, %s1878_s14 }
0x10d2   : > { %v1106_v52 = vpop.permute.xlu0 %1105 }
0x10d3   : > { %1108 = vst.msk [vmem:[%s1968_s26] sm:$0xff] %vm409_vm1, %v1106_v52  ;;  %1615 = vst.msk [vmem:[%s1468_s18 + $0x28] sm:$0xff] %vm409_vm1, %v1106_v52 }
0x10da   : > { %v1116_v53 = vld [vmem:[%s1968_s26] sm:$0xff] }
0x10db   : > { %v1117_v54 = vpack.c.bf16 %v1116_v53, %v1116_v53 }
0x10dc   : > { %v1172_v5 = vpop.permute.xlu1 %1171 }
0x10dd   : > { %1741 = vmatmul.mubr.msk.bf16.vlgmr.msra.gmra.mrb[16].mxu0 %vm409_vm1, %v1117_v54 }
0x11b0   : > { %v1155_v56 = vpop.f32.mrb[16].mxu0 }
0x11b1   : > { %v1161_v57 = vadd.f32 %v1617_v55, %v1155_v56  ;;  %v1742_v58 = vpop.f32.mrb[17].mxu0 }
0x11b2   : > { %v1158_v59 = vpop.f32.mrb[18].mxu0 }
0x11b3   : > { %1836 = vtanh.f32 %v1161_v57  ;;  %v1743_v60 = vpop.f32.mrb[19].mxu0  ;;  %v1619_v62 = vmul.f32 -1.442695, %v1161_v57 }
0x11b5   : > { %1838 = vpow2.f32 %v1619_v62 }
0x11bd   : > { %v1837_v61 = vpop.eup %1836 }
0x11be   : > { %1176 = vrot.lane.b32.xlu0 %v1837_v61, %s1878_s14 }
0x11bf   : > { %v1839_v63 = vpop.eup %1838 }
0x11c0   : > { %v1165_v0 = vadd.f32 1.0, %v1839_v63 }
0x11c2   : > { %1840 = vrcp.f32 %v1165_v0 }
0x11cc   : > { %v1841_v2 = vpop.eup %1840 }
0x11cd   : > { %v1174_v7 = vmul.f32 %v1841_v2, %v1172_v5 }
0x1230   : > { %v1177_v3 = vpop.permute.xlu0 %1176 }
0x1231   : > { %v1179_v4 = vmul.f32 %v1841_v2, %v1177_v3 }
0x1233   : > { %1181 = vrot.lane.b32.xlu0 %v1179_v4, %s1878_s14 }
0x12a5   : > { %v1182_v9 = vpop.permute.xlu0 %1181 }
0x12a6   : > { %v1184_v10 = vadd.f32 %v1182_v9, %v1174_v7 }
0x12a8   : > { %1842 = vtanh.f32 %v1184_v10 }
0x12b2   : > { %v1843_v11 = vpop.eup %1842 }
0x12b3   : > { %1187 = vrot.lane.b32.xlu1 %v1843_v11, %s1878_s14 }
0x12b7   : > { %1192 = vrot.lane.b32.xlu1 %v1184_v10, %s1879_s15 }
0x1325   : > { %v1188_v12 = vpop.permute.xlu1 %1187 }
0x1326   : > { %v1190_v13 = vmul.f32 %v1841_v2, %v1188_v12 }
0x1328   : > { %1197 = vrot.lane.b32.xlu0 %v1190_v13, %s1880_s16 }
0x1329   : > { %v1193_v14 = vpop.permute.xlu1 %1192 }
0x132a   : > { %1195 = vst.msk [vmem:[%s1973_s27] sm:$0xff] %vm409_vm1, %v1193_v14 }
0x1331   : > { %v1261_v15 = vld [vmem:[%s1973_s27] sm:$0xff] }
0x1332   : > { %1263 = vrot.lane.b32.xlu1 %v1261_v15, %s1878_s14 }
0x139a   : > { %v1198_v16 = vpop.permute.xlu0 %1197 }
0x139b   : > { %1200 = vst.msk [vmem:[%s1968_s26] sm:$0xff] %vm409_vm1, %v1198_v16  ;;  %1621 = vst.msk [vmem:[%s1476_s29 + $0x30] sm:$0xff] %vm409_vm1, %v1198_v16 }
0x13a2   : > { %v1208_v17 = vld [vmem:[%s1968_s26] sm:$0xff] }
0x13a3   : > { %v1209_v18 = vpack.c.bf16 %v1208_v17, %v1208_v17 }
0x13a4   : > { %v1264_v32 = vpop.permute.xlu1 %1263 }
0x13a5   : > { %1749 = vmatmul.mubr.msk.bf16.vlgmr.msra.gmra.mrb[16].mxu1 %vm409_vm1, %v1209_v18 }
0x1478   : > { %v1247_v20 = vpop.f32.mrb[16].mxu1 }
0x1479   : > { %v1253_v21 = vadd.f32 %v1623_v19, %v1247_v20  ;;  %v1750_v22 = vpop.f32.mrb[17].mxu1 }
0x147a   : > { %v1250_v23 = vpop.f32.mrb[18].mxu1 }
0x147b   : > { %1844 = vtanh.f32 %v1253_v21  ;;  %v1751_v24 = vpop.f32.mrb[19].mxu1  ;;  %v1625_v26 = vmul.f32 -1.442695, %v1253_v21 }
0x147d   : > { %1846 = vpow2.f32 %v1625_v26 }
0x1485   : > { %v1845_v25 = vpop.eup %1844 }
0x1486   : > { %1268 = vrot.lane.b32.xlu0 %v1845_v25, %s1878_s14 }
0x1487   : > { %v1847_v27 = vpop.eup %1846 }
0x1488   : > { %v1257_v28 = vadd.f32 1.0, %v1847_v27 }
0x148a   : > { %1848 = vrcp.f32 %v1257_v28 }
0x1494   : > { %v1849_v29 = vpop.eup %1848 }
0x1495   : > { %v1266_v33 = vmul.f32 %v1849_v29, %v1264_v32 }
0x14f8   : > { %v1269_v30 = vpop.permute.xlu0 %1268 }
0x14f9   : > { %v1271_v31 = vmul.f32 %v1849_v29, %v1269_v30 }
0x14fb   : > { %1273 = vrot.lane.b32.xlu0 %v1271_v31, %s1878_s14 }
0x156d   : > { %v1274_v34 = vpop.permute.xlu0 %1273 }
0x156e   : > { %v1276_v35 = vadd.f32 %v1274_v34, %v1266_v33 }
0x1570   : > { %1850 = vtanh.f32 %v1276_v35 }
0x157a   : > { %v1851_v36 = vpop.eup %1850 }
0x157b   : > { %1279 = vrot.lane.b32.xlu1 %v1851_v36, %s1878_s14  ;;  %s396_s14 = scalar_lea.vmem %s2215_s6, %s1640_s9 }
0x157f   : > { %1284 = vrot.lane.b32.xlu1 %v1276_v35, %s1879_s15 }
0x15ed   : > { %v1280_v37 = vpop.permute.xlu1 %1279 }
0x15ee   : > { %v1282_v38 = vmul.f32 %v1849_v29, %v1280_v37 }
0x15f0   : > { %1289 = vrot.lane.b32.xlu0 %v1282_v38, %s1880_s16 }
0x15f1   : > { %v1285_v39 = vpop.permute.xlu1 %1284 }
0x15f2   : > { %1287 = vst.msk [vmem:[%s1973_s27] sm:$0xff] %vm409_vm1, %v1285_v39 }
0x1662   : > { %v1290_v6 = vpop.permute.xlu0 %1289 }
0x1663   : > { %1292 = vst.msk [vmem:[%s1968_s26] sm:$0xff] %vm409_vm1, %v1290_v6  ;;  %1627 = vst.msk [vmem:[%s1484_s8 + $0x38] sm:$0xff] %vm409_vm1, %v1290_v6 }
0x166a   : > { %v1295_v40 = vld [vmem:[#allocation3] sm:$0xff]  ;;  %v1296_v41 = vld [vmem:[#allocation3 + $0x8] sm:$0xff]  ;;  %v1297_v1 = vld [vmem:[#allocation3 + $0x10] sm:$0xff] }
0x166b   : > { %v1298_v8 = vld [vmem:[#allocation3 + $0x18] sm:$0xff]  ;;  %v1299_v42 = vld [vmem:[#allocation3 + $0x20] sm:$0xff]  ;;  %v1300_v43 = vld [vmem:[#allocation3 + $0x28] sm:$0xff]  ;;  %v1641_v44 = vpack.c.bf16 %v1295_v40, %v1295_v40  ;;  %v1642_v45 = vpack.c.bf16 %v1296_v41, %v1296_v41  ;;  %v1643_v46 = vpack.c.bf16 %v1297_v1, %v1297_v1 }
0x166c   : > { %v1301_v47 = vld [vmem:[#allocation3 + $0x30] sm:$0xff]  ;;  %v1302_v48 = vld [vmem:[#allocation3 + $0x38] sm:$0xff]  ;;  %v1644_v49 = vpack.c.bf16 %v1298_v8, %v1298_v8  ;;  %v1645_v50 = vpack.c.bf16 %v1299_v42, %v1299_v42  ;;  %v1646_v51 = vpack.c.bf16 %v1300_v43, %v1300_v43 }
0x166d   : > { %v1647_v52 = vpack.c.bf16 %v1301_v47, %v1301_v47  ;;  %v1648_v53 = vpack.c.bf16 %v1302_v48, %v1302_v48  ;;  %1336 = vst.msk [vmem:[%s396_s14] sm:$0xf] %vm1335_vm3, %v1641_v44  ;;  %1337 = vst.msk [vmem:[%s396_s14 + $0x4] sm:$0xf] %vm1335_vm3, %v1642_v45 }
0x166e   : > { %1338 = vst.msk [vmem:[%s396_s14 + $0x8] sm:$0xf] %vm1335_vm3, %v1643_v46  ;;  %1339 = vst.msk [vmem:[%s396_s14 + $0xc] sm:$0xf] %vm1335_vm3, %v1644_v49 }
0x166f   : > { %1340 = vst.msk [vmem:[%s396_s14 + $0x10] sm:$0xf] %vm1335_vm3, %v1645_v50  ;;  %1341 = vst.msk [vmem:[%s396_s14 + $0x14] sm:$0xf] %vm1335_vm3, %v1646_v51 }
0x1670   : > { %1342 = vst.msk [vmem:[%s396_s14 + $0x18] sm:$0xf] %vm1335_vm3, %v1647_v52  ;;  %1343 = vst.msk [vmem:[%s396_s14 + $0x1c] sm:$0xf] %vm1335_vm3, %v1648_v53 }
0x1671 PF: > { %s16_s23 = sadd.s32 1, %s1874_s23   ;;  %s2216_s21 = smov %s1870_s22 }
0x1672   : > { %p13_p5 = scmp.ge.s32.totalorder %s16_s23, 4   ;;  %s2217_s22 = smov %s2219_s24 }
0x1674   :  { %15 = sbr.rel (!%p13_p5) target bundleno = 2 (0x2), region = 113 }

</bundles_post_ra>
